<compile_context>
chip_gen: v6e
topology: v6e:2x2x1
jax: 0.10.0
libtpu: 0.0.40
codegen_flags: <defaults>
</compile_context>

<pallas_src>
import functools

import jax
import jax.numpy as jnp
from jax.experimental import pallas as pl
from jax.experimental.pallas import tpu as pltpu

_MXU_DTYPE = jnp.bfloat16                 # matmul operand dtype (accumulate in f32)
_VMEM_LIMIT = 48 * 1024 * 1024            # scoped-VMEM budget (fits v7x's 64 MiB)
_LN_EPS = 1e-5


def _pick_tile(dim, candidates):
    """Largest candidate tile that evenly divides `dim`, else the full dim."""
    for c in candidates:
        if dim >= c and dim % c == 0:
            return c
    # TODO(synk): pad M/N up to a 128/256 multiple (and slice the result) instead of
    # falling back to the full dimension for huge non-divisible dims (e.g. 32k vocab).
    return dim


# -----------------------------------------------------------------------------
# Tiled linear:  y = x @ w + b   (w streamed in bf16, f32 VMEM accumulator)
# -----------------------------------------------------------------------------
def _linear_kernel(x_ref, w_ref, b_ref, o_ref, acc_ref):
    @pl.when(pl.program_id(2) == 0)
    def _init():
        acc_ref[...] = jnp.zeros_like(acc_ref)

    acc_ref[...] += jnp.dot(
        x_ref[...].astype(_MXU_DTYPE),
        w_ref[...].astype(_MXU_DTYPE),
        preferred_element_type=jnp.float32,
    )

    @pl.when(pl.program_id(2) == pl.num_programs(2) - 1)
    def _finalize():
        o_ref[...] = (acc_ref[...] + b_ref[...]).astype(o_ref.dtype)


def pallas_linear(x, w, b, out_dtype=jnp.float32):
    """x: [M, K], w: [K, N] (bf16 ok), b: [N] -> [M, N] in out_dtype."""
    M, K = x.shape
    N = w.shape[1]
    tm = _pick_tile(M, (512, 256, 128))
    tn = _pick_tile(N, (512, 256, 128))
    tk = _pick_tile(K, (1024, 512, 256, 128))
    grid = (M // tm, N // tn, K // tk)
    return pl.pallas_call(
        _linear_kernel,
        grid=grid,
        out_shape=jax.ShapeDtypeStruct((M, N), out_dtype),
        in_specs=[
            pl.BlockSpec((tm, tk), lambda i, j, k: (i, k)),
            pl.BlockSpec((tk, tn), lambda i, j, k: (k, j)),
            pl.BlockSpec((1, tn), lambda i, j, k: (0, j)),
        ],
        out_specs=pl.BlockSpec((tm, tn), lambda i, j, k: (i, j)),
        scratch_shapes=[pltpu.VMEM((tm, tn), jnp.float32)],
        compiler_params=pltpu.CompilerParams(
            dimension_semantics=("parallel", "parallel", "arbitrary"),
            vmem_limit_bytes=_VMEM_LIMIT,
        ),
    )(x, w, b.reshape(1, N))


# -----------------------------------------------------------------------------
# Linear + residual-add + LayerNorm fused epilogue:
#   y = LayerNorm(resid + (x @ w + b)) * gamma + beta
# Output tile keeps the full N (= hid_dim) row so LN stats are computed in-kernel.
# -----------------------------------------------------------------------------
def _linear_addln_kernel(x_ref, w_ref, b_ref, r_ref, g_ref, bln_ref, o_ref, acc_ref, *, eps):
    @pl.when(pl.program_id(1) == 0)
    def _init():
        acc_ref[...] = jnp.zeros_like(acc_ref)

    acc_ref[...] += jnp.dot(
        x_ref[...].astype(_MXU_DTYPE),
        w_ref[...].astype(_MXU_DTYPE),
        preferred_element_type=jnp.float32,
    )

    @pl.when(pl.program_id(1) == pl.num_programs(1) - 1)
    def _finalize():
        y = acc_ref[...] + b_ref[...] + r_ref[...]
        mean = jnp.mean(y, axis=-1, keepdims=True)
        var = jnp.mean(jnp.square(y - mean), axis=-1, keepdims=True)
        yn = (y - mean) * jax.lax.rsqrt(var + eps)
        o_ref[...] = (yn * g_ref[...] + bln_ref[...]).astype(o_ref.dtype)


def pallas_linear_add_ln(x, w, b, resid, gamma, beta, eps=_LN_EPS):
    """x: [M, K], w: [K, N], resid: [M, N] (f32) -> f32 [M, N]."""
    M, K = x.shape
    N = w.shape[1]
    tm = _pick_tile(M, (512, 256, 128))
    tk = _pick_tile(K, (1024, 512, 256, 128))
    grid = (M // tm, K // tk)
    kernel = functools.partial(_linear_addln_kernel, eps=eps)
    return pl.pallas_call(
        kernel,
        grid=grid,
        out_shape=jax.ShapeDtypeStruct((M, N), jnp.float32),
        in_specs=[
            pl.BlockSpec((tm, tk), lambda i, k: (i, k)),
            pl.BlockSpec((tk, N), lambda i, k: (k, 0)),
            pl.BlockSpec((1, N), lambda i, k: (0, 0)),
            pl.BlockSpec((tm, N), lambda i, k: (i, 0)),
            pl.BlockSpec((1, N), lambda i, k: (0, 0)),
            pl.BlockSpec((1, N), lambda i, k: (0, 0)),
        ],
        out_specs=pl.BlockSpec((tm, N), lambda i, k: (i, 0)),
        scratch_shapes=[pltpu.VMEM((tm, N), jnp.float32)],
        compiler_params=pltpu.CompilerParams(
            dimension_semantics=("parallel", "arbitrary"),
            vmem_limit_bytes=_VMEM_LIMIT,
        ),
    )(x, w, b.reshape(1, N), resid, gamma.reshape(1, N), beta.reshape(1, N))


# -----------------------------------------------------------------------------
# Fused FFN + residual-add + LayerNorm:
#   y = LayerNorm(x + relu(x @ W1 + b1) @ W2 + b2) * gamma + beta
# The [tm, pf] intermediate never leaves VMEM; x doubles as the residual.
# -----------------------------------------------------------------------------
def _ffn_addln_kernel(x_ref, w1_ref, b1_ref, w2_ref, b2_ref, g_ref, bln_ref,
                      o_ref, acc_ref, *, eps):
    @pl.when(pl.program_id(1) == 0)
    def _init():
        acc_ref[...] = jnp.zeros_like(acc_ref)

    h = jnp.dot(
        x_ref[...].astype(_MXU_DTYPE),
        w1_ref[...].astype(_MXU_DTYPE),
        preferred_element_type=jnp.float32,
    ) + b1_ref[...]
    h = jnp.maximum(h, 0.0)
    acc_ref[...] += jnp.dot(
        h.astype(_MXU_DTYPE),
        w2_ref[...].astype(_MXU_DTYPE),
        preferred_element_type=jnp.float32,
    )

    @pl.when(pl.program_id(1) == pl.num_programs(1) - 1)
    def _finalize():
        y = acc_ref[...] + b2_ref[...] + x_ref[...]        # x_ref is the f32 residual
        mean = jnp.mean(y, axis=-1, keepdims=True)
        var = jnp.mean(jnp.square(y - mean), axis=-1, keepdims=True)
        yn = (y - mean) * jax.lax.rsqrt(var + eps)
        o_ref[...] = (yn * g_ref[...] + bln_ref[...]).astype(o_ref.dtype)


def pallas_ffn_add_ln(x, w1, b1, w2, b2, gamma, beta, eps=_LN_EPS):
    """x: [M, H] f32 (also the residual), w1: [H, PF], w2: [PF, H] -> f32 [M, H]."""
    M, H = x.shape
    PF = w1.shape[1]
    tm = _pick_tile(M, (256, 128))
    tp = _pick_tile(PF, (1024, 512, 256, 128))
    grid = (M // tm, PF // tp)
    kernel = functools.partial(_ffn_addln_kernel, eps=eps)
    return pl.pallas_call(
        kernel,
        grid=grid,
        out_shape=jax.ShapeDtypeStruct((M, H), jnp.float32),
        in_specs=[
            pl.BlockSpec((tm, H), lambda i, p: (i, 0)),
            pl.BlockSpec((H, tp), lambda i, p: (0, p)),
            pl.BlockSpec((1, tp), lambda i, p: (0, p)),
            pl.BlockSpec((tp, H), lambda i, p: (p, 0)),
            pl.BlockSpec((1, H), lambda i, p: (0, 0)),
            pl.BlockSpec((1, H), lambda i, p: (0, 0)),
            pl.BlockSpec((1, H), lambda i, p: (0, 0)),
        ],
        out_specs=pl.BlockSpec((tm, H), lambda i, p: (i, 0)),
        scratch_shapes=[pltpu.VMEM((tm, H), jnp.float32)],
        compiler_params=pltpu.CompilerParams(
            dimension_semantics=("parallel", "arbitrary"),
            vmem_limit_bytes=_VMEM_LIMIT,
        ),
    )(x, w1, b1.reshape(1, PF), w2, b2.reshape(1, H),
      gamma.reshape(1, H), beta.reshape(1, H))


# -----------------------------------------------------------------------------
# Multi-head attention core (per-batch grid step; heads kept in VMEM, single
# lane-dense (Tq, H) context store)
# -----------------------------------------------------------------------------
def _mha_core(q, k, v, mask2d, *, n_heads, hid_dim):
    """q: (Tq, H) bf16; k, v: (Tk, H) bf16; mask2d broadcastable to (Tq, Tk).

    Returns (ctx (Tq, H) f32, attn (n_heads, Tq, Tk) f32)."""
    hd = hid_dim // n_heads
    inv_scale = jnp.float32(1.0 / (float(hd) ** 0.5))
    masked = mask2d == 0                       # hoisted out of the per-head loop
    ctx_list = []
    attn_list = []
    # TODO(synk): for head_dim >= 128 use lane-aligned head-major packing + batched
    # dot_general (or lax.fori_loop) instead of this small unrolled per-head loop, and
    # flash-style Tq/Tk tiling with online softmax for long sequences (v7x VMEM budget).
    for h in range(n_heads):
        lo, hi = h * hd, (h + 1) * hd
        qh = q[:, lo:hi]
        kh = k[:, lo:hi]
        vh = v[:, lo:hi]
        # energy = (Q @ K^T) / sqrt(hd), f32 accumulate
        energy = jax.lax.dot_general(
            qh, kh, (((1,), (1,)), ((), ())),
            preferred_element_type=jnp.float32) * inv_scale
        energy = jnp.where(masked, jnp.float32(-1e10), energy)
        energy = energy - jnp.max(energy, axis=-1, keepdims=True)
        p = jnp.exp(energy)
        attn = p * pl.reciprocal(jnp.sum(p, axis=-1, keepdims=True), approx=True)
        ctx = jnp.dot(attn.astype(_MXU_DTYPE), vh, preferred_element_type=jnp.float32)
        ctx_list.append(ctx)
        attn_list.append(attn)
    ctx_all = jnp.concatenate(ctx_list, axis=-1)      # (Tq, H), lane-dense store later
    attn_all = jnp.stack(attn_list, axis=0)           # (n_heads, Tq, Tk)
    return ctx_all, attn_all


def _mha_self_kernel(qkv_ref, m_ref, o_ref, *, n_heads, hid_dim):
    qkv = qkv_ref[0]                                   # (Tq, 3H) bf16: [Q | K | V]
    H = hid_dim
    ctx, _ = _mha_core(qkv[:, :H], qkv[:, H:2 * H], qkv[:, 2 * H:], m_ref[0],
                       n_heads=n_heads, hid_dim=H)
    o_ref[...] = ctx[None].astype(o_ref.dtype)


def _mha_cross_kernel(q_ref, kv_ref, m_ref, o_ref, *, n_heads, hid_dim):
    kv = kv_ref[0]                                     # (Tk, 2H) bf16: [K | V]
    ctx, _ = _mha_core(q_ref[0], kv[:, :hid_dim], kv[:, hid_dim:], m_ref[0],
                       n_heads=n_heads, hid_dim=hid_dim)
    o_ref[...] = ctx[None].astype(o_ref.dtype)


def _mha_cross_attn_kernel(q_ref, kv_ref, m_ref, o_ref, a_ref, *, n_heads, hid_dim):
    kv = kv_ref[0]
    ctx, attn = _mha_core(q_ref[0], kv[:, :hid_dim], kv[:, hid_dim:], m_ref[0],
                          n_heads=n_heads, hid_dim=hid_dim)
    o_ref[...] = ctx[None].astype(o_ref.dtype)
    a_ref[...] = attn[None].astype(a_ref.dtype)


def pallas_self_attention(qkv, mask, n_heads):
    """qkv: [B, Tq, 3H] bf16, mask: [B, Tq, Tq] f32 -> bf16 [B, Tq, H]."""
    B, Tq, H3 = qkv.shape
    H = H3 // 3
    kernel = functools.partial(_mha_self_kernel, n_heads=n_heads, hid_dim=H)
    return pl.pallas_call(
        kernel,
        grid=(B,),
        out_shape=jax.ShapeDtypeStruct((B, Tq, H), _MXU_DTYPE),
        in_specs=[
            pl.BlockSpec((1, Tq, H3), lambda i: (i, 0, 0)),
            pl.BlockSpec((1, Tq, Tq), lambda i: (i, 0, 0)),
        ],
        out_specs=pl.BlockSpec((1, Tq, H), lambda i: (i, 0, 0)),
        compiler_params=pltpu.CompilerParams(
            dimension_semantics=("parallel",),
            vmem_limit_bytes=_VMEM_LIMIT,
        ),
    )(qkv, mask)


def pallas_cross_attention(q, kv, mask, n_heads, need_attn):
    """q: [B, Tq, H] bf16, kv: [B, Tk, 2H] bf16, mask: [B, 1, Tk] f32.

    Returns (ctx bf16 [B, Tq, H], attn f32 [B, n_heads, Tq, Tk] or None)."""
    B, Tq, H = q.shape
    Tk = kv.shape[1]
    in_specs = [
        pl.BlockSpec((1, Tq, H), lambda i: (i, 0, 0)),
        pl.BlockSpec((1, Tk, 2 * H), lambda i: (i, 0, 0)),
        pl.BlockSpec((1, 1, Tk), lambda i: (i, 0, 0)),
    ]
    if need_attn:
        kernel = functools.partial(_mha_cross_attn_kernel, n_heads=n_heads, hid_dim=H)
        out, attn = pl.pallas_call(
            kernel,
            grid=(B,),
            out_shape=(
                jax.ShapeDtypeStruct((B, Tq, H), _MXU_DTYPE),
                jax.ShapeDtypeStruct((B, n_heads, Tq, Tk), jnp.float32),
            ),
            in_specs=in_specs,
            out_specs=(
                pl.BlockSpec((1, Tq, H), lambda i: (i, 0, 0)),
                pl.BlockSpec((1, n_heads, Tq, Tk), lambda i: (i, 0, 0, 0)),
            ),
            compiler_params=pltpu.CompilerParams(
                dimension_semantics=("parallel",),
                vmem_limit_bytes=_VMEM_LIMIT,
            ),
        )(q, kv, mask)
        return out, attn
    kernel = functools.partial(_mha_cross_kernel, n_heads=n_heads, hid_dim=H)
    out = pl.pallas_call(
        kernel,
        grid=(B,),
        out_shape=jax.ShapeDtypeStruct((B, Tq, H), _MXU_DTYPE),
        in_specs=in_specs,
        out_specs=pl.BlockSpec((1, Tq, H), lambda i: (i, 0, 0)),
        compiler_params=pltpu.CompilerParams(
            dimension_semantics=("parallel",),
            vmem_limit_bytes=_VMEM_LIMIT,
        ),
    )(q, kv, mask)
    return out, None


# -----------------------------------------------------------------------------
# Model glue (plain JAX orchestration around the Pallas kernels)
# -----------------------------------------------------------------------------
def decoder_layer(p, trg, enc_src, trg_mask3, src_mask2, n_heads, need_attn):
    B, T, H = trg.shape
    S = enc_src.shape[1]
    sa, ea = p["self_attn"], p["enc_attn"]

    # --- self attention; Wo projection fused with residual-add + LayerNorm ---
    qkv = pallas_linear(trg.reshape(B * T, H), sa["w_qkv"], sa["b_qkv"],
                        out_dtype=_MXU_DTYPE).reshape(B, T, 3 * H)
    ctx = pallas_self_attention(qkv, trg_mask3, n_heads)              # bf16
    trg = pallas_linear_add_ln(ctx.reshape(B * T, H), sa["wo"], sa["bo"],
                               trg.reshape(B * T, H), p["ln1_g"], p["ln1_b"]
                               ).reshape(B, T, H)

    # --- encoder (cross) attention; Wo projection fused with add + LayerNorm ---
    q = pallas_linear(trg.reshape(B * T, H), ea["wq"], ea["bq"],
                      out_dtype=_MXU_DTYPE).reshape(B, T, H)
    kv = pallas_linear(enc_src.reshape(B * S, H), ea["w_kv"], ea["b_kv"],
                       out_dtype=_MXU_DTYPE).reshape(B, S, 2 * H)
    ctx2, attention = pallas_cross_attention(q, kv, src_mask2, n_heads, need_attn)
    trg = pallas_linear_add_ln(ctx2.reshape(B * T, H), ea["wo"], ea["bo"],
                               trg.reshape(B * T, H), p["ln2_g"], p["ln2_b"]
                               ).reshape(B, T, H)

    # --- position-wise feed-forward fused with residual-add + LayerNorm ---
    trg = pallas_ffn_add_ln(trg.reshape(B * T, H), p["ff_w1"], p["ff_b1"],
                            p["ff_w2"], p["ff_b2"], p["ln3_g"], p["ln3_b"]
                            ).reshape(B, T, H)
    return trg, attention


def decoder_forward(params, trg_tokens, enc_src, trg_mask, src_mask, *, n_heads, hid_dim):
    B, T = trg_tokens.shape
    pos = jnp.broadcast_to(jnp.arange(T, dtype=jnp.int32)[None, :], (B, T))
    scale = jnp.sqrt(jnp.float32(hid_dim))
    # Embedding lookup is a gather (XLA glue). Dropout treated as identity (eval / p=0).
    # TODO(synk): RNG-based dropout kernel not implemented (inference semantics).
    x = params["tok_emb"][trg_tokens] * scale + params["pos_emb"][pos]

    # Masks: squeeze the broadcast head dim; keep the src padding mask as [B, 1, S]
    # (broadcast in VMEM) instead of materializing a [B, T, S] block.
    trg_mask3 = trg_mask[:, 0].astype(jnp.float32)      # [B, T, T]
    src_mask2 = src_mask[:, 0].astype(jnp.float32)      # [B, 1, S]

    attention = None
    n_layers = len(params["layers"])
    for li, lp in enumerate(params["layers"]):
        need_attn = (li == n_layers - 1)   # only the returned attention is materialized
        x, attn = decoder_layer(lp, x, enc_src, trg_mask3, src_mask2, n_heads, need_attn)
        if attn is not None:
            attention = attn

    out = pallas_linear(x.reshape(B * T, hid_dim), params["w_out"], params["b_out"])
    return out.reshape(B, T, -1), attention


# -----------------------------------------------------------------------------
# Deterministic parameter init (shapes follow the PyTorch module's __init__).
# Matmul weights are stored in bf16; biases / LN params / embeddings stay f32.
# -----------------------------------------------------------------------------
def _init_linear(key, fan_in, fan_out):
    kw, kb = jax.random.split(key)
    lim = 1.0 / (fan_in ** 0.5)
    w = jax.random.uniform(kw, (fan_in, fan_out), jnp.float32, -lim, lim)
    b = jax.random.uniform(kb, (fan_out,), jnp.float32, -lim, lim)
    return w, b


def _init_mha_self(key, hid_dim):
    ks = jax.random.split(key, 4)
    wq, bq = _init_linear(ks[0], hid_dim, hid_dim)
    wk, bk = _init_linear(ks[1], hid_dim, hid_dim)
    wv, bv = _init_linear(ks[2], hid_dim, hid_dim)
    wo, bo = _init_linear(ks[3], hid_dim, hid_dim)
    return dict(w_qkv=jnp.concatenate([wq, wk, wv], axis=1).astype(_MXU_DTYPE),
                b_qkv=jnp.concatenate([bq, bk, bv]),
                wo=wo.astype(_MXU_DTYPE), bo=bo)


def _init_mha_cross(key, hid_dim):
    ks = jax.random.split(key, 4)
    wq, bq = _init_linear(ks[0], hid_dim, hid_dim)
    wk, bk = _init_linear(ks[1], hid_dim, hid_dim)
    wv, bv = _init_linear(ks[2], hid_dim, hid_dim)
    wo, bo = _init_linear(ks[3], hid_dim, hid_dim)
    return dict(wq=wq.astype(_MXU_DTYPE), bq=bq,
                w_kv=jnp.concatenate([wk, wv], axis=1).astype(_MXU_DTYPE),
                b_kv=jnp.concatenate([bk, bv]),
                wo=wo.astype(_MXU_DTYPE), bo=bo)


def init_decoder_params(key, output_dim, hid_dim, n_layers, pf_dim, max_length=500):
    keys = jax.random.split(key, 3 + n_layers)
    params = {
        "tok_emb": jax.random.normal(keys[0], (output_dim, hid_dim), jnp.float32) * 0.02,
        "pos_emb": jax.random.normal(keys[1], (max_length, hid_dim), jnp.float32) * 0.02,
    }
    w_out, b_out = _init_linear(keys[2], hid_dim, output_dim)
    params["w_out"], params["b_out"] = w_out.astype(_MXU_DTYPE), b_out

    layers = []
    for li in range(n_layers):
        lk = jax.random.split(keys[3 + li], 4)
        ff_w1, ff_b1 = _init_linear(lk[2], hid_dim, pf_dim)
        ff_w2, ff_b2 = _init_linear(lk[3], pf_dim, hid_dim)
        layers.append(dict(
            self_attn=_init_mha_self(lk[0], hid_dim),
            enc_attn=_init_mha_cross(lk[1], hid_dim),
            ff_w1=ff_w1.astype(_MXU_DTYPE), ff_b1=ff_b1,
            ff_w2=ff_w2.astype(_MXU_DTYPE), ff_b2=ff_b2,
            ln1_g=jnp.ones((hid_dim,), jnp.float32), ln1_b=jnp.zeros((hid_dim,), jnp.float32),
            ln2_g=jnp.ones((hid_dim,), jnp.float32), ln2_b=jnp.zeros((hid_dim,), jnp.float32),
            ln3_g=jnp.ones((hid_dim,), jnp.float32), ln3_b=jnp.zeros((hid_dim,), jnp.float32),
        ))
    params["layers"] = layers
    return params


# -----------------------------------------------------------------------------
if __name__ == "__main__":
    # Small shapes consistent with the module.
    B, trg_len, src_len = 2, 8, 8
    output_dim, hid_dim, n_layers, n_heads, pf_dim = 20, 32, 2, 4, 64

    key = jax.random.PRNGKey(0)
    kp, kt, ke = jax.random.split(key, 3)

    params = init_decoder_params(kp, output_dim, hid_dim, n_layers, pf_dim)

    trg_tokens = jax.random.randint(kt, (B, trg_len), 0, output_dim, dtype=jnp.int32)
    enc_src = jax.random.normal(ke, (B, src_len, hid_dim), jnp.float32)

    # Causal target mask [B, 1, T, T]; full source mask [B, 1, 1, S].
    trg_mask = jnp.broadcast_to(
        jnp.tril(jnp.ones((trg_len, trg_len), jnp.float32))[None, None],
        (B, 1, trg_len, trg_len))
    src_mask = jnp.ones((B, 1, 1, src_len), jnp.float32)

    fwd = jax.jit(functools.partial(decoder_forward, n_heads=n_heads, hid_dim=hid_dim))
    output, attention = fwd(params, trg_tokens, enc_src, trg_mask, src_mask)
    jax.block_until_ready((output, attention))

    assert output.shape == (B, trg_len, output_dim)
    assert attention.shape == (B, n_heads, trg_len, src_len)
    assert bool(jnp.all(jnp.isfinite(output)))
    assert bool(jnp.all(jnp.isfinite(attention)))
    print("KERNEL_OK")
</pallas_src>

<mosaic_0001>
module attributes {stable_mosaic.version = 11 : i64} {
  func.func @_linear_kernel(%arg0: i32, %arg1: i32, %arg2: i32, %arg3: memref<16x32xf32, #tpu.memory_space<vmem>>, %arg4: memref<32x96xbf16, #tpu.memory_space<vmem>>, %arg5: memref<1x96xf32, #tpu.memory_space<vmem>>, %arg6: memref<16x96xbf16, #tpu.memory_space<vmem>>, %arg7: memref<16x96xf32, #tpu.memory_space<vmem>>) attributes {dimension_semantics = [#tpu.dimension_semantics<parallel>, #tpu.dimension_semantics<parallel>, #tpu.dimension_semantics<arbitrary>], iteration_bounds = array<i64: 1, 1, 1>, scalar_prefetch = 0 : i64, scratch_operands = 1 : i64, tpu.core_type = #tpu.core_type<tc>, window_params = [{transform_indices = @transform_0, window_bounds = array<i64: 16, 32>}, {transform_indices = @transform_1, window_bounds = array<i64: 32, 96>}, {transform_indices = @transform_2, window_bounds = array<i64: 1, 96>}, {transform_indices = @transform_3, window_bounds = array<i64: 16, 96>}]} {
    %c0_i32 = arith.constant 0 : i32
    %0 = arith.cmpi eq, %arg2, %c0_i32 : i32
    %1 = arith.extui %0 : i1 to i32
    %c0_i32_0 = arith.constant 0 : i32
    %2 = arith.cmpi ne, %1, %c0_i32_0 : i32
    scf.if %2 {
      %cst_10 = arith.constant 0.000000e+00 : f32
      %13 = vector.broadcast %cst_10 : f32 to vector<16x96xf32>
      %c0_11 = arith.constant 0 : index
      %c0_12 = arith.constant 0 : index
      %14 = vector.load %arg7[%c0_11, %c0_12] : memref<16x96xf32, #tpu.memory_space<vmem>>, vector<16x96xf32>
      tpu.vector_store %arg7[%c0_11, %c0_12], %13 {strides = array<i32>} : memref<16x96xf32, #tpu.memory_space<vmem>>, vector<16x96xf32>,
    } else {
    }
    %c0 = arith.constant 0 : index
    %c0_1 = arith.constant 0 : index
    %3 = vector.load %arg7[%c0, %c0_1] : memref<16x96xf32, #tpu.memory_space<vmem>>, vector<16x96xf32>
    %c0_2 = arith.constant 0 : index
    %c0_3 = arith.constant 0 : index
    %4 = vector.load %arg3[%c0_2, %c0_3] : memref<16x32xf32, #tpu.memory_space<vmem>>, vector<16x32xf32>
    %5 = arith.truncf %4 : vector<16x32xf32> to vector<16x32xbf16>
    %c0_4 = arith.constant 0 : index
    %c0_5 = arith.constant 0 : index
    %6 = vector.load %arg4[%c0_4, %c0_5] : memref<32x96xbf16, #tpu.memory_space<vmem>>, vector<32x96xbf16>
    %cst = arith.constant dense<0.000000e+00> : vector<16x96xf32>
    %7 = tpu.matmul %5, %6, %cst {dimension_numbers = #tpu.dot_dimension_numbers<[1], [0], [0], [1], [0, 0, 1, 1], [], []>} : vector<16x32xbf16>, vector<32x96xbf16>, vector<16x96xf32> -> vector<16x96xf32>
    %8 = arith.addf %3, %7 : vector<16x96xf32>
    %c0_6 = arith.constant 0 : index
    %c0_7 = arith.constant 0 : index
    %9 = vector.load %arg7[%c0_6, %c0_7] : memref<16x96xf32, #tpu.memory_space<vmem>>, vector<16x96xf32>
    tpu.vector_store %arg7[%c0_6, %c0_7], %8 {strides = array<i32>} : memref<16x96xf32, #tpu.memory_space<vmem>>, vector<16x96xf32>,
    %c0_i32_8 = arith.constant 0 : i32
    %10 = arith.cmpi eq, %arg2, %c0_i32_8 : i32
    %11 = arith.extui %10 : i1 to i32
    %c0_i32_9 = arith.constant 0 : i32
    %12 = arith.cmpi ne, %11, %c0_i32_9 : i32
    scf.if %12 {
      %c0_10 = arith.constant 0 : index
      %c0_11 = arith.constant 0 : index
      %13 = vector.load %arg7[%c0_10, %c0_11] : memref<16x96xf32, #tpu.memory_space<vmem>>, vector<16x96xf32>
      %c0_12 = arith.constant 0 : index
      %c0_13 = arith.constant 0 : index
      %14 = vector.load %arg5[%c0_12, %c0_13] : memref<1x96xf32, #tpu.memory_space<vmem>>, vector<1x96xf32>
      %15 = vector.broadcast %14 : vector<1x96xf32> to vector<16x96xf32>
      %16 = arith.addf %13, %15 : vector<16x96xf32>
      %17 = arith.truncf %16 : vector<16x96xf32> to vector<16x96xbf16>
      %c0_14 = arith.constant 0 : index
      %c0_15 = arith.constant 0 : index
      %18 = vector.load %arg6[%c0_14, %c0_15] : memref<16x96xbf16, #tpu.memory_space<vmem>>, vector<16x96xbf16>
      tpu.vector_store %arg6[%c0_14, %c0_15], %17 {strides = array<i32>} : memref<16x96xbf16, #tpu.memory_space<vmem>>, vector<16x96xbf16>,
    } else {
    }
    return
  }
  func.func @transform_0(%arg0: i32, %arg1: i32, %arg2: i32) -> (i32, i32) {
    %c0_i32 = arith.constant 0 : i32
    return %arg0, %arg2 : i32, i32
  }
  func.func @transform_1(%arg0: i32, %arg1: i32, %arg2: i32) -> (i32, i32) {
    %c0_i32 = arith.constant 0 : i32
    return %arg2, %arg1 : i32, i32
  }
  func.func @transform_2(%arg0: i32, %arg1: i32, %arg2: i32) -> (i32, i32) {
    %c0_i32 = arith.constant 0 : i32
    %c0_i32_0 = arith.constant 0 : i32
    return %c0_i32, %arg1 : i32, i32
  }
  func.func @transform_3(%arg0: i32, %arg1: i32, %arg2: i32) -> (i32, i32) {
    %c0_i32 = arith.constant 0 : i32
    return %arg0, %arg1 : i32, i32
  }
}

module attributes {stable_mosaic.version = 11 : i64} {
  func.func @_linear_addln_kernel(%arg0: i32, %arg1: i32, %arg2: memref<16x32xbf16, #tpu.memory_space<vmem>>, %arg3: memref<32x32xbf16, #tpu.memory_space<vmem>>, %arg4: memref<1x32xf32, #tpu.memory_space<vmem>>, %arg5: memref<16x32xf32, #tpu.memory_space<vmem>>, %arg6: memref<1x32xf32, #tpu.memory_space<vmem>>, %arg7: memref<1x32xf32, #tpu.memory_space<vmem>>, %arg8: memref<16x32xf32, #tpu.memory_space<vmem>>, %arg9: memref<16x32xf32, #tpu.memory_space<vmem>>) attributes {dimension_semantics = [#tpu.dimension_semantics<parallel>, #tpu.dimension_semantics<arbitrary>], iteration_bounds = array<i64: 1, 1>, scalar_prefetch = 0 : i64, scratch_operands = 1 : i64, tpu.core_type = #tpu.core_type<tc>, window_params = [{transform_indices = @transform_0, window_bounds = array<i64: 16, 32>}, {transform_indices = @transform_1, window_bounds = array<i64: 32, 32>}, {pipeline_mode = #tpu.pipeline_mode<synchronous>, transform_indices = @transform_2, window_bounds = array<i64: 1, 32>}, {transform_indices = @transform_3, window_bounds = array<i64: 16, 32>}, {pipeline_mode = #tpu.pipeline_mode<synchronous>, transform_indices = @transform_4, window_bounds = array<i64: 1, 32>}, {pipeline_mode = #tpu.pipeline_mode<synchronous>, transform_indices = @transform_5, window_bounds = array<i64: 1, 32>}, {transform_indices = @transform_6, window_bounds = array<i64: 16, 32>}]} {
    %c0_i32 = arith.constant 0 : i32
    %0 = arith.cmpi eq, %arg1, %c0_i32 : i32
    %1 = arith.extui %0 : i1 to i32
    %c0_i32_0 = arith.constant 0 : i32
    %2 = arith.cmpi ne, %1, %c0_i32_0 : i32
    scf.if %2 {
      %cst_10 = arith.constant 0.000000e+00 : f32
      %12 = vector.broadcast %cst_10 : f32 to vector<16x32xf32>
      %c0_11 = arith.constant 0 : index
      %c0_12 = arith.constant 0 : index
      %13 = vector.load %arg9[%c0_11, %c0_12] : memref<16x32xf32, #tpu.memory_space<vmem>>, vector<16x32xf32>
      tpu.vector_store %arg9[%c0_11, %c0_12], %12 {strides = array<i32>} : memref<16x32xf32, #tpu.memory_space<vmem>>, vector<16x32xf32>,
    } else {
    }
    %c0 = arith.constant 0 : index
    %c0_1 = arith.constant 0 : index
    %3 = vector.load %arg9[%c0, %c0_1] : memref<16x32xf32, #tpu.memory_space<vmem>>, vector<16x32xf32>
    %c0_2 = arith.constant 0 : index
    %c0_3 = arith.constant 0 : index
    %4 = vector.load %arg2[%c0_2, %c0_3] : memref<16x32xbf16, #tpu.memory_space<vmem>>, vector<16x32xbf16>
    %c0_4 = arith.constant 0 : index
    %c0_5 = arith.constant 0 : index
    %5 = vector.load %arg3[%c0_4, %c0_5] : memref<32x32xbf16, #tpu.memory_space<vmem>>, vector<32x32xbf16>
    %cst = arith.constant dense<0.000000e+00> : vector<16x32xf32>
    %6 = tpu.matmul %4, %5, %cst {dimension_numbers = #tpu.dot_dimension_numbers<[1], [0], [0], [1], [0, 0, 1, 1], [], []>} : vector<16x32xbf16>, vector<32x32xbf16>, vector<16x32xf32> -> vector<16x32xf32>
    %7 = arith.addf %3, %6 : vector<16x32xf32>
    %c0_6 = arith.constant 0 : index
    %c0_7 = arith.constant 0 : index
    %8 = vector.load %arg9[%c0_6, %c0_7] : memref<16x32xf32, #tpu.memory_space<vmem>>, vector<16x32xf32>
    tpu.vector_store %arg9[%c0_6, %c0_7], %7 {strides = array<i32>} : memref<16x32xf32, #tpu.memory_space<vmem>>, vector<16x32xf32>,
    %c0_i32_8 = arith.constant 0 : i32
    %9 = arith.cmpi eq, %arg1, %c0_i32_8 : i32
    %10 = arith.extui %9 : i1 to i32
    %c0_i32_9 = arith.constant 0 : i32
    %11 = arith.cmpi ne, %10, %c0_i32_9 : i32
    scf.if %11 {
      %c0_10 = arith.constant 0 : index
      %c0_11 = arith.constant 0 : index
      %12 = vector.load %arg9[%c0_10, %c0_11] : memref<16x32xf32, #tpu.memory_space<vmem>>, vector<16x32xf32>
      %c0_12 = arith.constant 0 : index
      %c0_13 = arith.constant 0 : index
      %13 = vector.load %arg4[%c0_12, %c0_13] : memref<1x32xf32, #tpu.memory_space<vmem>>, vector<1x32xf32>
      %14 = vector.broadcast %13 : vector<1x32xf32> to vector<16x32xf32>
      %15 = arith.addf %12, %14 : vector<16x32xf32>
      %c0_14 = arith.constant 0 : index
      %c0_15 = arith.constant 0 : index
      %16 = vector.load %arg5[%c0_14, %c0_15] : memref<16x32xf32, #tpu.memory_space<vmem>>, vector<16x32xf32>
      %17 = arith.addf %15, %16 : vector<16x32xf32>
      %cst_16 = arith.constant dense<0.000000e+00> : vector<16xf32>
      %18 = vector.multi_reduction <add>, %17, %cst_16 [1] : vector<16x32xf32> to vector<16xf32>
      %19 = vector.shape_cast %18 : vector<16xf32> to vector<16x1xf32>
      %cst_17 = arith.constant 3.200000e+01 : f32
      %20 = vector.broadcast %cst_17 : f32 to vector<16x1xf32>
      %21 = arith.divf %19, %20 : vector<16x1xf32>
      %22 = vector.broadcast %21 : vector<16x1xf32> to vector<16x32xf32>
      %23 = arith.subf %17, %22 : vector<16x32xf32>
      %24 = arith.mulf %23, %23 : vector<16x32xf32>
      %cst_18 = arith.constant dense<0.000000e+00> : vector<16xf32>
      %25 = vector.multi_reduction <add>, %24, %cst_18 [1] : vector<16x32xf32> to vector<16xf32>
      %26 = vector.shape_cast %25 : vector<16xf32> to vector<16x1xf32>
      %cst_19 = arith.constant 3.200000e+01 : f32
      %27 = vector.broadcast %cst_19 : f32 to vector<16x1xf32>
      %28 = arith.divf %26, %27 : vector<16x1xf32>
      %29 = vector.broadcast %21 : vector<16x1xf32> to vector<16x32xf32>
      %30 = arith.subf %17, %29 : vector<16x32xf32>
      %cst_20 = arith.constant 9.99999974E-6 : f32
      %31 = vector.broadcast %cst_20 : f32 to vector<16x1xf32>
      %32 = arith.addf %28, %31 : vector<16x1xf32>
      %33 = math.rsqrt %32 : vector<16x1xf32>
      %34 = vector.broadcast %33 : vector<16x1xf32> to vector<16x32xf32>
      %35 = arith.mulf %30, %34 : vector<16x32xf32>
      %c0_21 = arith.constant 0 : index
      %c0_22 = arith.constant 0 : index
      %36 = vector.load %arg6[%c0_21, %c0_22] : memref<1x32xf32, #tpu.memory_space<vmem>>, vector<1x32xf32>
      %37 = vector.broadcast %36 : vector<1x32xf32> to vector<16x32xf32>
      %38 = arith.mulf %35, %37 : vector<16x32xf32>
      %c0_23 = arith.constant 0 : index
      %c0_24 = arith.constant 0 : index
      %39 = vector.load %arg7[%c0_23, %c0_24] : memref<1x32xf32, #tpu.memory_space<vmem>>, vector<1x32xf32>
      %40 = vector.broadcast %39 : vector<1x32xf32> to vector<16x32xf32>
      %41 = arith.addf %38, %40 : vector<16x32xf32>
      %c0_25 = arith.constant 0 : index
      %c0_26 = arith.constant 0 : index
      %42 = vector.load %arg8[%c0_25, %c0_26] : memref<16x32xf32, #tpu.memory_space<vmem>>, vector<16x32xf32>
      tpu.vector_store %arg8[%c0_25, %c0_26], %41 {strides = array<i32>} : memref<16x32xf32, #tpu.memory_space<vmem>>, vector<16x32xf32>,
    } else {
    }
    return
  }
  func.func @transform_0(%arg0: i32, %arg1: i32) -> (i32, i32) {
    %c0_i32 = arith.constant 0 : i32
    return %arg0, %arg1 : i32, i32
  }
  func.func @transform_1(%arg0: i32, %arg1: i32) -> (i32, i32) {
    %c0_i32 = arith.constant 0 : i32
    %c0_i32_0 = arith.constant 0 : i32
    return %arg1, %c0_i32 : i32, i32
  }
  func.func @transform_2(%arg0: i32, %arg1: i32) -> (i32, i32) {
    %c0_i32 = arith.constant 0 : i32
    %c0_i32_0 = arith.constant 0 : i32
    %c0_i32_1 = arith.constant 0 : i32
    return %c0_i32, %c0_i32_0 : i32, i32
  }
  func.func @transform_3(%arg0: i32, %arg1: i32) -> (i32, i32) {
    %c0_i32 = arith.constant 0 : i32
    %c0_i32_0 = arith.constant 0 : i32
    return %arg0, %c0_i32 : i32, i32
  }
  func.func @transform_4(%arg0: i32, %arg1: i32) -> (i32, i32) {
    %c0_i32 = arith.constant 0 : i32
    %c0_i32_0 = arith.constant 0 : i32
    %c0_i32_1 = arith.constant 0 : i32
    return %c0_i32, %c0_i32_0 : i32, i32
  }
  func.func @transform_5(%arg0: i32, %arg1: i32) -> (i32, i32) {
    %c0_i32 = arith.constant 0 : i32
    %c0_i32_0 = arith.constant 0 : i32
    %c0_i32_1 = arith.constant 0 : i32
    return %c0_i32, %c0_i32_0 : i32, i32
  }
  func.func @transform_6(%arg0: i32, %arg1: i32) -> (i32, i32) {
    %c0_i32 = arith.constant 0 : i32
    %c0_i32_0 = arith.constant 0 : i32
    return %arg0, %c0_i32 : i32, i32
  }
}

module attributes {stable_mosaic.version = 11 : i64} {
  func.func @_mha_self_kernel(%arg0: i32, %arg1: memref<1x8x96xbf16, #tpu.memory_space<vmem>>, %arg2: memref<1x8x8xf32, #tpu.memory_space<vmem>>, %arg3: memref<1x8x32xbf16, #tpu.memory_space<vmem>>) attributes {dimension_semantics = [#tpu.dimension_semantics<parallel>], iteration_bounds = array<i64: 2>, scalar_prefetch = 0 : i64, scratch_operands = 0 : i64, tpu.core_type = #tpu.core_type<tc>, window_params = [{transform_indices = @transform_0, window_bounds = array<i64: 1, 8, 96>}, {transform_indices = @transform_1, window_bounds = array<i64: 1, 8, 8>}, {transform_indices = @transform_2, window_bounds = array<i64: 1, 8, 32>}]} {
    %c0 = arith.constant 0 : index
    %c0_0 = arith.constant 0 : index
    %c0_1 = arith.constant 0 : index
    %0 = vector.load %arg1[%c0, %c0_0, %c0_1] : memref<1x8x96xbf16, #tpu.memory_space<vmem>>, vector<1x8x96xbf16>
    %1 = vector.shape_cast %0 : vector<1x8x96xbf16> to vector<8x96xbf16>
    %2 = vector.extract_strided_slice %1 {offsets = [0, 0], sizes = [8, 32], strides = [1, 1]} : vector<8x96xbf16> to vector<8x32xbf16>
    %3 = vector.extract_strided_slice %1 {offsets = [0, 32], sizes = [8, 32], strides = [1, 1]} : vector<8x96xbf16> to vector<8x32xbf16>
    %4 = vector.extract_strided_slice %1 {offsets = [0, 64], sizes = [8, 32], strides = [1, 1]} : vector<8x96xbf16> to vector<8x32xbf16>
    %c0_2 = arith.constant 0 : index
    %c0_3 = arith.constant 0 : index
    %c0_4 = arith.constant 0 : index
    %5 = vector.load %arg2[%c0_2, %c0_3, %c0_4] : memref<1x8x8xf32, #tpu.memory_space<vmem>>, vector<1x8x8xf32>
    %6 = vector.shape_cast %5 : vector<1x8x8xf32> to vector<8x8xf32>
    %cst = arith.constant 0.000000e+00 : f32
    %7 = vector.broadcast %cst : f32 to vector<8x8xf32>
    %8 = arith.cmpf oeq, %6, %7 : vector<8x8xf32>
    %9 = vector.extract_strided_slice %2 {offsets = [0, 0], sizes = [8, 8], strides = [1, 1]} : vector<8x32xbf16> to vector<8x8xbf16>
    %10 = vector.extract_strided_slice %3 {offsets = [0, 0], sizes = [8, 8], strides = [1, 1]} : vector<8x32xbf16> to vector<8x8xbf16>
    %11 = vector.extract_strided_slice %4 {offsets = [0, 0], sizes = [8, 8], strides = [1, 1]} : vector<8x32xbf16> to vector<8x8xbf16>
    %cst_5 = arith.constant dense<0.000000e+00> : vector<8x8xf32>
    %12 = tpu.matmul %9, %10, %cst_5 {dimension_numbers = #tpu.dot_dimension_numbers<[1], [1], [0], [0], [0, 0, 1, 0], [], []>} : vector<8x8xbf16>, vector<8x8xbf16>, vector<8x8xf32> -> vector<8x8xf32>
    %cst_6 = arith.constant 0.353553385 : f32
    %13 = vector.broadcast %cst_6 : f32 to vector<8x8xf32>
    %14 = arith.mulf %12, %13 : vector<8x8xf32>
    %cst_7 = arith.constant -1.000000e+10 : f32
    %15 = vector.broadcast %cst_7 : f32 to vector<8x8xf32>
    %16 = arith.select %8, %15, %14 : vector<8x8xi1>, vector<8x8xf32>
    %cst_8 = arith.constant dense<0xFF800000> : vector<8xf32>
    %17 = vector.multi_reduction <maximumf>, %16, %cst_8 [1] : vector<8x8xf32> to vector<8xf32>
    %18 = vector.shape_cast %17 : vector<8xf32> to vector<8x1xf32>
    %19 = vector.broadcast %18 : vector<8x1xf32> to vector<8x8xf32>
    %20 = arith.subf %16, %19 : vector<8x8xf32>
    %21 = math.exp %20 : vector<8x8xf32>
    %cst_9 = arith.constant dense<0.000000e+00> : vector<8xf32>
    %22 = vector.multi_reduction <add>, %21, %cst_9 [1] : vector<8x8xf32> to vector<8xf32>
    %23 = vector.shape_cast %22 : vector<8xf32> to vector<8x1xf32>
    %24 = tpu.reciprocal %23 {approx = true} : vector<8x1xf32> -> vector<8x1xf32>
    %25 = vector.broadcast %24 : vector<8x1xf32> to vector<8x8xf32>
    %26 = arith.mulf %21, %25 : vector<8x8xf32>
    %27 = arith.truncf %26 : vector<8x8xf32> to vector<8x8xbf16>
    %cst_10 = arith.constant dense<0.000000e+00> : vector<8x8xf32>
    %28 = tpu.matmul %27, %11, %cst_10 {dimension_numbers = #tpu.dot_dimension_numbers<[1], [0], [0], [1], [0, 0, 1, 1], [], []>} : vector<8x8xbf16>, vector<8x8xbf16>, vector<8x8xf32> -> vector<8x8xf32>
    %29 = vector.extract_strided_slice %2 {offsets = [0, 8], sizes = [8, 8], strides = [1, 1]} : vector<8x32xbf16> to vector<8x8xbf16>
    %30 = vector.extract_strided_slice %3 {offsets = [0, 8], sizes = [8, 8], strides = [1, 1]} : vector<8x32xbf16> to vector<8x8xbf16>
    %31 = vector.extract_strided_slice %4 {offsets = [0, 8], sizes = [8, 8], strides = [1, 1]} : vector<8x32xbf16> to vector<8x8xbf16>
    %cst_11 = arith.constant dense<0.000000e+00> : vector<8x8xf32>
    %32 = tpu.matmul %29, %30, %cst_11 {dimension_numbers = #tpu.dot_dimension_numbers<[1], [1], [0], [0], [0, 0, 1, 0], [], []>} : vector<8x8xbf16>, vector<8x8xbf16>, vector<8x8xf32> -> vector<8x8xf32>
    %cst_12 = arith.constant 0.353553385 : f32
    %33 = vector.broadcast %cst_12 : f32 to vector<8x8xf32>
    %34 = arith.mulf %32, %33 : vector<8x8xf32>
    %cst_13 = arith.constant -1.000000e+10 : f32
    %35 = vector.broadcast %cst_13 : f32 to vector<8x8xf32>
    %36 = arith.select %8, %35, %34 : vector<8x8xi1>, vector<8x8xf32>
    %cst_14 = arith.constant dense<0xFF800000> : vector<8xf32>
    %37 = vector.multi_reduction <maximumf>, %36, %cst_14 [1] : vector<8x8xf32> to vector<8xf32>
    %38 = vector.shape_cast %37 : vector<8xf32> to vector<8x1xf32>
    %39 = vector.broadcast %38 : vector<8x1xf32> to vector<8x8xf32>
    %40 = arith.subf %36, %39 : vector<8x8xf32>
    %41 = math.exp %40 : vector<8x8xf32>
    %cst_15 = arith.constant dense<0.000000e+00> : vector<8xf32>
    %42 = vector.multi_reduction <add>, %41, %cst_15 [1] : vector<8x8xf32> to vector<8xf32>
    %43 = vector.shape_cast %42 : vector<8xf32> to vector<8x1xf32>
    %44 = tpu.reciprocal %43 {approx = true} : vector<8x1xf32> -> vector<8x1xf32>
    %45 = vector.broadcast %44 : vector<8x1xf32> to vector<8x8xf32>
    %46 = arith.mulf %41, %45 : vector<8x8xf32>
    %47 = arith.truncf %46 : vector<8x8xf32> to vector<8x8xbf16>
    %cst_16 = arith.constant dense<0.000000e+00> : vector<8x8xf32>
    %48 = tpu.matmul %47, %31, %cst_16 {dimension_numbers = #tpu.dot_dimension_numbers<[1], [0], [0], [1], [0, 0, 1, 1], [], []>} : vector<8x8xbf16>, vector<8x8xbf16>, vector<8x8xf32> -> vector<8x8xf32>
    %49 = vector.extract_strided_slice %2 {offsets = [0, 16], sizes = [8, 8], strides = [1, 1]} : vector<8x32xbf16> to vector<8x8xbf16>
    %50 = vector.extract_strided_slice %3 {offsets = [0, 16], sizes = [8, 8], strides = [1, 1]} : vector<8x32xbf16> to vector<8x8xbf16>
    %51 = vector.extract_strided_slice %4 {offsets = [0, 16], sizes = [8, 8], strides = [1, 1]} : vector<8x32xbf16> to vector<8x8xbf16>
    %cst_17 = arith.constant dense<0.000000e+00> : vector<8x8xf32>
    %52 = tpu.matmul %49, %50, %cst_17 {dimension_numbers = #tpu.dot_dimension_numbers<[1], [1], [0], [0], [0, 0, 1, 0], [], []>} : vector<8x8xbf16>, vector<8x8xbf16>, vector<8x8xf32> -> vector<8x8xf32>
    %cst_18 = arith.constant 0.353553385 : f32
    %53 = vector.broadcast %cst_18 : f32 to vector<8x8xf32>
    %54 = arith.mulf %52, %53 : vector<8x8xf32>
    %cst_19 = arith.constant -1.000000e+10 : f32
    %55 = vector.broadcast %cst_19 : f32 to vector<8x8xf32>
    %56 = arith.select %8, %55, %54 : vector<8x8xi1>, vector<8x8xf32>
    %cst_20 = arith.constant dense<0xFF800000> : vector<8xf32>
    %57 = vector.multi_reduction <maximumf>, %56, %cst_20 [1] : vector<8x8xf32> to vector<8xf32>
    %58 = vector.shape_cast %57 : vector<8xf32> to vector<8x1xf32>
    %59 = vector.broadcast %58 : vector<8x1xf32> to vector<8x8xf32>
    %60 = arith.subf %56, %59 : vector<8x8xf32>
    %61 = math.exp %60 : vector<8x8xf32>
    %cst_21 = arith.constant dense<0.000000e+00> : vector<8xf32>
    %62 = vector.multi_reduction <add>, %61, %cst_21 [1] : vector<8x8xf32> to vector<8xf32>
    %63 = vector.shape_cast %62 : vector<8xf32> to vector<8x1xf32>
    %64 = tpu.reciprocal %63 {approx = true} : vector<8x1xf32> -> vector<8x1xf32>
    %65 = vector.broadcast %64 : vector<8x1xf32> to vector<8x8xf32>
    %66 = arith.mulf %61, %65 : vector<8x8xf32>
    %67 = arith.truncf %66 : vector<8x8xf32> to vector<8x8xbf16>
    %cst_22 = arith.constant dense<0.000000e+00> : vector<8x8xf32>
    %68 = tpu.matmul %67, %51, %cst_22 {dimension_numbers = #tpu.dot_dimension_numbers<[1], [0], [0], [1], [0, 0, 1, 1], [], []>} : vector<8x8xbf16>, vector<8x8xbf16>, vector<8x8xf32> -> vector<8x8xf32>
    %69 = vector.extract_strided_slice %2 {offsets = [0, 24], sizes = [8, 8], strides = [1, 1]} : vector<8x32xbf16> to vector<8x8xbf16>
    %70 = vector.extract_strided_slice %3 {offsets = [0, 24], sizes = [8, 8], strides = [1, 1]} : vector<8x32xbf16> to vector<8x8xbf16>
    %71 = vector.extract_strided_slice %4 {offsets = [0, 24], sizes = [8, 8], strides = [1, 1]} : vector<8x32xbf16> to vector<8x8xbf16>
    %cst_23 = arith.constant dense<0.000000e+00> : vector<8x8xf32>
    %72 = tpu.matmul %69, %70, %cst_23 {dimension_numbers = #tpu.dot_dimension_numbers<[1], [1], [0], [0], [0, 0, 1, 0], [], []>} : vector<8x8xbf16>, vector<8x8xbf16>, vector<8x8xf32> -> vector<8x8xf32>
    %cst_24 = arith.constant 0.353553385 : f32
    %73 = vector.broadcast %cst_24 : f32 to vector<8x8xf32>
    %74 = arith.mulf %72, %73 : vector<8x8xf32>
    %cst_25 = arith.constant -1.000000e+10 : f32
    %75 = vector.broadcast %cst_25 : f32 to vector<8x8xf32>
    %76 = arith.select %8, %75, %74 : vector<8x8xi1>, vector<8x8xf32>
    %cst_26 = arith.constant dense<0xFF800000> : vector<8xf32>
    %77 = vector.multi_reduction <maximumf>, %76, %cst_26 [1] : vector<8x8xf32> to vector<8xf32>
    %78 = vector.shape_cast %77 : vector<8xf32> to vector<8x1xf32>
    %79 = vector.broadcast %78 : vector<8x1xf32> to vector<8x8xf32>
    %80 = arith.subf %76, %79 : vector<8x8xf32>
    %81 = math.exp %80 : vector<8x8xf32>
    %cst_27 = arith.constant dense<0.000000e+00> : vector<8xf32>
    %82 = vector.multi_reduction <add>, %81, %cst_27 [1] : vector<8x8xf32> to vector<8xf32>
    %83 = vector.shape_cast %82 : vector<8xf32> to vector<8x1xf32>
    %84 = tpu.reciprocal %83 {approx = true} : vector<8x1xf32> -> vector<8x1xf32>
    %85 = vector.broadcast %84 : vector<8x1xf32> to vector<8x8xf32>
    %86 = arith.mulf %81, %85 : vector<8x8xf32>
    %87 = arith.truncf %86 : vector<8x8xf32> to vector<8x8xbf16>
    %cst_28 = arith.constant dense<0.000000e+00> : vector<8x8xf32>
    %88 = tpu.matmul %87, %71, %cst_28 {dimension_numbers = #tpu.dot_dimension_numbers<[1], [0], [0], [1], [0, 0, 1, 1], [], []>} : vector<8x8xbf16>, vector<8x8xbf16>, vector<8x8xf32> -> vector<8x8xf32>
    %89 = tpu.concatenate %28, %48, %68, %88 in 1 : vector<8x8xf32>, vector<8x8xf32>, vector<8x8xf32>, vector<8x8xf32> -> vector<8x32xf32>
    %90 = vector.shape_cast %89 : vector<8x32xf32> to vector<1x8x32xf32>
    %91 = arith.truncf %90 : vector<1x8x32xf32> to vector<1x8x32xbf16>
    %c0_29 = arith.constant 0 : index
    %c0_30 = arith.constant 0 : index
    %c0_31 = arith.constant 0 : index
    %92 = vector.load %arg3[%c0_29, %c0_30, %c0_31] : memref<1x8x32xbf16, #tpu.memory_space<vmem>>, vector<1x8x32xbf16>
    tpu.vector_store %arg3[%c0_29, %c0_30, %c0_31], %91 {strides = array<i32>} : memref<1x8x32xbf16, #tpu.memory_space<vmem>>, vector<1x8x32xbf16>,
    return
  }
  func.func @transform_0(%arg0: i32) -> (i32, i32, i32) {
    %c0_i32 = arith.constant 0 : i32
    %c0_i32_0 = arith.constant 0 : i32
    %c0_i32_1 = arith.constant 0 : i32
    return %arg0, %c0_i32, %c0_i32_0 : i32, i32, i32
  }
  func.func @transform_1(%arg0: i32) -> (i32, i32, i32) {
    %c0_i32 = arith.constant 0 : i32
    %c0_i32_0 = arith.constant 0 : i32
    %c0_i32_1 = arith.constant 0 : i32
    return %arg0, %c0_i32, %c0_i32_0 : i32, i32, i32
  }
  func.func @transform_2(%arg0: i32) -> (i32, i32, i32) {
    %c0_i32 = arith.constant 0 : i32
    %c0_i32_0 = arith.constant 0 : i32
    %c0_i32_1 = arith.constant 0 : i32
    return %arg0, %c0_i32, %c0_i32_0 : i32, i32, i32
  }
}

module attributes {stable_mosaic.version = 11 : i64} {
  func.func @_linear_kernel(%arg0: i32, %arg1: i32, %arg2: i32, %arg3: memref<16x32xf32, #tpu.memory_space<vmem>>, %arg4: memref<32x32xbf16, #tpu.memory_space<vmem>>, %arg5: memref<1x32xf32, #tpu.memory_space<vmem>>, %arg6: memref<16x32xbf16, #tpu.memory_space<vmem>>, %arg7: memref<16x32xf32, #tpu.memory_space<vmem>>) attributes {dimension_semantics = [#tpu.dimension_semantics<parallel>, #tpu.dimension_semantics<parallel>, #tpu.dimension_semantics<arbitrary>], iteration_bounds = array<i64: 1, 1, 1>, scalar_prefetch = 0 : i64, scratch_operands = 1 : i64, tpu.core_type = #tpu.core_type<tc>, window_params = [{transform_indices = @transform_0, window_bounds = array<i64: 16, 32>}, {transform_indices = @transform_1, window_bounds = array<i64: 32, 32>}, {transform_indices = @transform_2, window_bounds = array<i64: 1, 32>}, {transform_indices = @transform_3, window_bounds = array<i64: 16, 32>}]} {
    %c0_i32 = arith.constant 0 : i32
    %0 = arith.cmpi eq, %arg2, %c0_i32 : i32
    %1 = arith.extui %0 : i1 to i32
    %c0_i32_0 = arith.constant 0 : i32
    %2 = arith.cmpi ne, %1, %c0_i32_0 : i32
    scf.if %2 {
      %cst_10 = arith.constant 0.000000e+00 : f32
      %13 = vector.broadcast %cst_10 : f32 to vector<16x32xf32>
      %c0_11 = arith.constant 0 : index
      %c0_12 = arith.constant 0 : index
      %14 = vector.load %arg7[%c0_11, %c0_12] : memref<16x32xf32, #tpu.memory_space<vmem>>, vector<16x32xf32>
      tpu.vector_store %arg7[%c0_11, %c0_12], %13 {strides = array<i32>} : memref<16x32xf32, #tpu.memory_space<vmem>>, vector<16x32xf32>,
    } else {
    }
    %c0 = arith.constant 0 : index
    %c0_1 = arith.constant 0 : index
    %3 = vector.load %arg7[%c0, %c0_1] : memref<16x32xf32, #tpu.memory_space<vmem>>, vector<16x32xf32>
    %c0_2 = arith.constant 0 : index
    %c0_3 = arith.constant 0 : index
    %4 = vector.load %arg3[%c0_2, %c0_3] : memref<16x32xf32, #tpu.memory_space<vmem>>, vector<16x32xf32>
    %5 = arith.truncf %4 : vector<16x32xf32> to vector<16x32xbf16>
    %c0_4 = arith.constant 0 : index
    %c0_5 = arith.constant 0 : index
    %6 = vector.load %arg4[%c0_4, %c0_5] : memref<32x32xbf16, #tpu.memory_space<vmem>>, vector<32x32xbf16>
    %cst = arith.constant dense<0.000000e+00> : vector<16x32xf32>
    %7 = tpu.matmul %5, %6, %cst {dimension_numbers = #tpu.dot_dimension_numbers<[1], [0], [0], [1], [0, 0, 1, 1], [], []>} : vector<16x32xbf16>, vector<32x32xbf16>, vector<16x32xf32> -> vector<16x32xf32>
    %8 = arith.addf %3, %7 : vector<16x32xf32>
    %c0_6 = arith.constant 0 : index
    %c0_7 = arith.constant 0 : index
    %9 = vector.load %arg7[%c0_6, %c0_7] : memref<16x32xf32, #tpu.memory_space<vmem>>, vector<16x32xf32>
    tpu.vector_store %arg7[%c0_6, %c0_7], %8 {strides = array<i32>} : memref<16x32xf32, #tpu.memory_space<vmem>>, vector<16x32xf32>,
    %c0_i32_8 = arith.constant 0 : i32
    %10 = arith.cmpi eq, %arg2, %c0_i32_8 : i32
    %11 = arith.extui %10 : i1 to i32
    %c0_i32_9 = arith.constant 0 : i32
    %12 = arith.cmpi ne, %11, %c0_i32_9 : i32
    scf.if %12 {
      %c0_10 = arith.constant 0 : index
      %c0_11 = arith.constant 0 : index
      %13 = vector.load %arg7[%c0_10, %c0_11] : memref<16x32xf32, #tpu.memory_space<vmem>>, vector<16x32xf32>
      %c0_12 = arith.constant 0 : index
      %c0_13 = arith.constant 0 : index
      %14 = vector.load %arg5[%c0_12, %c0_13] : memref<1x32xf32, #tpu.memory_space<vmem>>, vector<1x32xf32>
      %15 = vector.broadcast %14 : vector<1x32xf32> to vector<16x32xf32>
      %16 = arith.addf %13, %15 : vector<16x32xf32>
      %17 = arith.truncf %16 : vector<16x32xf32> to vector<16x32xbf16>
      %c0_14 = arith.constant 0 : index
      %c0_15 = arith.constant 0 : index
      %18 = vector.load %arg6[%c0_14, %c0_15] : memref<16x32xbf16, #tpu.memory_space<vmem>>, vector<16x32xbf16>
      tpu.vector_store %arg6[%c0_14, %c0_15], %17 {strides = array<i32>} : memref<16x32xbf16, #tpu.memory_space<vmem>>, vector<16x32xbf16>,
    } else {
    }
    return
  }
  func.func @transform_0(%arg0: i32, %arg1: i32, %arg2: i32) -> (i32, i32) {
    %c0_i32 = arith.constant 0 : i32
    return %arg0, %arg2 : i32, i32
  }
  func.func @transform_1(%arg0: i32, %arg1: i32, %arg2: i32) -> (i32, i32) {
    %c0_i32 = arith.constant 0 : i32
    return %arg2, %arg1 : i32, i32
  }
  func.func @transform_2(%arg0: i32, %arg1: i32, %arg2: i32) -> (i32, i32) {
    %c0_i32 = arith.constant 0 : i32
    %c0_i32_0 = arith.constant 0 : i32
    return %c0_i32, %arg1 : i32, i32
  }
  func.func @transform_3(%arg0: i32, %arg1: i32, %arg2: i32) -> (i32, i32) {
    %c0_i32 = arith.constant 0 : i32
    return %arg0, %arg1 : i32, i32
  }
}

module attributes {stable_mosaic.version = 11 : i64} {
  func.func @_mha_cross_kernel(%arg0: i32, %arg1: memref<1x8x32xbf16, #tpu.memory_space<vmem>>, %arg2: memref<1x8x64xbf16, #tpu.memory_space<vmem>>, %arg3: memref<1x1x8xf32, #tpu.memory_space<vmem>>, %arg4: memref<1x8x32xbf16, #tpu.memory_space<vmem>>) attributes {dimension_semantics = [#tpu.dimension_semantics<parallel>], iteration_bounds = array<i64: 2>, scalar_prefetch = 0 : i64, scratch_operands = 0 : i64, tpu.core_type = #tpu.core_type<tc>, window_params = [{transform_indices = @transform_0, window_bounds = array<i64: 1, 8, 32>}, {transform_indices = @transform_1, window_bounds = array<i64: 1, 8, 64>}, {transform_indices = @transform_2, window_bounds = array<i64: 1, 1, 8>}, {transform_indices = @transform_3, window_bounds = array<i64: 1, 8, 32>}]} {
    %c0 = arith.constant 0 : index
    %c0_0 = arith.constant 0 : index
    %c0_1 = arith.constant 0 : index
    %0 = vector.load %arg2[%c0, %c0_0, %c0_1] : memref<1x8x64xbf16, #tpu.memory_space<vmem>>, vector<1x8x64xbf16>
    %1 = vector.shape_cast %0 : vector<1x8x64xbf16> to vector<8x64xbf16>
    %c0_2 = arith.constant 0 : index
    %c0_3 = arith.constant 0 : index
    %c0_4 = arith.constant 0 : index
    %2 = vector.load %arg1[%c0_2, %c0_3, %c0_4] : memref<1x8x32xbf16, #tpu.memory_space<vmem>>, vector<1x8x32xbf16>
    %3 = vector.shape_cast %2 : vector<1x8x32xbf16> to vector<8x32xbf16>
    %4 = vector.extract_strided_slice %1 {offsets = [0, 0], sizes = [8, 32], strides = [1, 1]} : vector<8x64xbf16> to vector<8x32xbf16>
    %5 = vector.extract_strided_slice %1 {offsets = [0, 32], sizes = [8, 32], strides = [1, 1]} : vector<8x64xbf16> to vector<8x32xbf16>
    %c0_5 = arith.constant 0 : index
    %c0_6 = arith.constant 0 : index
    %c0_7 = arith.constant 0 : index
    %6 = vector.load %arg3[%c0_5, %c0_6, %c0_7] : memref<1x1x8xf32, #tpu.memory_space<vmem>>, vector<1x1x8xf32>
    %7 = vector.shape_cast %6 : vector<1x1x8xf32> to vector<1x8xf32>
    %cst = arith.constant 0.000000e+00 : f32
    %8 = vector.broadcast %cst : f32 to vector<1x8xf32>
    %9 = arith.cmpf oeq, %7, %8 : vector<1x8xf32>
    %10 = vector.extract_strided_slice %3 {offsets = [0, 0], sizes = [8, 8], strides = [1, 1]} : vector<8x32xbf16> to vector<8x8xbf16>
    %11 = vector.extract_strided_slice %4 {offsets = [0, 0], sizes = [8, 8], strides = [1, 1]} : vector<8x32xbf16> to vector<8x8xbf16>
    %12 = vector.extract_strided_slice %5 {offsets = [0, 0], sizes = [8, 8], strides = [1, 1]} : vector<8x32xbf16> to vector<8x8xbf16>
    %cst_8 = arith.constant dense<0.000000e+00> : vector<8x8xf32>
    %13 = tpu.matmul %10, %11, %cst_8 {dimension_numbers = #tpu.dot_dimension_numbers<[1], [1], [0], [0], [0, 0, 1, 0], [], []>} : vector<8x8xbf16>, vector<8x8xbf16>, vector<8x8xf32> -> vector<8x8xf32>
    %cst_9 = arith.constant 0.353553385 : f32
    %14 = vector.broadcast %cst_9 : f32 to vector<8x8xf32>
    %15 = arith.mulf %13, %14 : vector<8x8xf32>
    %cst_10 = arith.constant -1.000000e+10 : f32
    %16 = vector.shape_cast %9 : vector<1x8xi1> to vector<1x8xi1>
    %17 = vector.broadcast %16 : vector<1x8xi1> to vector<8x8xi1>
    %18 = vector.broadcast %cst_10 : f32 to vector<8x8xf32>
    %19 = arith.select %17, %18, %15 : vector<8x8xi1>, vector<8x8xf32>
    %cst_11 = arith.constant dense<0xFF800000> : vector<8xf32>
    %20 = vector.multi_reduction <maximumf>, %19, %cst_11 [1] : vector<8x8xf32> to vector<8xf32>
    %21 = vector.shape_cast %20 : vector<8xf32> to vector<8x1xf32>
    %22 = vector.broadcast %21 : vector<8x1xf32> to vector<8x8xf32>
    %23 = arith.subf %19, %22 : vector<8x8xf32>
    %24 = math.exp %23 : vector<8x8xf32>
    %cst_12 = arith.constant dense<0.000000e+00> : vector<8xf32>
    %25 = vector.multi_reduction <add>, %24, %cst_12 [1] : vector<8x8xf32> to vector<8xf32>
    %26 = vector.shape_cast %25 : vector<8xf32> to vector<8x1xf32>
    %27 = tpu.reciprocal %26 {approx = true} : vector<8x1xf32> -> vector<8x1xf32>
    %28 = vector.broadcast %27 : vector<8x1xf32> to vector<8x8xf32>
    %29 = arith.mulf %24, %28 : vector<8x8xf32>
    %30 = arith.truncf %29 : vector<8x8xf32> to vector<8x8xbf16>
    %cst_13 = arith.constant dense<0.000000e+00> : vector<8x8xf32>
    %31 = tpu.matmul %30, %12, %cst_13 {dimension_numbers = #tpu.dot_dimension_numbers<[1], [0], [0], [1], [0, 0, 1, 1], [], []>} : vector<8x8xbf16>, vector<8x8xbf16>, vector<8x8xf32> -> vector<8x8xf32>
    %32 = vector.extract_strided_slice %3 {offsets = [0, 8], sizes = [8, 8], strides = [1, 1]} : vector<8x32xbf16> to vector<8x8xbf16>
    %33 = vector.extract_strided_slice %4 {offsets = [0, 8], sizes = [8, 8], strides = [1, 1]} : vector<8x32xbf16> to vector<8x8xbf16>
    %34 = vector.extract_strided_slice %5 {offsets = [0, 8], sizes = [8, 8], strides = [1, 1]} : vector<8x32xbf16> to vector<8x8xbf16>
    %cst_14 = arith.constant dense<0.000000e+00> : vector<8x8xf32>
    %35 = tpu.matmul %32, %33, %cst_14 {dimension_numbers = #tpu.dot_dimension_numbers<[1], [1], [0], [0], [0, 0, 1, 0], [], []>} : vector<8x8xbf16>, vector<8x8xbf16>, vector<8x8xf32> -> vector<8x8xf32>
    %cst_15 = arith.constant 0.353553385 : f32
    %36 = vector.broadcast %cst_15 : f32 to vector<8x8xf32>
    %37 = arith.mulf %35, %36 : vector<8x8xf32>
    %cst_16 = arith.constant -1.000000e+10 : f32
    %38 = vector.shape_cast %9 : vector<1x8xi1> to vector<1x8xi1>
    %39 = vector.broadcast %38 : vector<1x8xi1> to vector<8x8xi1>
    %40 = vector.broadcast %cst_16 : f32 to vector<8x8xf32>
    %41 = arith.select %39, %40, %37 : vector<8x8xi1>, vector<8x8xf32>
    %cst_17 = arith.constant dense<0xFF800000> : vector<8xf32>
    %42 = vector.multi_reduction <maximumf>, %41, %cst_17 [1] : vector<8x8xf32> to vector<8xf32>
    %43 = vector.shape_cast %42 : vector<8xf32> to vector<8x1xf32>
    %44 = vector.broadcast %43 : vector<8x1xf32> to vector<8x8xf32>
    %45 = arith.subf %41, %44 : vector<8x8xf32>
    %46 = math.exp %45 : vector<8x8xf32>
    %cst_18 = arith.constant dense<0.000000e+00> : vector<8xf32>
    %47 = vector.multi_reduction <add>, %46, %cst_18 [1] : vector<8x8xf32> to vector<8xf32>
    %48 = vector.shape_cast %47 : vector<8xf32> to vector<8x1xf32>
    %49 = tpu.reciprocal %48 {approx = true} : vector<8x1xf32> -> vector<8x1xf32>
    %50 = vector.broadcast %49 : vector<8x1xf32> to vector<8x8xf32>
    %51 = arith.mulf %46, %50 : vector<8x8xf32>
    %52 = arith.truncf %51 : vector<8x8xf32> to vector<8x8xbf16>
    %cst_19 = arith.constant dense<0.000000e+00> : vector<8x8xf32>
    %53 = tpu.matmul %52, %34, %cst_19 {dimension_numbers = #tpu.dot_dimension_numbers<[1], [0], [0], [1], [0, 0, 1, 1], [], []>} : vector<8x8xbf16>, vector<8x8xbf16>, vector<8x8xf32> -> vector<8x8xf32>
    %54 = vector.extract_strided_slice %3 {offsets = [0, 16], sizes = [8, 8], strides = [1, 1]} : vector<8x32xbf16> to vector<8x8xbf16>
    %55 = vector.extract_strided_slice %4 {offsets = [0, 16], sizes = [8, 8], strides = [1, 1]} : vector<8x32xbf16> to vector<8x8xbf16>
    %56 = vector.extract_strided_slice %5 {offsets = [0, 16], sizes = [8, 8], strides = [1, 1]} : vector<8x32xbf16> to vector<8x8xbf16>
    %cst_20 = arith.constant dense<0.000000e+00> : vector<8x8xf32>
    %57 = tpu.matmul %54, %55, %cst_20 {dimension_numbers = #tpu.dot_dimension_numbers<[1], [1], [0], [0], [0, 0, 1, 0], [], []>} : vector<8x8xbf16>, vector<8x8xbf16>, vector<8x8xf32> -> vector<8x8xf32>
    %cst_21 = arith.constant 0.353553385 : f32
    %58 = vector.broadcast %cst_21 : f32 to vector<8x8xf32>
    %59 = arith.mulf %57, %58 : vector<8x8xf32>
    %cst_22 = arith.constant -1.000000e+10 : f32
    %60 = vector.shape_cast %9 : vector<1x8xi1> to vector<1x8xi1>
    %61 = vector.broadcast %60 : vector<1x8xi1> to vector<8x8xi1>
    %62 = vector.broadcast %cst_22 : f32 to vector<8x8xf32>
    %63 = arith.select %61, %62, %59 : vector<8x8xi1>, vector<8x8xf32>
    %cst_23 = arith.constant dense<0xFF800000> : vector<8xf32>
    %64 = vector.multi_reduction <maximumf>, %63, %cst_23 [1] : vector<8x8xf32> to vector<8xf32>
    %65 = vector.shape_cast %64 : vector<8xf32> to vector<8x1xf32>
    %66 = vector.broadcast %65 : vector<8x1xf32> to vector<8x8xf32>
    %67 = arith.subf %63, %66 : vector<8x8xf32>
    %68 = math.exp %67 : vector<8x8xf32>
    %cst_24 = arith.constant dense<0.000000e+00> : vector<8xf32>
    %69 = vector.multi_reduction <add>, %68, %cst_24 [1] : vector<8x8xf32> to vector<8xf32>
    %70 = vector.shape_cast %69 : vector<8xf32> to vector<8x1xf32>
    %71 = tpu.reciprocal %70 {approx = true} : vector<8x1xf32> -> vector<8x1xf32>
    %72 = vector.broadcast %71 : vector<8x1xf32> to vector<8x8xf32>
    %73 = arith.mulf %68, %72 : vector<8x8xf32>
    %74 = arith.truncf %73 : vector<8x8xf32> to vector<8x8xbf16>
    %cst_25 = arith.constant dense<0.000000e+00> : vector<8x8xf32>
    %75 = tpu.matmul %74, %56, %cst_25 {dimension_numbers = #tpu.dot_dimension_numbers<[1], [0], [0], [1], [0, 0, 1, 1], [], []>} : vector<8x8xbf16>, vector<8x8xbf16>, vector<8x8xf32> -> vector<8x8xf32>
    %76 = vector.extract_strided_slice %3 {offsets = [0, 24], sizes = [8, 8], strides = [1, 1]} : vector<8x32xbf16> to vector<8x8xbf16>
    %77 = vector.extract_strided_slice %4 {offsets = [0, 24], sizes = [8, 8], strides = [1, 1]} : vector<8x32xbf16> to vector<8x8xbf16>
    %78 = vector.extract_strided_slice %5 {offsets = [0, 24], sizes = [8, 8], strides = [1, 1]} : vector<8x32xbf16> to vector<8x8xbf16>
    %cst_26 = arith.constant dense<0.000000e+00> : vector<8x8xf32>
    %79 = tpu.matmul %76, %77, %cst_26 {dimension_numbers = #tpu.dot_dimension_numbers<[1], [1], [0], [0], [0, 0, 1, 0], [], []>} : vector<8x8xbf16>, vector<8x8xbf16>, vector<8x8xf32> -> vector<8x8xf32>
    %cst_27 = arith.constant 0.353553385 : f32
    %80 = vector.broadcast %cst_27 : f32 to vector<8x8xf32>
    %81 = arith.mulf %79, %80 : vector<8x8xf32>
    %cst_28 = arith.constant -1.000000e+10 : f32
    %82 = vector.shape_cast %9 : vector<1x8xi1> to vector<1x8xi1>
    %83 = vector.broadcast %82 : vector<1x8xi1> to vector<8x8xi1>
    %84 = vector.broadcast %cst_28 : f32 to vector<8x8xf32>
    %85 = arith.select %83, %84, %81 : vector<8x8xi1>, vector<8x8xf32>
    %cst_29 = arith.constant dense<0xFF800000> : vector<8xf32>
    %86 = vector.multi_reduction <maximumf>, %85, %cst_29 [1] : vector<8x8xf32> to vector<8xf32>
    %87 = vector.shape_cast %86 : vector<8xf32> to vector<8x1xf32>
    %88 = vector.broadcast %87 : vector<8x1xf32> to vector<8x8xf32>
    %89 = arith.subf %85, %88 : vector<8x8xf32>
    %90 = math.exp %89 : vector<8x8xf32>
    %cst_30 = arith.constant dense<0.000000e+00> : vector<8xf32>
    %91 = vector.multi_reduction <add>, %90, %cst_30 [1] : vector<8x8xf32> to vector<8xf32>
    %92 = vector.shape_cast %91 : vector<8xf32> to vector<8x1xf32>
    %93 = tpu.reciprocal %92 {approx = true} : vector<8x1xf32> -> vector<8x1xf32>
    %94 = vector.broadcast %93 : vector<8x1xf32> to vector<8x8xf32>
    %95 = arith.mulf %90, %94 : vector<8x8xf32>
    %96 = arith.truncf %95 : vector<8x8xf32> to vector<8x8xbf16>
    %cst_31 = arith.constant dense<0.000000e+00> : vector<8x8xf32>
    %97 = tpu.matmul %96, %78, %cst_31 {dimension_numbers = #tpu.dot_dimension_numbers<[1], [0], [0], [1], [0, 0, 1, 1], [], []>} : vector<8x8xbf16>, vector<8x8xbf16>, vector<8x8xf32> -> vector<8x8xf32>
    %98 = tpu.concatenate %31, %53, %75, %97 in 1 : vector<8x8xf32>, vector<8x8xf32>, vector<8x8xf32>, vector<8x8xf32> -> vector<8x32xf32>
    %99 = vector.shape_cast %98 : vector<8x32xf32> to vector<1x8x32xf32>
    %100 = arith.truncf %99 : vector<1x8x32xf32> to vector<1x8x32xbf16>
    %c0_32 = arith.constant 0 : index
    %c0_33 = arith.constant 0 : index
    %c0_34 = arith.constant 0 : index
    %101 = vector.load %arg4[%c0_32, %c0_33, %c0_34] : memref<1x8x32xbf16, #tpu.memory_space<vmem>>, vector<1x8x32xbf16>
    tpu.vector_store %arg4[%c0_32, %c0_33, %c0_34], %100 {strides = array<i32>} : memref<1x8x32xbf16, #tpu.memory_space<vmem>>, vector<1x8x32xbf16>,
    return
  }
  func.func @transform_0(%arg0: i32) -> (i32, i32, i32) {
    %c0_i32 = arith.constant 0 : i32
    %c0_i32_0 = arith.constant 0 : i32
    %c0_i32_1 = arith.constant 0 : i32
    return %arg0, %c0_i32, %c0_i32_0 : i32, i32, i32
  }
  func.func @transform_1(%arg0: i32) -> (i32, i32, i32) {
    %c0_i32 = arith.constant 0 : i32
    %c0_i32_0 = arith.constant 0 : i32
    %c0_i32_1 = arith.constant 0 : i32
    return %arg0, %c0_i32, %c0_i32_0 : i32, i32, i32
  }
  func.func @transform_2(%arg0: i32) -> (i32, i32, i32) {
    %c0_i32 = arith.constant 0 : i32
    %c0_i32_0 = arith.constant 0 : i32
    %c0_i32_1 = arith.constant 0 : i32
    return %arg0, %c0_i32, %c0_i32_0 : i32, i32, i32
  }
  func.func @transform_3(%arg0: i32) -> (i32, i32, i32) {
    %c0_i32 = arith.constant 0 : i32
    %c0_i32_0 = arith.constant 0 : i32
    %c0_i32_1 = arith.constant 0 : i32
    return %arg0, %c0_i32, %c0_i32_0 : i32, i32, i32
  }
}

module attributes {stable_mosaic.version = 11 : i64} {
  func.func @_ffn_addln_kernel(%arg0: i32, %arg1: i32, %arg2: memref<16x32xf32, #tpu.memory_space<vmem>>, %arg3: memref<32x64xbf16, #tpu.memory_space<vmem>>, %arg4: memref<1x64xf32, #tpu.memory_space<vmem>>, %arg5: memref<64x32xbf16, #tpu.memory_space<vmem>>, %arg6: memref<1x32xf32, #tpu.memory_space<vmem>>, %arg7: memref<1x32xf32, #tpu.memory_space<vmem>>, %arg8: memref<1x32xf32, #tpu.memory_space<vmem>>, %arg9: memref<16x32xf32, #tpu.memory_space<vmem>>, %arg10: memref<16x32xf32, #tpu.memory_space<vmem>>) attributes {dimension_semantics = [#tpu.dimension_semantics<parallel>, #tpu.dimension_semantics<arbitrary>], iteration_bounds = array<i64: 1, 1>, scalar_prefetch = 0 : i64, scratch_operands = 1 : i64, tpu.core_type = #tpu.core_type<tc>, window_params = [{transform_indices = @transform_0, window_bounds = array<i64: 16, 32>}, {transform_indices = @transform_1, window_bounds = array<i64: 32, 64>}, {transform_indices = @transform_2, window_bounds = array<i64: 1, 64>}, {transform_indices = @transform_3, window_bounds = array<i64: 64, 32>}, {pipeline_mode = #tpu.pipeline_mode<synchronous>, transform_indices = @transform_4, window_bounds = array<i64: 1, 32>}, {pipeline_mode = #tpu.pipeline_mode<synchronous>, transform_indices = @transform_5, window_bounds = array<i64: 1, 32>}, {pipeline_mode = #tpu.pipeline_mode<synchronous>, transform_indices = @transform_6, window_bounds = array<i64: 1, 32>}, {transform_indices = @transform_7, window_bounds = array<i64: 16, 32>}]} {
    %c0_i32 = arith.constant 0 : i32
    %0 = arith.cmpi eq, %arg1, %c0_i32 : i32
    %1 = arith.extui %0 : i1 to i32
    %c0_i32_0 = arith.constant 0 : i32
    %2 = arith.cmpi ne, %1, %c0_i32_0 : i32
    scf.if %2 {
      %cst_16 = arith.constant 0.000000e+00 : f32
      %21 = vector.broadcast %cst_16 : f32 to vector<16x32xf32>
      %c0_17 = arith.constant 0 : index
      %c0_18 = arith.constant 0 : index
      %22 = vector.load %arg10[%c0_17, %c0_18] : memref<16x32xf32, #tpu.memory_space<vmem>>, vector<16x32xf32>
      tpu.vector_store %arg10[%c0_17, %c0_18], %21 {strides = array<i32>} : memref<16x32xf32, #tpu.memory_space<vmem>>, vector<16x32xf32>,
    } else {
    }
    %c0 = arith.constant 0 : index
    %c0_1 = arith.constant 0 : index
    %3 = vector.load %arg2[%c0, %c0_1] : memref<16x32xf32, #tpu.memory_space<vmem>>, vector<16x32xf32>
    %4 = arith.truncf %3 : vector<16x32xf32> to vector<16x32xbf16>
    %c0_2 = arith.constant 0 : index
    %c0_3 = arith.constant 0 : index
    %5 = vector.load %arg3[%c0_2, %c0_3] : memref<32x64xbf16, #tpu.memory_space<vmem>>, vector<32x64xbf16>
    %cst = arith.constant dense<0.000000e+00> : vector<16x64xf32>
    %6 = tpu.matmul %4, %5, %cst {dimension_numbers = #tpu.dot_dimension_numbers<[1], [0], [0], [1], [0, 0, 1, 1], [], []>} : vector<16x32xbf16>, vector<32x64xbf16>, vector<16x64xf32> -> vector<16x64xf32>
    %c0_4 = arith.constant 0 : index
    %c0_5 = arith.constant 0 : index
    %7 = vector.load %arg4[%c0_4, %c0_5] : memref<1x64xf32, #tpu.memory_space<vmem>>, vector<1x64xf32>
    %8 = vector.broadcast %7 : vector<1x64xf32> to vector<16x64xf32>
    %9 = arith.addf %6, %8 : vector<16x64xf32>
    %cst_6 = arith.constant 0.000000e+00 : f32
    %10 = vector.broadcast %cst_6 : f32 to vector<16x64xf32>
    %11 = arith.maximumf %9, %10 : vector<16x64xf32>
    %c0_7 = arith.constant 0 : index
    %c0_8 = arith.constant 0 : index
    %12 = vector.load %arg10[%c0_7, %c0_8] : memref<16x32xf32, #tpu.memory_space<vmem>>, vector<16x32xf32>
    %13 = arith.truncf %11 : vector<16x64xf32> to vector<16x64xbf16>
    %c0_9 = arith.constant 0 : index
    %c0_10 = arith.constant 0 : index
    %14 = vector.load %arg5[%c0_9, %c0_10] : memref<64x32xbf16, #tpu.memory_space<vmem>>, vector<64x32xbf16>
    %cst_11 = arith.constant dense<0.000000e+00> : vector<16x32xf32>
    %15 = tpu.matmul %13, %14, %cst_11 {dimension_numbers = #tpu.dot_dimension_numbers<[1], [0], [0], [1], [0, 0, 1, 1], [], []>} : vector<16x64xbf16>, vector<64x32xbf16>, vector<16x32xf32> -> vector<16x32xf32>
    %16 = arith.addf %12, %15 : vector<16x32xf32>
    %c0_12 = arith.constant 0 : index
    %c0_13 = arith.constant 0 : index
    %17 = vector.load %arg10[%c0_12, %c0_13] : memref<16x32xf32, #tpu.memory_space<vmem>>, vector<16x32xf32>
    tpu.vector_store %arg10[%c0_12, %c0_13], %16 {strides = array<i32>} : memref<16x32xf32, #tpu.memory_space<vmem>>, vector<16x32xf32>,
    %c0_i32_14 = arith.constant 0 : i32
    %18 = arith.cmpi eq, %arg1, %c0_i32_14 : i32
    %19 = arith.extui %18 : i1 to i32
    %c0_i32_15 = arith.constant 0 : i32
    %20 = arith.cmpi ne, %19, %c0_i32_15 : i32
    scf.if %20 {
      %c0_16 = arith.constant 0 : index
      %c0_17 = arith.constant 0 : index
      %21 = vector.load %arg10[%c0_16, %c0_17] : memref<16x32xf32, #tpu.memory_space<vmem>>, vector<16x32xf32>
      %c0_18 = arith.constant 0 : index
      %c0_19 = arith.constant 0 : index
      %22 = vector.load %arg6[%c0_18, %c0_19] : memref<1x32xf32, #tpu.memory_space<vmem>>, vector<1x32xf32>
      %23 = vector.broadcast %22 : vector<1x32xf32> to vector<16x32xf32>
      %24 = arith.addf %21, %23 : vector<16x32xf32>
      %c0_20 = arith.constant 0 : index
      %c0_21 = arith.constant 0 : index
      %25 = vector.load %arg2[%c0_20, %c0_21] : memref<16x32xf32, #tpu.memory_space<vmem>>, vector<16x32xf32>
      %26 = arith.addf %24, %25 : vector<16x32xf32>
      %cst_22 = arith.constant dense<0.000000e+00> : vector<16xf32>
      %27 = vector.multi_reduction <add>, %26, %cst_22 [1] : vector<16x32xf32> to vector<16xf32>
      %28 = vector.shape_cast %27 : vector<16xf32> to vector<16x1xf32>
      %cst_23 = arith.constant 3.200000e+01 : f32
      %29 = vector.broadcast %cst_23 : f32 to vector<16x1xf32>
      %30 = arith.divf %28, %29 : vector<16x1xf32>
      %31 = vector.broadcast %30 : vector<16x1xf32> to vector<16x32xf32>
      %32 = arith.subf %26, %31 : vector<16x32xf32>
      %33 = arith.mulf %32, %32 : vector<16x32xf32>
      %cst_24 = arith.constant dense<0.000000e+00> : vector<16xf32>
      %34 = vector.multi_reduction <add>, %33, %cst_24 [1] : vector<16x32xf32> to vector<16xf32>
      %35 = vector.shape_cast %34 : vector<16xf32> to vector<16x1xf32>
      %cst_25 = arith.constant 3.200000e+01 : f32
      %36 = vector.broadcast %cst_25 : f32 to vector<16x1xf32>
      %37 = arith.divf %35, %36 : vector<16x1xf32>
      %38 = vector.broadcast %30 : vector<16x1xf32> to vector<16x32xf32>
      %39 = arith.subf %26, %38 : vector<16x32xf32>
      %cst_26 = arith.constant 9.99999974E-6 : f32
      %40 = vector.broadcast %cst_26 : f32 to vector<16x1xf32>
      %41 = arith.addf %37, %40 : vector<16x1xf32>
      %42 = math.rsqrt %41 : vector<16x1xf32>
      %43 = vector.broadcast %42 : vector<16x1xf32> to vector<16x32xf32>
      %44 = arith.mulf %39, %43 : vector<16x32xf32>
      %c0_27 = arith.constant 0 : index
      %c0_28 = arith.constant 0 : index
      %45 = vector.load %arg7[%c0_27, %c0_28] : memref<1x32xf32, #tpu.memory_space<vmem>>, vector<1x32xf32>
      %46 = vector.broadcast %45 : vector<1x32xf32> to vector<16x32xf32>
      %47 = arith.mulf %44, %46 : vector<16x32xf32>
      %c0_29 = arith.constant 0 : index
      %c0_30 = arith.constant 0 : index
      %48 = vector.load %arg8[%c0_29, %c0_30] : memref<1x32xf32, #tpu.memory_space<vmem>>, vector<1x32xf32>
      %49 = vector.broadcast %48 : vector<1x32xf32> to vector<16x32xf32>
      %50 = arith.addf %47, %49 : vector<16x32xf32>
      %c0_31 = arith.constant 0 : index
      %c0_32 = arith.constant 0 : index
      %51 = vector.load %arg9[%c0_31, %c0_32] : memref<16x32xf32, #tpu.memory_space<vmem>>, vector<16x32xf32>
      tpu.vector_store %arg9[%c0_31, %c0_32], %50 {strides = array<i32>} : memref<16x32xf32, #tpu.memory_space<vmem>>, vector<16x32xf32>,
    } else {
    }
    return
  }
  func.func @transform_0(%arg0: i32, %arg1: i32) -> (i32, i32) {
    %c0_i32 = arith.constant 0 : i32
    %c0_i32_0 = arith.constant 0 : i32
    return %arg0, %c0_i32 : i32, i32
  }
  func.func @transform_1(%arg0: i32, %arg1: i32) -> (i32, i32) {
    %c0_i32 = arith.constant 0 : i32
    %c0_i32_0 = arith.constant 0 : i32
    return %c0_i32, %arg1 : i32, i32
  }
  func.func @transform_2(%arg0: i32, %arg1: i32) -> (i32, i32) {
    %c0_i32 = arith.constant 0 : i32
    %c0_i32_0 = arith.constant 0 : i32
    return %c0_i32, %arg1 : i32, i32
  }
  func.func @transform_3(%arg0: i32, %arg1: i32) -> (i32, i32) {
    %c0_i32 = arith.constant 0 : i32
    %c0_i32_0 = arith.constant 0 : i32
    return %arg1, %c0_i32 : i32, i32
  }
  func.func @transform_4(%arg0: i32, %arg1: i32) -> (i32, i32) {
    %c0_i32 = arith.constant 0 : i32
    %c0_i32_0 = arith.constant 0 : i32
    %c0_i32_1 = arith.constant 0 : i32
    return %c0_i32, %c0_i32_0 : i32, i32
  }
  func.func @transform_5(%arg0: i32, %arg1: i32) -> (i32, i32) {
    %c0_i32 = arith.constant 0 : i32
    %c0_i32_0 = arith.constant 0 : i32
    %c0_i32_1 = arith.constant 0 : i32
    return %c0_i32, %c0_i32_0 : i32, i32
  }
  func.func @transform_6(%arg0: i32, %arg1: i32) -> (i32, i32) {
    %c0_i32 = arith.constant 0 : i32
    %c0_i32_0 = arith.constant 0 : i32
    %c0_i32_1 = arith.constant 0 : i32
    return %c0_i32, %c0_i32_0 : i32, i32
  }
  func.func @transform_7(%arg0: i32, %arg1: i32) -> (i32, i32) {
    %c0_i32 = arith.constant 0 : i32
    %c0_i32_0 = arith.constant 0 : i32
    return %arg0, %c0_i32 : i32, i32
  }
}

module attributes {stable_mosaic.version = 11 : i64} {
  func.func @_mha_cross_attn_kernel(%arg0: i32, %arg1: memref<1x8x32xbf16, #tpu.memory_space<vmem>>, %arg2: memref<1x8x64xbf16, #tpu.memory_space<vmem>>, %arg3: memref<1x1x8xf32, #tpu.memory_space<vmem>>, %arg4: memref<1x8x32xbf16, #tpu.memory_space<vmem>>, %arg5: memref<1x4x8x8xf32, #tpu.memory_space<vmem>>) attributes {dimension_semantics = [#tpu.dimension_semantics<parallel>], iteration_bounds = array<i64: 2>, scalar_prefetch = 0 : i64, scratch_operands = 0 : i64, tpu.core_type = #tpu.core_type<tc>, window_params = [{transform_indices = @transform_0, window_bounds = array<i64: 1, 8, 32>}, {transform_indices = @transform_1, window_bounds = array<i64: 1, 8, 64>}, {transform_indices = @transform_2, window_bounds = array<i64: 1, 1, 8>}, {transform_indices = @transform_3, window_bounds = array<i64: 1, 8, 32>}, {transform_indices = @transform_4, window_bounds = array<i64: 1, 4, 8, 8>}]} {
    %c0 = arith.constant 0 : index
    %c0_0 = arith.constant 0 : index
    %c0_1 = arith.constant 0 : index
    %0 = vector.load %arg2[%c0, %c0_0, %c0_1] : memref<1x8x64xbf16, #tpu.memory_space<vmem>>, vector<1x8x64xbf16>
    %1 = vector.shape_cast %0 : vector<1x8x64xbf16> to vector<8x64xbf16>
    %c0_2 = arith.constant 0 : index
    %c0_3 = arith.constant 0 : index
    %c0_4 = arith.constant 0 : index
    %2 = vector.load %arg1[%c0_2, %c0_3, %c0_4] : memref<1x8x32xbf16, #tpu.memory_space<vmem>>, vector<1x8x32xbf16>
    %3 = vector.shape_cast %2 : vector<1x8x32xbf16> to vector<8x32xbf16>
    %4 = vector.extract_strided_slice %1 {offsets = [0, 0], sizes = [8, 32], strides = [1, 1]} : vector<8x64xbf16> to vector<8x32xbf16>
    %5 = vector.extract_strided_slice %1 {offsets = [0, 32], sizes = [8, 32], strides = [1, 1]} : vector<8x64xbf16> to vector<8x32xbf16>
    %c0_5 = arith.constant 0 : index
    %c0_6 = arith.constant 0 : index
    %c0_7 = arith.constant 0 : index
    %6 = vector.load %arg3[%c0_5, %c0_6, %c0_7] : memref<1x1x8xf32, #tpu.memory_space<vmem>>, vector<1x1x8xf32>
    %7 = vector.shape_cast %6 : vector<1x1x8xf32> to vector<1x8xf32>
    %cst = arith.constant 0.000000e+00 : f32
    %8 = vector.broadcast %cst : f32 to vector<1x8xf32>
    %9 = arith.cmpf oeq, %7, %8 : vector<1x8xf32>
    %10 = vector.extract_strided_slice %3 {offsets = [0, 0], sizes = [8, 8], strides = [1, 1]} : vector<8x32xbf16> to vector<8x8xbf16>
    %11 = vector.extract_strided_slice %4 {offsets = [0, 0], sizes = [8, 8], strides = [1, 1]} : vector<8x32xbf16> to vector<8x8xbf16>
    %12 = vector.extract_strided_slice %5 {offsets = [0, 0], sizes = [8, 8], strides = [1, 1]} : vector<8x32xbf16> to vector<8x8xbf16>
    %cst_8 = arith.constant dense<0.000000e+00> : vector<8x8xf32>
    %13 = tpu.matmul %10, %11, %cst_8 {dimension_numbers = #tpu.dot_dimension_numbers<[1], [1], [0], [0], [0, 0, 1, 0], [], []>} : vector<8x8xbf16>, vector<8x8xbf16>, vector<8x8xf32> -> vector<8x8xf32>
    %cst_9 = arith.constant 0.353553385 : f32
    %14 = vector.broadcast %cst_9 : f32 to vector<8x8xf32>
    %15 = arith.mulf %13, %14 : vector<8x8xf32>
    %cst_10 = arith.constant -1.000000e+10 : f32
    %16 = vector.shape_cast %9 : vector<1x8xi1> to vector<1x8xi1>
    %17 = vector.broadcast %16 : vector<1x8xi1> to vector<8x8xi1>
    %18 = vector.broadcast %cst_10 : f32 to vector<8x8xf32>
    %19 = arith.select %17, %18, %15 : vector<8x8xi1>, vector<8x8xf32>
    %cst_11 = arith.constant dense<0xFF800000> : vector<8xf32>
    %20 = vector.multi_reduction <maximumf>, %19, %cst_11 [1] : vector<8x8xf32> to vector<8xf32>
    %21 = vector.shape_cast %20 : vector<8xf32> to vector<8x1xf32>
    %22 = vector.broadcast %21 : vector<8x1xf32> to vector<8x8xf32>
    %23 = arith.subf %19, %22 : vector<8x8xf32>
    %24 = math.exp %23 : vector<8x8xf32>
    %cst_12 = arith.constant dense<0.000000e+00> : vector<8xf32>
    %25 = vector.multi_reduction <add>, %24, %cst_12 [1] : vector<8x8xf32> to vector<8xf32>
    %26 = vector.shape_cast %25 : vector<8xf32> to vector<8x1xf32>
    %27 = tpu.reciprocal %26 {approx = true} : vector<8x1xf32> -> vector<8x1xf32>
    %28 = vector.broadcast %27 : vector<8x1xf32> to vector<8x8xf32>
    %29 = arith.mulf %24, %28 : vector<8x8xf32>
    %30 = arith.truncf %29 : vector<8x8xf32> to vector<8x8xbf16>
    %cst_13 = arith.constant dense<0.000000e+00> : vector<8x8xf32>
    %31 = tpu.matmul %30, %12, %cst_13 {dimension_numbers = #tpu.dot_dimension_numbers<[1], [0], [0], [1], [0, 0, 1, 1], [], []>} : vector<8x8xbf16>, vector<8x8xbf16>, vector<8x8xf32> -> vector<8x8xf32>
    %32 = vector.extract_strided_slice %3 {offsets = [0, 8], sizes = [8, 8], strides = [1, 1]} : vector<8x32xbf16> to vector<8x8xbf16>
    %33 = vector.extract_strided_slice %4 {offsets = [0, 8], sizes = [8, 8], strides = [1, 1]} : vector<8x32xbf16> to vector<8x8xbf16>
    %34 = vector.extract_strided_slice %5 {offsets = [0, 8], sizes = [8, 8], strides = [1, 1]} : vector<8x32xbf16> to vector<8x8xbf16>
    %cst_14 = arith.constant dense<0.000000e+00> : vector<8x8xf32>
    %35 = tpu.matmul %32, %33, %cst_14 {dimension_numbers = #tpu.dot_dimension_numbers<[1], [1], [0], [0], [0, 0, 1, 0], [], []>} : vector<8x8xbf16>, vector<8x8xbf16>, vector<8x8xf32> -> vector<8x8xf32>
    %cst_15 = arith.constant 0.353553385 : f32
    %36 = vector.broadcast %cst_15 : f32 to vector<8x8xf32>
    %37 = arith.mulf %35, %36 : vector<8x8xf32>
    %cst_16 = arith.constant -1.000000e+10 : f32
    %38 = vector.shape_cast %9 : vector<1x8xi1> to vector<1x8xi1>
    %39 = vector.broadcast %38 : vector<1x8xi1> to vector<8x8xi1>
    %40 = vector.broadcast %cst_16 : f32 to vector<8x8xf32>
    %41 = arith.select %39, %40, %37 : vector<8x8xi1>, vector<8x8xf32>
    %cst_17 = arith.constant dense<0xFF800000> : vector<8xf32>
    %42 = vector.multi_reduction <maximumf>, %41, %cst_17 [1] : vector<8x8xf32> to vector<8xf32>
    %43 = vector.shape_cast %42 : vector<8xf32> to vector<8x1xf32>
    %44 = vector.broadcast %43 : vector<8x1xf32> to vector<8x8xf32>
    %45 = arith.subf %41, %44 : vector<8x8xf32>
    %46 = math.exp %45 : vector<8x8xf32>
    %cst_18 = arith.constant dense<0.000000e+00> : vector<8xf32>
    %47 = vector.multi_reduction <add>, %46, %cst_18 [1] : vector<8x8xf32> to vector<8xf32>
    %48 = vector.shape_cast %47 : vector<8xf32> to vector<8x1xf32>
    %49 = tpu.reciprocal %48 {approx = true} : vector<8x1xf32> -> vector<8x1xf32>
    %50 = vector.broadcast %49 : vector<8x1xf32> to vector<8x8xf32>
    %51 = arith.mulf %46, %50 : vector<8x8xf32>
    %52 = arith.truncf %51 : vector<8x8xf32> to vector<8x8xbf16>
    %cst_19 = arith.constant dense<0.000000e+00> : vector<8x8xf32>
    %53 = tpu.matmul %52, %34, %cst_19 {dimension_numbers = #tpu.dot_dimension_numbers<[1], [0], [0], [1], [0, 0, 1, 1], [], []>} : vector<8x8xbf16>, vector<8x8xbf16>, vector<8x8xf32> -> vector<8x8xf32>
    %54 = vector.extract_strided_slice %3 {offsets = [0, 16], sizes = [8, 8], strides = [1, 1]} : vector<8x32xbf16> to vector<8x8xbf16>
    %55 = vector.extract_strided_slice %4 {offsets = [0, 16], sizes = [8, 8], strides = [1, 1]} : vector<8x32xbf16> to vector<8x8xbf16>
    %56 = vector.extract_strided_slice %5 {offsets = [0, 16], sizes = [8, 8], strides = [1, 1]} : vector<8x32xbf16> to vector<8x8xbf16>
    %cst_20 = arith.constant dense<0.000000e+00> : vector<8x8xf32>
    %57 = tpu.matmul %54, %55, %cst_20 {dimension_numbers = #tpu.dot_dimension_numbers<[1], [1], [0], [0], [0, 0, 1, 0], [], []>} : vector<8x8xbf16>, vector<8x8xbf16>, vector<8x8xf32> -> vector<8x8xf32>
    %cst_21 = arith.constant 0.353553385 : f32
    %58 = vector.broadcast %cst_21 : f32 to vector<8x8xf32>
    %59 = arith.mulf %57, %58 : vector<8x8xf32>
    %cst_22 = arith.constant -1.000000e+10 : f32
    %60 = vector.shape_cast %9 : vector<1x8xi1> to vector<1x8xi1>
    %61 = vector.broadcast %60 : vector<1x8xi1> to vector<8x8xi1>
    %62 = vector.broadcast %cst_22 : f32 to vector<8x8xf32>
    %63 = arith.select %61, %62, %59 : vector<8x8xi1>, vector<8x8xf32>
    %cst_23 = arith.constant dense<0xFF800000> : vector<8xf32>
    %64 = vector.multi_reduction <maximumf>, %63, %cst_23 [1] : vector<8x8xf32> to vector<8xf32>
    %65 = vector.shape_cast %64 : vector<8xf32> to vector<8x1xf32>
    %66 = vector.broadcast %65 : vector<8x1xf32> to vector<8x8xf32>
    %67 = arith.subf %63, %66 : vector<8x8xf32>
    %68 = math.exp %67 : vector<8x8xf32>
    %cst_24 = arith.constant dense<0.000000e+00> : vector<8xf32>
    %69 = vector.multi_reduction <add>, %68, %cst_24 [1] : vector<8x8xf32> to vector<8xf32>
    %70 = vector.shape_cast %69 : vector<8xf32> to vector<8x1xf32>
    %71 = tpu.reciprocal %70 {approx = true} : vector<8x1xf32> -> vector<8x1xf32>
    %72 = vector.broadcast %71 : vector<8x1xf32> to vector<8x8xf32>
    %73 = arith.mulf %68, %72 : vector<8x8xf32>
    %74 = arith.truncf %73 : vector<8x8xf32> to vector<8x8xbf16>
    %cst_25 = arith.constant dense<0.000000e+00> : vector<8x8xf32>
    %75 = tpu.matmul %74, %56, %cst_25 {dimension_numbers = #tpu.dot_dimension_numbers<[1], [0], [0], [1], [0, 0, 1, 1], [], []>} : vector<8x8xbf16>, vector<8x8xbf16>, vector<8x8xf32> -> vector<8x8xf32>
    %76 = vector.extract_strided_slice %3 {offsets = [0, 24], sizes = [8, 8], strides = [1, 1]} : vector<8x32xbf16> to vector<8x8xbf16>
    %77 = vector.extract_strided_slice %4 {offsets = [0, 24], sizes = [8, 8], strides = [1, 1]} : vector<8x32xbf16> to vector<8x8xbf16>
    %78 = vector.extract_strided_slice %5 {offsets = [0, 24], sizes = [8, 8], strides = [1, 1]} : vector<8x32xbf16> to vector<8x8xbf16>
    %cst_26 = arith.constant dense<0.000000e+00> : vector<8x8xf32>
    %79 = tpu.matmul %76, %77, %cst_26 {dimension_numbers = #tpu.dot_dimension_numbers<[1], [1], [0], [0], [0, 0, 1, 0], [], []>} : vector<8x8xbf16>, vector<8x8xbf16>, vector<8x8xf32> -> vector<8x8xf32>
    %cst_27 = arith.constant 0.353553385 : f32
    %80 = vector.broadcast %cst_27 : f32 to vector<8x8xf32>
    %81 = arith.mulf %79, %80 : vector<8x8xf32>
    %cst_28 = arith.constant -1.000000e+10 : f32
    %82 = vector.shape_cast %9 : vector<1x8xi1> to vector<1x8xi1>
    %83 = vector.broadcast %82 : vector<1x8xi1> to vector<8x8xi1>
    %84 = vector.broadcast %cst_28 : f32 to vector<8x8xf32>
    %85 = arith.select %83, %84, %81 : vector<8x8xi1>, vector<8x8xf32>
    %cst_29 = arith.constant dense<0xFF800000> : vector<8xf32>
    %86 = vector.multi_reduction <maximumf>, %85, %cst_29 [1] : vector<8x8xf32> to vector<8xf32>
    %87 = vector.shape_cast %86 : vector<8xf32> to vector<8x1xf32>
    %88 = vector.broadcast %87 : vector<8x1xf32> to vector<8x8xf32>
    %89 = arith.subf %85, %88 : vector<8x8xf32>
    %90 = math.exp %89 : vector<8x8xf32>
    %cst_30 = arith.constant dense<0.000000e+00> : vector<8xf32>
    %91 = vector.multi_reduction <add>, %90, %cst_30 [1] : vector<8x8xf32> to vector<8xf32>
    %92 = vector.shape_cast %91 : vector<8xf32> to vector<8x1xf32>
    %93 = tpu.reciprocal %92 {approx = true} : vector<8x1xf32> -> vector<8x1xf32>
    %94 = vector.broadcast %93 : vector<8x1xf32> to vector<8x8xf32>
    %95 = arith.mulf %90, %94 : vector<8x8xf32>
    %96 = arith.truncf %95 : vector<8x8xf32> to vector<8x8xbf16>
    %cst_31 = arith.constant dense<0.000000e+00> : vector<8x8xf32>
    %97 = tpu.matmul %96, %78, %cst_31 {dimension_numbers = #tpu.dot_dimension_numbers<[1], [0], [0], [1], [0, 0, 1, 1], [], []>} : vector<8x8xbf16>, vector<8x8xbf16>, vector<8x8xf32> -> vector<8x8xf32>
    %98 = tpu.concatenate %31, %53, %75, %97 in 1 : vector<8x8xf32>, vector<8x8xf32>, vector<8x8xf32>, vector<8x8xf32> -> vector<8x32xf32>
    %99 = vector.shape_cast %29 : vector<8x8xf32> to vector<1x8x8xf32>
    %100 = vector.shape_cast %51 : vector<8x8xf32> to vector<1x8x8xf32>
    %101 = vector.shape_cast %73 : vector<8x8xf32> to vector<1x8x8xf32>
    %102 = vector.shape_cast %95 : vector<8x8xf32> to vector<1x8x8xf32>
    %103 = tpu.concatenate %99, %100, %101, %102 in 0 : vector<1x8x8xf32>, vector<1x8x8xf32>, vector<1x8x8xf32>, vector<1x8x8xf32> -> vector<4x8x8xf32>
    %104 = vector.shape_cast %98 : vector<8x32xf32> to vector<1x8x32xf32>
    %105 = arith.truncf %104 : vector<1x8x32xf32> to vector<1x8x32xbf16>
    %c0_32 = arith.constant 0 : index
    %c0_33 = arith.constant 0 : index
    %c0_34 = arith.constant 0 : index
    %106 = vector.load %arg4[%c0_32, %c0_33, %c0_34] : memref<1x8x32xbf16, #tpu.memory_space<vmem>>, vector<1x8x32xbf16>
    tpu.vector_store %arg4[%c0_32, %c0_33, %c0_34], %105 {strides = array<i32>} : memref<1x8x32xbf16, #tpu.memory_space<vmem>>, vector<1x8x32xbf16>,
    %107 = vector.shape_cast %103 : vector<4x8x8xf32> to vector<1x4x8x8xf32>
    %c0_35 = arith.constant 0 : index
    %c0_36 = arith.constant 0 : index
    %c0_37 = arith.constant 0 : index
    %c0_38 = arith.constant 0 : index
    %108 = vector.load %arg5[%c0_35, %c0_36, %c0_37, %c0_38] : memref<1x4x8x8xf32, #tpu.memory_space<vmem>>, vector<1x4x8x8xf32>
    tpu.vector_store %arg5[%c0_35, %c0_36, %c0_37, %c0_38], %107 {strides = array<i32>} : memref<1x4x8x8xf32, #tpu.memory_space<vmem>>, vector<1x4x8x8xf32>,
    return
  }
  func.func @transform_0(%arg0: i32) -> (i32, i32, i32) {
    %c0_i32 = arith.constant 0 : i32
    %c0_i32_0 = arith.constant 0 : i32
    %c0_i32_1 = arith.constant 0 : i32
    return %arg0, %c0_i32, %c0_i32_0 : i32, i32, i32
  }
  func.func @transform_1(%arg0: i32) -> (i32, i32, i32) {
    %c0_i32 = arith.constant 0 : i32
    %c0_i32_0 = arith.constant 0 : i32
    %c0_i32_1 = arith.constant 0 : i32
    return %arg0, %c0_i32, %c0_i32_0 : i32, i32, i32
  }
  func.func @transform_2(%arg0: i32) -> (i32, i32, i32) {
    %c0_i32 = arith.constant 0 : i32
    %c0_i32_0 = arith.constant 0 : i32
    %c0_i32_1 = arith.constant 0 : i32
    return %arg0, %c0_i32, %c0_i32_0 : i32, i32, i32
  }
  func.func @transform_3(%arg0: i32) -> (i32, i32, i32) {
    %c0_i32 = arith.constant 0 : i32
    %c0_i32_0 = arith.constant 0 : i32
    %c0_i32_1 = arith.constant 0 : i32
    return %arg0, %c0_i32, %c0_i32_0 : i32, i32, i32
  }
  func.func @transform_4(%arg0: i32) -> (i32, i32, i32, i32) {
    %c0_i32 = arith.constant 0 : i32
    %c0_i32_0 = arith.constant 0 : i32
    %c0_i32_1 = arith.constant 0 : i32
    %c0_i32_2 = arith.constant 0 : i32
    return %arg0, %c0_i32, %c0_i32_0, %c0_i32_1 : i32, i32, i32, i32
  }
}

module attributes {stable_mosaic.version = 11 : i64} {
  func.func @_linear_kernel(%arg0: i32, %arg1: i32, %arg2: i32, %arg3: memref<16x32xf32, #tpu.memory_space<vmem>>, %arg4: memref<32x64xbf16, #tpu.memory_space<vmem>>, %arg5: memref<1x64xf32, #tpu.memory_space<vmem>>, %arg6: memref<16x64xbf16, #tpu.memory_space<vmem>>, %arg7: memref<16x64xf32, #tpu.memory_space<vmem>>) attributes {dimension_semantics = [#tpu.dimension_semantics<parallel>, #tpu.dimension_semantics<parallel>, #tpu.dimension_semantics<arbitrary>], iteration_bounds = array<i64: 1, 1, 1>, scalar_prefetch = 0 : i64, scratch_operands = 1 : i64, tpu.core_type = #tpu.core_type<tc>, window_params = [{transform_indices = @transform_0, window_bounds = array<i64: 16, 32>}, {transform_indices = @transform_1, window_bounds = array<i64: 32, 64>}, {transform_indices = @transform_2, window_bounds = array<i64: 1, 64>}, {transform_indices = @transform_3, window_bounds = array<i64: 16, 64>}]} {
    %c0_i32 = arith.constant 0 : i32
    %0 = arith.cmpi eq, %arg2, %c0_i32 : i32
    %1 = arith.extui %0 : i1 to i32
    %c0_i32_0 = arith.constant 0 : i32
    %2 = arith.cmpi ne, %1, %c0_i32_0 : i32
    scf.if %2 {
      %cst_10 = arith.constant 0.000000e+00 : f32
      %13 = vector.broadcast %cst_10 : f32 to vector<16x64xf32>
      %c0_11 = arith.constant 0 : index
      %c0_12 = arith.constant 0 : index
      %14 = vector.load %arg7[%c0_11, %c0_12] : memref<16x64xf32, #tpu.memory_space<vmem>>, vector<16x64xf32>
      tpu.vector_store %arg7[%c0_11, %c0_12], %13 {strides = array<i32>} : memref<16x64xf32, #tpu.memory_space<vmem>>, vector<16x64xf32>,
    } else {
    }
    %c0 = arith.constant 0 : index
    %c0_1 = arith.constant 0 : index
    %3 = vector.load %arg7[%c0, %c0_1] : memref<16x64xf32, #tpu.memory_space<vmem>>, vector<16x64xf32>
    %c0_2 = arith.constant 0 : index
    %c0_3 = arith.constant 0 : index
    %4 = vector.load %arg3[%c0_2, %c0_3] : memref<16x32xf32, #tpu.memory_space<vmem>>, vector<16x32xf32>
    %5 = arith.truncf %4 : vector<16x32xf32> to vector<16x32xbf16>
    %c0_4 = arith.constant 0 : index
    %c0_5 = arith.constant 0 : index
    %6 = vector.load %arg4[%c0_4, %c0_5] : memref<32x64xbf16, #tpu.memory_space<vmem>>, vector<32x64xbf16>
    %cst = arith.constant dense<0.000000e+00> : vector<16x64xf32>
    %7 = tpu.matmul %5, %6, %cst {dimension_numbers = #tpu.dot_dimension_numbers<[1], [0], [0], [1], [0, 0, 1, 1], [], []>} : vector<16x32xbf16>, vector<32x64xbf16>, vector<16x64xf32> -> vector<16x64xf32>
    %8 = arith.addf %3, %7 : vector<16x64xf32>
    %c0_6 = arith.constant 0 : index
    %c0_7 = arith.constant 0 : index
    %9 = vector.load %arg7[%c0_6, %c0_7] : memref<16x64xf32, #tpu.memory_space<vmem>>, vector<16x64xf32>
    tpu.vector_store %arg7[%c0_6, %c0_7], %8 {strides = array<i32>} : memref<16x64xf32, #tpu.memory_space<vmem>>, vector<16x64xf32>,
    %c0_i32_8 = arith.constant 0 : i32
    %10 = arith.cmpi eq, %arg2, %c0_i32_8 : i32
    %11 = arith.extui %10 : i1 to i32
    %c0_i32_9 = arith.constant 0 : i32
    %12 = arith.cmpi ne, %11, %c0_i32_9 : i32
    scf.if %12 {
      %c0_10 = arith.constant 0 : index
      %c0_11 = arith.constant 0 : index
      %13 = vector.load %arg7[%c0_10, %c0_11] : memref<16x64xf32, #tpu.memory_space<vmem>>, vector<16x64xf32>
      %c0_12 = arith.constant 0 : index
      %c0_13 = arith.constant 0 : index
      %14 = vector.load %arg5[%c0_12, %c0_13] : memref<1x64xf32, #tpu.memory_space<vmem>>, vector<1x64xf32>
      %15 = vector.broadcast %14 : vector<1x64xf32> to vector<16x64xf32>
      %16 = arith.addf %13, %15 : vector<16x64xf32>
      %17 = arith.truncf %16 : vector<16x64xf32> to vector<16x64xbf16>
      %c0_14 = arith.constant 0 : index
      %c0_15 = arith.constant 0 : index
      %18 = vector.load %arg6[%c0_14, %c0_15] : memref<16x64xbf16, #tpu.memory_space<vmem>>, vector<16x64xbf16>
      tpu.vector_store %arg6[%c0_14, %c0_15], %17 {strides = array<i32>} : memref<16x64xbf16, #tpu.memory_space<vmem>>, vector<16x64xbf16>,
    } else {
    }
    return
  }
  func.func @transform_0(%arg0: i32, %arg1: i32, %arg2: i32) -> (i32, i32) {
    %c0_i32 = arith.constant 0 : i32
    return %arg0, %arg2 : i32, i32
  }
  func.func @transform_1(%arg0: i32, %arg1: i32, %arg2: i32) -> (i32, i32) {
    %c0_i32 = arith.constant 0 : i32
    return %arg2, %arg1 : i32, i32
  }
  func.func @transform_2(%arg0: i32, %arg1: i32, %arg2: i32) -> (i32, i32) {
    %c0_i32 = arith.constant 0 : i32
    %c0_i32_0 = arith.constant 0 : i32
    return %c0_i32, %arg1 : i32, i32
  }
  func.func @transform_3(%arg0: i32, %arg1: i32, %arg2: i32) -> (i32, i32) {
    %c0_i32 = arith.constant 0 : i32
    return %arg0, %arg1 : i32, i32
  }
}

module attributes {stable_mosaic.version = 11 : i64} {
  func.func @_linear_kernel(%arg0: i32, %arg1: i32, %arg2: i32, %arg3: memref<16x32xf32, #tpu.memory_space<vmem>>, %arg4: memref<32x20xbf16, #tpu.memory_space<vmem>>, %arg5: memref<1x20xf32, #tpu.memory_space<vmem>>, %arg6: memref<16x20xf32, #tpu.memory_space<vmem>>, %arg7: memref<16x20xf32, #tpu.memory_space<vmem>>) attributes {dimension_semantics = [#tpu.dimension_semantics<parallel>, #tpu.dimension_semantics<parallel>, #tpu.dimension_semantics<arbitrary>], iteration_bounds = array<i64: 1, 1, 1>, scalar_prefetch = 0 : i64, scratch_operands = 1 : i64, tpu.core_type = #tpu.core_type<tc>, window_params = [{transform_indices = @transform_0, window_bounds = array<i64: 16, 32>}, {transform_indices = @transform_1, window_bounds = array<i64: 32, 20>}, {transform_indices = @transform_2, window_bounds = array<i64: 1, 20>}, {transform_indices = @transform_3, window_bounds = array<i64: 16, 20>}]} {
    %c0_i32 = arith.constant 0 : i32
    %0 = arith.cmpi eq, %arg2, %c0_i32 : i32
    %1 = arith.extui %0 : i1 to i32
    %c0_i32_0 = arith.constant 0 : i32
    %2 = arith.cmpi ne, %1, %c0_i32_0 : i32
    scf.if %2 {
      %cst_10 = arith.constant 0.000000e+00 : f32
      %13 = vector.broadcast %cst_10 : f32 to vector<16x20xf32>
      %c0_11 = arith.constant 0 : index
      %c0_12 = arith.constant 0 : index
      %14 = vector.load %arg7[%c0_11, %c0_12] : memref<16x20xf32, #tpu.memory_space<vmem>>, vector<16x20xf32>
      tpu.vector_store %arg7[%c0_11, %c0_12], %13 {strides = array<i32>} : memref<16x20xf32, #tpu.memory_space<vmem>>, vector<16x20xf32>,
    } else {
    }
    %c0 = arith.constant 0 : index
    %c0_1 = arith.constant 0 : index
    %3 = vector.load %arg7[%c0, %c0_1] : memref<16x20xf32, #tpu.memory_space<vmem>>, vector<16x20xf32>
    %c0_2 = arith.constant 0 : index
    %c0_3 = arith.constant 0 : index
    %4 = vector.load %arg3[%c0_2, %c0_3] : memref<16x32xf32, #tpu.memory_space<vmem>>, vector<16x32xf32>
    %5 = arith.truncf %4 : vector<16x32xf32> to vector<16x32xbf16>
    %c0_4 = arith.constant 0 : index
    %c0_5 = arith.constant 0 : index
    %6 = vector.load %arg4[%c0_4, %c0_5] : memref<32x20xbf16, #tpu.memory_space<vmem>>, vector<32x20xbf16>
    %cst = arith.constant dense<0.000000e+00> : vector<16x20xf32>
    %7 = tpu.matmul %5, %6, %cst {dimension_numbers = #tpu.dot_dimension_numbers<[1], [0], [0], [1], [0, 0, 1, 1], [], []>} : vector<16x32xbf16>, vector<32x20xbf16>, vector<16x20xf32> -> vector<16x20xf32>
    %8 = arith.addf %3, %7 : vector<16x20xf32>
    %c0_6 = arith.constant 0 : index
    %c0_7 = arith.constant 0 : index
    %9 = vector.load %arg7[%c0_6, %c0_7] : memref<16x20xf32, #tpu.memory_space<vmem>>, vector<16x20xf32>
    tpu.vector_store %arg7[%c0_6, %c0_7], %8 {strides = array<i32>} : memref<16x20xf32, #tpu.memory_space<vmem>>, vector<16x20xf32>,
    %c0_i32_8 = arith.constant 0 : i32
    %10 = arith.cmpi eq, %arg2, %c0_i32_8 : i32
    %11 = arith.extui %10 : i1 to i32
    %c0_i32_9 = arith.constant 0 : i32
    %12 = arith.cmpi ne, %11, %c0_i32_9 : i32
    scf.if %12 {
      %c0_10 = arith.constant 0 : index
      %c0_11 = arith.constant 0 : index
      %13 = vector.load %arg7[%c0_10, %c0_11] : memref<16x20xf32, #tpu.memory_space<vmem>>, vector<16x20xf32>
      %c0_12 = arith.constant 0 : index
      %c0_13 = arith.constant 0 : index
      %14 = vector.load %arg5[%c0_12, %c0_13] : memref<1x20xf32, #tpu.memory_space<vmem>>, vector<1x20xf32>
      %15 = vector.broadcast %14 : vector<1x20xf32> to vector<16x20xf32>
      %16 = arith.addf %13, %15 : vector<16x20xf32>
      %c0_14 = arith.constant 0 : index
      %c0_15 = arith.constant 0 : index
      %17 = vector.load %arg6[%c0_14, %c0_15] : memref<16x20xf32, #tpu.memory_space<vmem>>, vector<16x20xf32>
      tpu.vector_store %arg6[%c0_14, %c0_15], %16 {strides = array<i32>} : memref<16x20xf32, #tpu.memory_space<vmem>>, vector<16x20xf32>,
    } else {
    }
    return
  }
  func.func @transform_0(%arg0: i32, %arg1: i32, %arg2: i32) -> (i32, i32) {
    %c0_i32 = arith.constant 0 : i32
    return %arg0, %arg2 : i32, i32
  }
  func.func @transform_1(%arg0: i32, %arg1: i32, %arg2: i32) -> (i32, i32) {
    %c0_i32 = arith.constant 0 : i32
    return %arg2, %arg1 : i32, i32
  }
  func.func @transform_2(%arg0: i32, %arg1: i32, %arg2: i32) -> (i32, i32) {
    %c0_i32 = arith.constant 0 : i32
    %c0_i32_0 = arith.constant 0 : i32
    return %c0_i32, %arg1 : i32, i32
  }
  func.func @transform_3(%arg0: i32, %arg1: i32, %arg2: i32) -> (i32, i32) {
    %c0_i32 = arith.constant 0 : i32
    return %arg0, %arg1 : i32, i32
  }
}

</mosaic_0001>

<bundles_post_ra>
// kernel: decoder_forward.17
= control target key start
LH: loop header
LB: loop body
LE: loop exit
PB: predicated region body
PF: predicated region fallthrough
CT: control target
= control target key end

     0   :  { %vm19_vm0 = vcmask 785408   ;;  %v145_v0 = vmov 0.0   ;;  %vm146_vm1 = vmmov 0   ;;  %vm43_vm2 = vcmask 261120   ;;  %s192_s1 = inlined_call_operand.vmem [shape: bf16[32,96], index: 1, kind: input, shape index: {}]   ;;  %s193_s0 = inlined_call_operand.vmem [shape: f32[16,32], index: 0, kind: input, shape index: {}]   ;;  %s194_s2 = inlined_call_operand.vmem [shape: f32[1,96], index: 2, kind: input, shape index: {}]   ;;  %s195_s3 = inlined_call_operand.vmem [shape: bf16[16,96], index: 3, kind: output, shape index: {}]  }
   0x1   :  { %133 = vmatprep.subr.bf16.mxu0 %v145_v0  ;;  %v143_v1 = vld [vmem:[%s192_s1 + $0x8] sm:$0xff]   ;;  %137 = vmatprep.mubr.msk.bf16.mxu0 %vm146_vm1, %v145_v0  ;;  %20 = vst.msk [vmem:[#allocation2] sm:$0xff] %vm19_vm0, %v145_v0  ;;  %21 = vst.msk [vmem:[#allocation2 + $0x8] sm:$0xff] %vm19_vm0, %v145_v0  ;;  %v144_v2 = vld [vmem:[%s192_s1] sm:$0xff]   ;;  %vm115_vm3 = vcmask 781312  }
   0x2   :  { %134 = vmatpush3.bf16.msra.mxu0 %v143_v1  ;;  %v24_v3 = vld [vmem:[%s193_s0] sm:$0xff]  ;;  %v25_v4 = vld [vmem:[%s193_s0 + $0x8] sm:$0xff] }
   0x3   :  { %135 = vmatprep.subr.bf16.mxu0 %v145_v0  ;;  %v26_v5 = vpack.c.bf16 %v25_v4, %v24_v3  ;;  %v125_v14 = vld [vmem:[%s194_s2] ss:$0 sm:$0xff] }
   0x6   :  { %136 = vmatpush3.bf16.msra.mxu0 %v144_v2 }
   0x8   :  { %v22_v6 = vld [vmem:[#allocation2] sm:$0xff]  ;;  %v23_v10 = vld [vmem:[#allocation2 + $0x8] sm:$0xff] }
   0x9   :  { %138 = vmatmul.mubr.msk.bf16.vlgmr.msra.gmra.mxu0 %vm43_vm2, %v26_v5 }
  0xc9   :  { %v81_v7 = vpop.f32.mrf.mxu0 }
  0xca   :  { %v88_v8 = vadd.f32 %v81_v7, %v22_v6 }
  0xcb   :  { %v139_v9 = vpop.f32.mrf.mxu0 }
  0xcc   :  { %91 = vst.msk [vmem:[#allocation2] sm:$0xff] %vm19_vm0, %v88_v8 }
  0xcd   :  { %v84_v11 = vpop.f32.mrf.mxu0 }
  0xce   :  { %v89_v12 = vadd.f32 %v84_v11, %v23_v10 }
  0xcf   :  { %v140_v13 = vpop.f32.mrf.mxu0 }
  0xd0   :  { %92 = vst.msk [vmem:[#allocation2 + $0x8] sm:$0xff] %vm19_vm0, %v89_v12 }
  0xd3   :  { %v96_v15 = vld [vmem:[#allocation2] sm:$0xff] }
  0xd4   :  { %v105_v16 = vadd.f32 %v125_v14, %v96_v15 }
  0xd6   :  { %v128_v17 = vpack.c.bf16 %v105_v16, %v105_v16 }
  0xd7   :  { %v97_v18 = vld [vmem:[#allocation2 + $0x8] sm:$0xff] }
  0xd8   :  { %116 = vst.msk [vmem:[%s195_s3] sm:$0xf] %vm115_vm3, %v128_v17  ;;  %v106_v19 = vadd.f32 %v125_v14, %v97_v18 }
  0xda   :  { %v129_v20 = vpack.c.bf16 %v106_v19, %v106_v19 }
  0xdc   :  { %117 = vst.msk [vmem:[%s195_s3 + $0x4] sm:$0xf] %vm115_vm3, %v129_v20 }

// kernel: decoder_forward.19
= control target key start
LH: loop header
LB: loop body
LE: loop exit
PB: predicated region body
PF: predicated region fallthrough
CT: control target
= control target key end

     0   :  { %vm28_vm0 = vcmask 261120   ;;  %v201_v0 = vmov 0.0   ;;  %vm202_vm1 = vmmov 0   ;;  %s279_s1 = inlined_call_operand.vmem [shape: bf16[32,32], index: 1, kind: input, shape index: {}]   ;;  %s280_s0 = inlined_call_operand.vmem [shape: bf16[16,32], index: 0, kind: input, shape index: {}]   ;;  %s281_s2 = inlined_call_operand.vmem [shape: f32[1,32], index: 2, kind: input, shape index: {}]   ;;  %s282_s3 = inlined_call_operand.vmem [shape: f32[16,32], index: 3, kind: input, shape index: {}]   ;;  %s283_s4 = inlined_call_operand.vmem [shape: f32[1,32], index: 4, kind: input, shape index: {}]   ;;  %s284_s5 = inlined_call_operand.vmem [shape: f32[1,32], index: 5, kind: input, shape index: {}]   ;;  %s285_s6 = inlined_call_operand.vmem [shape: f32[16,32], index: 6, kind: output, shape index: {}]  }
   0x1   :  { %184 = vmatprep.subr.bf16.mxu0 %v201_v0  ;;  %v194_v1 = vld [vmem:[%s279_s1 + $0x8] sm:$0xff]   ;;  %188 = vmatprep.mubr.msk.bf16.mxu0 %vm202_vm1, %v201_v0  ;;  %29 = vst.msk [vmem:[#allocation2] sm:$0xff] %vm28_vm0, %v201_v0  ;;  %30 = vst.msk [vmem:[#allocation2 + $0x8] sm:$0xff] %vm28_vm0, %v201_v0  ;;  %v195_v2 = vld [vmem:[%s279_s1] sm:$0xff]  }
   0x2   :  { %185 = vmatpush3.bf16.msra.mxu0 %v194_v1  ;;  %v196_v3 = vld [vmem:[%s280_s0] sm:$0xff]   ;;  %v120_v18 = vld [vmem:[%s282_s3 + $0x8] sm:$0xff] }
   0x3   :  { %186 = vmatprep.subr.bf16.mxu0 %v201_v0  ;;  %v178_v12 = vld [vmem:[%s281_s2] ss:$0 sm:$0xff] }
   0x4   :  { %v119_v14 = vld [vmem:[%s282_s3] sm:$0xff] }
   0x5   :  { %v179_v40 = vld [vmem:[%s283_s4] ss:$0 sm:$0xff] }
   0x6   :  { %187 = vmatpush3.bf16.msra.mxu0 %v195_v2  ;;  %v180_v42 = vld [vmem:[%s284_s5] ss:$0 sm:$0xff] }
   0x8   :  { %v31_v4 = vld [vmem:[#allocation2] sm:$0xff]  ;;  %v32_v8 = vld [vmem:[#allocation2 + $0x8] sm:$0xff] }
   0x9   :  { %189 = vmatmul.mubr.msk.bf16.vlgmr.msra.gmra.mxu0 %vm28_vm0, %v196_v3 }
  0xc9   :  { %v94_v5 = vpop.f32.mrf.mxu0 }
  0xca   :  { %v101_v6 = vadd.f32 %v94_v5, %v31_v4 }
  0xcb   :  { %v190_v7 = vpop.f32.mrf.mxu0 }
  0xcc   :  { %103 = vst.msk [vmem:[#allocation2] sm:$0xff] %vm28_vm0, %v101_v6 }
  0xcd   :  { %v97_v9 = vpop.f32.mrf.mxu0 }
  0xce   :  { %v102_v10 = vadd.f32 %v97_v9, %v32_v8 }
  0xcf   :  { %v191_v11 = vpop.f32.mrf.mxu0 }
  0xd0   :  { %104 = vst.msk [vmem:[#allocation2 + $0x8] sm:$0xff] %vm28_vm0, %v102_v10 }
  0xd3   :  { %v108_v13 = vld [vmem:[#allocation2] sm:$0xff] }
  0xd4   :  { %v117_v15 = vadd.f32 %v178_v12, %v108_v13 }
  0xd6   :  { %v121_v16 = vadd.f32 %v119_v14, %v117_v15 }
  0xd7   :  { %v109_v17 = vld [vmem:[#allocation2 + $0x8] sm:$0xff] }
  0xd8   :  { %v123_v19 = vsel %vm28_vm0, %v121_v16, 0.0  ;;  %v118_v20 = vadd.f32 %v178_v12, %v109_v17 }
  0xd9   :  { %124 = vadd.xlane.f32.xlu0 %v123_v19 }
  0xda   :  { %v122_v21 = vadd.f32 %v120_v18, %v118_v20 }
  0xdc   :  { %v126_v22 = vsel %vm28_vm0, %v122_v21, 0.0 }
  0xdd   :  { %127 = vadd.xlane.f32.xlu0 %v126_v22 }
 0x162   :  { %v125_v23 = vpop.xlane.xlu0 %124 }
 0x163   :  { %v130_v24 = vmul.f32 0.03125, %v125_v23 }
 0x165   :  { %v132_v25 = vsub.f32 %v121_v16, %v130_v24 }
 0x166   :  { %v128_v26 = vpop.xlane.xlu0 %127 }
 0x167   :  { %v131_v27 = vmul.f32 0.03125, %v128_v26  ;;  %v134_v28 = vmul.f32 %v132_v25, %v132_v25 }
 0x169   :  { %v133_v29 = vsub.f32 %v122_v21, %v131_v27  ;;  %v136_v30 = vsel %vm28_vm0, %v134_v28, 0.0 }
 0x16a   :  { %137 = vadd.xlane.f32.xlu1 %v136_v30 }
 0x16b   :  { %v135_v31 = vmul.f32 %v133_v29, %v133_v29 }
 0x16d   :  { %v139_v32 = vsel %vm28_vm0, %v135_v31, 0.0 }
 0x16e   :  { %140 = vadd.xlane.f32.xlu1 %v139_v32 }
 0x1f3   :  { %v138_v33 = vpop.xlane.xlu1 %137 }
 0x1f4   :  { %v142_v34 = vmul.f32 0.03125, %v138_v33 }
 0x1f6   :  { %v144_v35 = vadd.f32 1e-05, %v142_v34 }
 0x1f7   :  { %v141_v36 = vpop.xlane.xlu1 %140 }
 0x1f8   :  { %197 = vrsqrt.f32 %v144_v35  ;;  %v143_v37 = vmul.f32 0.03125, %v141_v36 }
 0x1fa   :  { %v145_v38 = vadd.f32 1e-05, %v143_v37 }
 0x1fc   :  { %199 = vrsqrt.f32 %v145_v38 }
 0x205   :  { %v198_v39 = vpop.eup %197 }
 0x206   :  { %v148_v41 = vmul.f32 %v198_v39, %v132_v25 }
 0x208   :  { %v157_v43 = vmul.f32 %v179_v40, %v148_v41 }
 0x209   :  { %v200_v44 = vpop.eup %199 }
 0x20a   :  { %v166_v45 = vadd.f32 %v180_v42, %v157_v43  ;;  %v149_v46 = vmul.f32 %v200_v44, %v133_v29 }
 0x20c   :  { %168 = vst.msk [vmem:[%s285_s6] sm:$0xff] %vm28_vm0, %v166_v45  ;;  %v158_v47 = vmul.f32 %v179_v40, %v149_v46 }
 0x20e   :  { %v167_v48 = vadd.f32 %v180_v42, %v158_v47 }
 0x210   :  { %169 = vst.msk [vmem:[%s285_s6 + $0x8] sm:$0xff] %vm28_vm0, %v167_v48 }

// kernel: decoder_forward.20
= control target key start
LH: loop header
LB: loop body
LE: loop exit
PB: predicated region body
PF: predicated region fallthrough
CT: control target
= control target key end

     0   :  { %vm19_vm0 = vcmask 261120   ;;  %v144_v0 = vmov 0.0   ;;  %vm145_vm1 = vmmov 0   ;;  %vm114_vm2 = vcmask 257024   ;;  %s192_s1 = inlined_call_operand.vmem [shape: bf16[32,32], index: 1, kind: input, shape index: {}]   ;;  %s193_s0 = inlined_call_operand.vmem [shape: f32[16,32], index: 0, kind: input, shape index: {}]   ;;  %s194_s2 = inlined_call_operand.vmem [shape: f32[1,32], index: 2, kind: input, shape index: {}]   ;;  %s195_s3 = inlined_call_operand.vmem [shape: bf16[16,32], index: 3, kind: output, shape index: {}]  }
   0x1   :  { %132 = vmatprep.subr.bf16.mxu0 %v144_v0  ;;  %v142_v1 = vld [vmem:[%s192_s1 + $0x8] sm:$0xff]   ;;  %136 = vmatprep.mubr.msk.bf16.mxu0 %vm145_vm1, %v144_v0  ;;  %20 = vst.msk [vmem:[#allocation2] sm:$0xff] %vm19_vm0, %v144_v0  ;;  %21 = vst.msk [vmem:[#allocation2 + $0x8] sm:$0xff] %vm19_vm0, %v144_v0  ;;  %v143_v2 = vld [vmem:[%s192_s1] sm:$0xff]  }
   0x2   :  { %133 = vmatpush3.bf16.msra.mxu0 %v142_v1  ;;  %v24_v3 = vld [vmem:[%s193_s0] sm:$0xff]  ;;  %v25_v4 = vld [vmem:[%s193_s0 + $0x8] sm:$0xff] }
   0x3   :  { %134 = vmatprep.subr.bf16.mxu0 %v144_v0  ;;  %v26_v5 = vpack.c.bf16 %v25_v4, %v24_v3  ;;  %v124_v14 = vld [vmem:[%s194_s2] ss:$0 sm:$0xff] }
   0x6   :  { %135 = vmatpush3.bf16.msra.mxu0 %v143_v2 }
   0x8   :  { %v22_v6 = vld [vmem:[#allocation2] sm:$0xff]  ;;  %v23_v10 = vld [vmem:[#allocation2 + $0x8] sm:$0xff] }
   0x9   :  { %137 = vmatmul.mubr.msk.bf16.vlgmr.msra.gmra.mxu0 %vm19_vm0, %v26_v5 }
  0xc9   :  { %v81_v7 = vpop.f32.mrf.mxu0 }
  0xca   :  { %v88_v8 = vadd.f32 %v81_v7, %v22_v6 }
  0xcb   :  { %v138_v9 = vpop.f32.mrf.mxu0 }
  0xcc   :  { %90 = vst.msk [vmem:[#allocation2] sm:$0xff] %vm19_vm0, %v88_v8 }
  0xcd   :  { %v84_v11 = vpop.f32.mrf.mxu0 }
  0xce   :  { %v89_v12 = vadd.f32 %v84_v11, %v23_v10 }
  0xcf   :  { %v139_v13 = vpop.f32.mrf.mxu0 }
  0xd0   :  { %91 = vst.msk [vmem:[#allocation2 + $0x8] sm:$0xff] %vm19_vm0, %v89_v12 }
  0xd3   :  { %v95_v15 = vld [vmem:[#allocation2] sm:$0xff] }
  0xd4   :  { %v104_v16 = vadd.f32 %v124_v14, %v95_v15 }
  0xd6   :  { %v127_v17 = vpack.c.bf16 %v104_v16, %v104_v16 }
  0xd7   :  { %v96_v18 = vld [vmem:[#allocation2 + $0x8] sm:$0xff] }
  0xd8   :  { %115 = vst.msk [vmem:[%s195_s3] sm:$0xf] %vm114_vm2, %v127_v17  ;;  %v105_v19 = vadd.f32 %v124_v14, %v96_v18 }
  0xda   :  { %v128_v20 = vpack.c.bf16 %v105_v19, %v105_v19 }
  0xdc   :  { %116 = vst.msk [vmem:[%s195_s3 + $0x4] sm:$0xf] %vm114_vm2, %v128_v20 }

// kernel: decoder_forward.18
= control target key start
LH: loop header
LB: loop body
LE: loop exit
PB: predicated region body
PF: predicated region fallthrough
CT: control target
= control target key end

     0   :  { %s859_s9 = smov 0   ;;  %s963_s0 = inlined_call_operand.vmem [shape: bf16[2,8,96], index: 0, kind: input, shape index: {}]   ;;  %s964_s1 = inlined_call_operand.vmem [shape: f32[2,8,8], index: 1, kind: input, shape index: {}]   ;;  %s965_s2 = inlined_call_operand.vmem [shape: bf16[2,8,32], index: 2, kind: output, shape index: {}]  }
   0x1 LB: > { %s696_s10 = sadd.s32 4294967295, %s826_s9   ;;  %p700_p0 = scmp.ge.s32.totalorder %s826_s9, 1  ;;  %s826_s9 = sphi %s859_s9, %s12_s9  }
   0x2   : > { %p120_p1 = scmp.lt.s32.totalorder %s826_s9, 3 }
   0x4   : > { %p121_p2 = pnand %p700_p0, %p120_p1 }
   0x5   : > { %p144_p3 = scmp.lt.s32.totalorder (!%p121_p2), %s696_s10, 1  ;;  %s830_s15 = smov (!%p121_p2), 96  }
   0x6   : > { %124 = sbr.rel (%p121_p2) target bundleno = 1541 (0x605), region = 28  ;;  %s831_s16 = smov (!%p121_p2), 64  }
   0x7   : > { %s832_s17 = smov (!%p121_p2), 88   ;;  %s833_s22 = smov (!%p121_p2), 72  }
   0x8   : > { %s834_s23 = smov (!%p121_p2), 120   ;;  %s835_s24 = smov (!%p121_p2), 80  }
   0x9   : > { %s836_s25 = smov (!%p121_p2), 112   ;;  %s837_s26 = smov (!%p121_p2), 104  }
   0xa   : > { %s838_s27 = smov (!%p121_p2), 56   ;;  %s839_s28 = smov (!%p121_p2), 48  }
   0xb   : > { %v828_v0 = vmov 0.0   ;;  %vm829_vm0 = vmmov 0   ;;  %s967_s10 = smov (!%p144_p3, %s696_s10), 1  ;;  %vm165_vm1 = vcmask 64512   ;;  %vm231_vm3 = vcmask 1043456   ;;  %s840_s29 = smov 40  }
   0xc   : > { %731 = vmatprep.subr.bf16.mxu0 %v828_v0  ;;  %733 = vmatprep.mubr.msk.bf16.mxu0 %vm829_vm0, %v828_v0  ;;  %s701_s11 = sshll.u32 %s967_s10, 2  ;;  %s702_s18 = sshll.u32 %s967_s10, 3  ;;  %vm624_vm4 = vcmask 130048   ;;  %vm626_vm5 = vcmask 195584   ;;  %vm629_vm6 = vcmask 257024  }
   0xd   : > { %737 = vmatprep.subr.bf16.mxu1 %v828_v0  ;;  %739 = vmatprep.mubr.msk.bf16.mxu1 %vm829_vm0, %v828_v0  ;;  %s147_s14 = scalar_lea.vmem %s963_s0, %s701_s11  ;;  %s151_s21 = scalar_lea.vmem %s964_s1, %s702_s18 }
   0xe   : > { %v157_v1 = vld [vmem:[%s147_s14] sm:$0xf]  ;;  %s841_s30 = smov 8   ;;  %s842_s3 = smov 16  }
   0xf   : > { %v881_v2 = vcombine.low %v157_v1, %v157_v1  ;;  %v895_v5 = vld [vmem:[%s151_s21] sm:$0xff]  ;;  %s843_s4 = smov 24   ;;  %s155_s7 = scalar_lea.vmem %s965_s2, %s701_s11 }
  0x10   : > { %vm159_vm2 = vcmp.eq.f32.partialorder %v895_v5, 0.0 }
  0x11   : > { %163 = vrot.lane.b32.xlu0 %v881_v2, %s830_s15  ;;  %226 = vrot.lane.b32.xlu1 %v881_v2, %s831_s16 }
  0x15   : > { %277 = vrot.lane.b32.xlu1 %v881_v2, %s832_s17 }
  0x83   : > { %v164_v3 = vpop.permute.xlu0 %163  ;;  %v227_v13 = vpop.permute.xlu1 %226 }
  0x84   : > { %v170_v4 = vsel %vm165_vm1, %v164_v3, 0  ;;  %v233_v14 = vsel %vm231_vm3, %v227_v13, 0 }
  0x85   : > { %732 = vmatpush3.bf16.xpose.msra.mxu0 %v170_v4  ;;  %738 = vmatpush3.bf16.msra.mxu1 %v233_v14 }
  0x86   : > { %749 = vmatprep.subr.bf16.mxu0 %v828_v0  ;;  %743 = vmatprep.subr.bf16.mxu1 %v828_v0 }
  0x87   : > { %v278_v20 = vpop.permute.xlu1 %277 }
  0x88   : > { %v283_v26 = vsel %vm165_vm1, %v278_v20, 0 }
  0x8c   : > { %734 = vmatmul.mubr.msk.bf16.vlgmr.msra.gmra.mxu0 %vm165_vm1, %v157_v1 }
  0x8d   : > { %751 = vmatprep.mubr.msk.bf16.mxu0 %vm829_vm0, %v828_v0 }
 0x14c   : > { %v206_v6 = vpop.f32.mrf.mxu0 }
 0x14d   : > { %v212_v7 = vmul.f32 0.35355338, %v206_v6 }
 0x14e   : > { %v735_v8 = vpop.f32.mrf.mxu0 }
 0x14f   : > { %v213_v9 = vsel %vm159_vm2, -1e+10, %v212_v7 }
 0x150   : > { %v209_v10 = vpop.f32.mrf.mxu0  ;;  %v214_v11 = vsel %vm165_vm1, %v213_v9, -inf }
 0x151   : > { %215 = vmax.xlane.f32.xlu0 %v214_v11 }
 0x152   : > { %v736_v12 = vpop.f32.mrf.mxu0 }
 0x167   : > { %501 = vrot.lane.b32.xlu0 %v881_v2, %s833_s22 }
 0x1da   : > { %v216_v15 = vpop.xlane.xlu0 %215 }
 0x1db   : > { %v217_v16 = vsub.f32 %v213_v9, %v216_v15 }
 0x1dd   : > { %v218_v17 = vmul.f32 1.442695, %v217_v16 }
 0x1de   : > { %v502_v29 = vpop.permute.xlu0 %501 }
 0x1df   : > { %804 = vpow2.f32 %v218_v17  ;;  %v507_v31 = vsel %vm165_vm1, %v502_v29, 0 }
 0x1ec   : > { %v805_v18 = vpop.eup %804 }
 0x1ed   : > { %v220_v19 = vsel %vm165_vm1, %v805_v18, 0.0 }
 0x1ee   : > { %221 = vadd.xlane.f32.xlu1 %v220_v19 }
 0x1ff   : > { %275 = vrot.lane.b32.xlu1 %v881_v2, %s834_s23 }
 0x203   : > { %389 = vrot.lane.b32.xlu1 %v881_v2, %s835_s24 }
 0x207   : > { %387 = vrot.lane.b32.xlu1 %v881_v2, %s836_s25 }
 0x20b   : > { %499 = vrot.lane.b32.xlu1 %v881_v2, %s837_s26 }
 0x277   : > { %v222_v21 = vpop.xlane.xlu1 %221 }
 0x278   : > { %806 = vrcp.f32 %v222_v21 }
 0x27b   : > { %v276_v24 = vpop.permute.xlu1 %275 }
 0x27f   : > { %v390_v27 = vpop.permute.xlu1 %389 }
 0x280   : > { %v395_v28 = vsel %vm165_vm1, %v390_v27, 0 }
 0x283   : > { %v388_v30 = vpop.permute.xlu1 %387 }
 0x285   : > { %v807_v22 = vpop.eup %806 }
 0x286   : > { %v224_v23 = vmul.f32 %v807_v22, %v805_v18 }
 0x287   : > { %v500_v32 = vpop.permute.xlu1 %499 }
 0x288   : > { %v225_v25 = vpack.c.bf16 %v224_v23, %v224_v23 }
 0x28a   : > { %740 = vmatmul.mubr.msk.bf16.vlgmr.msra.gmra.mxu1 %vm165_vm1, %v225_v25 }
 0x28b   : > { %744 = vmatpush3.bf16.xpose.msra.mxu1 %v283_v26  ;;  %745 = vmatprep.mubr.msk.bf16.mxu1 %vm829_vm0, %v828_v0 }
 0x28c   : > { %755 = vmatprep.subr.bf16.mxu1 %v828_v0 }
 0x292   : > { %746 = vmatmul.mubr.msk.bf16.vlgmr.msra.gmra.mxu1 %vm165_vm1, %v276_v24 }
 0x293   : > { %756 = vmatpush3.bf16.xpose.msra.mxu1 %v395_v28  ;;  %757 = vmatprep.mubr.msk.bf16.mxu1 %vm829_vm0, %v828_v0 }
 0x294   : > { %767 = vmatprep.subr.bf16.mxu1 %v828_v0 }
 0x29a   : > { %758 = vmatmul.mubr.msk.bf16.vlgmr.msra.gmra.mxu1 %vm165_vm1, %v388_v30 }
 0x29b   : > { %768 = vmatpush3.bf16.xpose.msra.mxu1 %v507_v31  ;;  %769 = vmatprep.mubr.msk.bf16.mxu1 %vm829_vm0, %v828_v0 }
 0x2a2   : > { %770 = vmatmul.mubr.msk.bf16.vlgmr.msra.gmra.mxu1 %vm165_vm1, %v500_v32 }
 0x34a   : > { %v924_v33 = vpop.f32.mrf.mxu1 }
 0x34c   : > { %v741_v34 = vpop.f32.mrf.mxu1 }
 0x34e   : > { %v272_v35 = vpop.f32.mrf.mxu1 }
 0x350   : > { %v742_v36 = vpop.f32.mrf.mxu1 }
 0x352   : > { %v319_v37 = vpop.f32.mrf.mxu1 }
 0x353   : > { %v325_v38 = vmul.f32 0.35355338, %v319_v37 }
 0x354   : > { %v747_v39 = vpop.f32.mrf.mxu1 }
 0x355   : > { %v326_v40 = vsel %vm159_vm2, -1e+10, %v325_v38 }
 0x356   : > { %v322_v41 = vpop.f32.mrf.mxu1  ;;  %v327_v42 = vsel %vm165_vm1, %v326_v40, -inf }
 0x357   : > { %328 = vmax.xlane.f32.xlu1 %v327_v42 }
 0x358   : > { %v748_v43 = vpop.f32.mrf.mxu1 }
 0x35a   : > { %v431_v44 = vpop.f32.mrf.mxu1 }
 0x35b   : > { %v437_v45 = vmul.f32 0.35355338, %v431_v44 }
 0x35c   : > { %v759_v46 = vpop.f32.mrf.mxu1 }
 0x35d   : > { %v438_v47 = vsel %vm159_vm2, -1e+10, %v437_v45 }
 0x35e   : > { %v434_v48 = vpop.f32.mrf.mxu1  ;;  %v439_v49 = vsel %vm165_vm1, %v438_v47, -inf }
 0x35f   : > { %440 = vmax.xlane.f32.xlu0 %v439_v49 }
 0x360   : > { %v760_v50 = vpop.f32.mrf.mxu1 }
 0x362   : > { %v543_v51 = vpop.f32.mrf.mxu1 }
 0x363   : > { %v549_v52 = vmul.f32 0.35355338, %v543_v51 }
 0x364   : > { %v771_v53 = vpop.f32.mrf.mxu1 }
 0x365   : > { %v550_v54 = vsel %vm159_vm2, -1e+10, %v549_v52 }
 0x366   : > { %v551_v55 = vsel %vm165_vm1, %v550_v54, -inf  ;;  %v546_v56 = vpop.f32.mrf.mxu1 }
 0x367   : > { %552 = vmax.xlane.f32.xlu1 %v551_v55 }
 0x368   : > { %v772_v57 = vpop.f32.mrf.mxu1 }
 0x3e0   : > { %v329_v58 = vpop.xlane.xlu1 %328 }
 0x3e1   : > { %v330_v59 = vsub.f32 %v326_v40, %v329_v58 }
 0x3e3   : > { %v331_v60 = vmul.f32 1.442695, %v330_v59 }
 0x3e5   : > { %808 = vpow2.f32 %v331_v60 }
 0x3e8   : > { %v441_v6 = vpop.xlane.xlu0 %440 }
 0x3e9   : > { %v442_v7 = vsub.f32 %v438_v47, %v441_v6 }
 0x3eb   : > { %v443_v8 = vmul.f32 1.442695, %v442_v7 }
 0x3f0   : > { %v553_v61 = vpop.xlane.xlu1 %552 }
 0x3f1   : > { %v554_v62 = vsub.f32 %v550_v54, %v553_v61 }
 0x3f2   : > { %v809_v63 = vpop.eup %808 }
 0x3f3   : > { %v555_v1 = vmul.f32 1.442695, %v554_v62  ;;  %v333_v3 = vsel %vm165_vm1, %v809_v63, 0.0 }
 0x3f4   : > { %334 = vadd.xlane.f32.xlu1 %v333_v3 }
 0x3f5   : > { %810 = vpow2.f32 %v555_v1 }
 0x3f6   : > { %812 = vpow2.f32 %v443_v8 }
 0x402   : > { %v811_v4 = vpop.eup %810 }
 0x403   : > { %v557_v5 = vsel %vm165_vm1, %v811_v4, 0.0  ;;  %v813_v9 = vpop.eup %812 }
 0x404   : > { %558 = vadd.xlane.f32.xlu0 %v557_v5  ;;  %v445_v10 = vsel %vm165_vm1, %v813_v9, 0.0 }
 0x405   : > { %339 = vrot.lane.b32.xlu1 %v881_v2, %s838_s27 }
 0x41a   : > { %451 = vrot.lane.b32.xlu0 %v881_v2, %s839_s28 }
 0x429   : > { %446 = vadd.xlane.f32.xlu1 %v445_v10 }
 0x43a   : > { %563 = vrot.lane.b32.xlu1 %v881_v2, %s840_s29 }
 0x47d   : > { %v335_v11 = vpop.xlane.xlu1 %334 }
 0x47e   : > { %814 = vrcp.f32 %v335_v11 }
 0x481   : > { %v340_v12 = vpop.permute.xlu1 %339 }
 0x482   : > { %v345_v13 = vsel %vm231_vm3, %v340_v12, 0 }
 0x483   : > { %750 = vmatpush3.bf16.msra.mxu0 %v345_v13 }
 0x484   : > { %761 = vmatprep.subr.bf16.mxu0 %v828_v0 }
 0x48b   : > { %v815_v14 = vpop.eup %814 }
 0x48c   : > { %v337_v15 = vmul.f32 %v815_v14, %v809_v63 }
 0x48d   : > { %v559_v16 = vpop.xlane.xlu0 %558 }
 0x48e   : > { %v338_v17 = vpack.c.bf16 %v337_v15, %v337_v15 }
 0x490   : > { %752 = vmatmul.mubr.msk.bf16.vlgmr.msra.gmra.mxu0 %vm165_vm1, %v338_v17 }
 0x491   : > { %v452_v18 = vpop.permute.xlu0 %451  ;;  %763 = vmatprep.mubr.msk.bf16.mxu0 %vm829_vm0, %v828_v0 }
 0x492   : > { %v457_v2 = vsel %vm231_vm3, %v452_v18, 0 }
 0x493   : > { %762 = vmatpush3.bf16.msra.mxu0 %v457_v2 }
 0x494   : > { %773 = vmatprep.subr.bf16.mxu0 %v828_v0 }
 0x4b2   : > { %v447_v19 = vpop.xlane.xlu1 %446 }
 0x4b3   : > { %816 = vrcp.f32 %v447_v19 }
 0x4b4   : > { %818 = vrcp.f32 %v559_v16 }
 0x4b6   : > { %v564_v21 = vpop.permute.xlu1 %563 }
 0x4b7   : > { %v569_v23 = vsel %vm231_vm3, %v564_v21, 0 }
 0x4c0   : > { %v817_v20 = vpop.eup %816 }
 0x4c1   : > { %v449_v22 = vmul.f32 %v817_v20, %v813_v9  ;;  %v819_v25 = vpop.eup %818 }
 0x4c2   : > { %v561_v26 = vmul.f32 %v819_v25, %v811_v4 }
 0x4c3   : > { %v450_v24 = vpack.c.bf16 %v449_v22, %v449_v22 }
 0x4c4   : > { %v562_v27 = vpack.c.bf16 %v561_v26, %v561_v26 }
 0x4c5   : > { %764 = vmatmul.mubr.msk.bf16.vlgmr.msra.gmra.mxu0 %vm165_vm1, %v450_v24 }
 0x4c6   : > { %774 = vmatpush3.bf16.msra.mxu0 %v569_v23  ;;  %775 = vmatprep.mubr.msk.bf16.mxu0 %vm829_vm0, %v828_v0 }
 0x4cd   : > { %776 = vmatmul.mubr.msk.bf16.vlgmr.msra.gmra.mxu0 %vm165_vm1, %v562_v27 }
 0x550   : > { %v381_v28 = vpop.f32.mrf.mxu0 }
 0x551   : > { %612 = vrot.lane.b32.xlu1 %v381_v28, %s841_s30 }
 0x552   : > { %v753_v29 = vpop.f32.mrf.mxu0 }
 0x554   : > { %v384_v30 = vpop.f32.mrf.mxu0 }
 0x556   : > { %v754_v31 = vpop.f32.mrf.mxu0 }
 0x585   : > { %v493_v32 = vpop.f32.mrf.mxu0 }
 0x586   : > { %616 = vrot.lane.b32.xlu0 %v493_v32, %s842_s3 }
 0x587   : > { %v765_v34 = vpop.f32.mrf.mxu0 }
 0x589   : > { %v496_v35 = vpop.f32.mrf.mxu0 }
 0x58b   : > { %v766_v36 = vpop.f32.mrf.mxu0 }
 0x58d   : > { %v605_v37 = vpop.f32.mrf.mxu0 }
 0x58e   : > { %620 = vrot.lane.b32.xlu1 %v605_v37, %s843_s4 }
 0x58f   : > { %v777_v0 = vpop.f32.mrf.mxu0 }
 0x591   : > { %v608_v38 = vpop.f32.mrf.mxu0 }
 0x593   : > { %v778_v39 = vpop.f32.mrf.mxu0 }
 0x5c3   : > { %v613_v40 = vpop.permute.xlu1 %612 }
 0x5c4   : > { %v623_v42 = vsel %vm165_vm1, %v924_v33, %v613_v40 }
 0x5f8   : > { %v617_v41 = vpop.permute.xlu0 %616 }
 0x5f9   : > { %v625_v43 = vsel %vm624_vm4, %v623_v42, %v617_v41 }
 0x600   : > { %v621_v44 = vpop.permute.xlu1 %620 }
 0x601   : > { %v627_v45 = vsel %vm626_vm5, %v625_v43, %v621_v44 }
 0x602   : > { %v628_v46 = vpack.c.bf16 %v627_v45, %v627_v45 }
 0x604   : > { %630 = vst.msk [vmem:[%s155_s7] sm:$0xf] %vm629_vm6, %v628_v46 }
 0x605 PF: > { %s12_s9 = sadd.s32 1, %s826_s9  }
 0x606   : > { %p9_p4 = scmp.ge.s32.totalorder %s12_s9, 4  }
 0x608   :  { %11 = sbr.rel (!%p9_p4) target bundleno = 1 (0x1), region = 61 }

// kernel: decoder_forward.21
= control target key start
LH: loop header
LB: loop body
LE: loop exit
PB: predicated region body
PF: predicated region fallthrough
CT: control target
= control target key end

     0   :  { %vm19_vm0 = vcmask 523264   ;;  %v145_v0 = vmov 0.0   ;;  %vm146_vm1 = vmmov 0   ;;  %vm43_vm2 = vcmask 261120   ;;  %s192_s1 = inlined_call_operand.vmem [shape: bf16[32,64], index: 1, kind: input, shape index: {}]   ;;  %s193_s0 = inlined_call_operand.vmem [shape: f32[16,32], index: 0, kind: input, shape index: {}]   ;;  %s194_s2 = inlined_call_operand.vmem [shape: f32[1,64], index: 2, kind: input, shape index: {}]   ;;  %s195_s3 = inlined_call_operand.vmem [shape: bf16[16,64], index: 3, kind: output, shape index: {}]  }
   0x1   :  { %133 = vmatprep.subr.bf16.mxu0 %v145_v0  ;;  %v143_v1 = vld [vmem:[%s192_s1 + $0x8] sm:$0xff]   ;;  %137 = vmatprep.mubr.msk.bf16.mxu0 %vm146_vm1, %v145_v0  ;;  %20 = vst.msk [vmem:[#allocation2] sm:$0xff] %vm19_vm0, %v145_v0  ;;  %21 = vst.msk [vmem:[#allocation2 + $0x8] sm:$0xff] %vm19_vm0, %v145_v0  ;;  %v144_v2 = vld [vmem:[%s192_s1] sm:$0xff]   ;;  %vm115_vm3 = vcmask 519168  }
   0x2   :  { %134 = vmatpush3.bf16.msra.mxu0 %v143_v1  ;;  %v24_v3 = vld [vmem:[%s193_s0] sm:$0xff]  ;;  %v25_v4 = vld [vmem:[%s193_s0 + $0x8] sm:$0xff] }
   0x3   :  { %135 = vmatprep.subr.bf16.mxu0 %v145_v0  ;;  %v26_v5 = vpack.c.bf16 %v25_v4, %v24_v3  ;;  %v125_v14 = vld [vmem:[%s194_s2] ss:$0 sm:$0xff] }
   0x6   :  { %136 = vmatpush3.bf16.msra.mxu0 %v144_v2 }
   0x8   :  { %v22_v6 = vld [vmem:[#allocation2] sm:$0xff]  ;;  %v23_v10 = vld [vmem:[#allocation2 + $0x8] sm:$0xff] }
   0x9   :  { %138 = vmatmul.mubr.msk.bf16.vlgmr.msra.gmra.mxu0 %vm43_vm2, %v26_v5 }
  0xc9   :  { %v81_v7 = vpop.f32.mrf.mxu0 }
  0xca   :  { %v88_v8 = vadd.f32 %v81_v7, %v22_v6 }
  0xcb   :  { %v139_v9 = vpop.f32.mrf.mxu0 }
  0xcc   :  { %91 = vst.msk [vmem:[#allocation2] sm:$0xff] %vm19_vm0, %v88_v8 }
  0xcd   :  { %v84_v11 = vpop.f32.mrf.mxu0 }
  0xce   :  { %v89_v12 = vadd.f32 %v84_v11, %v23_v10 }
  0xcf   :  { %v140_v13 = vpop.f32.mrf.mxu0 }
  0xd0   :  { %92 = vst.msk [vmem:[#allocation2 + $0x8] sm:$0xff] %vm19_vm0, %v89_v12 }
  0xd3   :  { %v96_v15 = vld [vmem:[#allocation2] sm:$0xff] }
  0xd4   :  { %v105_v16 = vadd.f32 %v125_v14, %v96_v15 }
  0xd6   :  { %v128_v17 = vpack.c.bf16 %v105_v16, %v105_v16 }
  0xd7   :  { %v97_v18 = vld [vmem:[#allocation2 + $0x8] sm:$0xff] }
  0xd8   :  { %116 = vst.msk [vmem:[%s195_s3] sm:$0xf] %vm115_vm3, %v128_v17  ;;  %v106_v19 = vadd.f32 %v125_v14, %v97_v18 }
  0xda   :  { %v129_v20 = vpack.c.bf16 %v106_v19, %v106_v19 }
  0xdc   :  { %117 = vst.msk [vmem:[%s195_s3 + $0x4] sm:$0xf] %vm115_vm3, %v129_v20 }

// kernel: decoder_forward.24
= control target key start
LH: loop header
LB: loop body
LE: loop exit
PB: predicated region body
PF: predicated region fallthrough
CT: control target
= control target key end

     0   :  { %vm31_vm0 = vcmask 261120   ;;  %v312_v0 = vmov 0.0   ;;  %vm313_vm1 = vmmov 0   ;;  %vm142_vm2 = vcmask 523264   ;;  %s407_s1 = inlined_call_operand.vmem [shape: bf16[32,64], index: 1, kind: input, shape index: {}]   ;;  %s408_s0 = inlined_call_operand.vmem [shape: f32[16,32], index: 0, kind: input, shape index: {}]   ;;  %s409_s3 = inlined_call_operand.vmem [shape: bf16[64,32], index: 3, kind: input, shape index: {}]   ;;  %s410_s2 = inlined_call_operand.vmem [shape: f32[1,64], index: 2, kind: input, shape index: {}]   ;;  %s411_s4 = inlined_call_operand.vmem [shape: f32[1,32], index: 4, kind: input, shape index: {}]   ;;  %s412_s5 = inlined_call_operand.vmem [shape: f32[1,32], index: 5, kind: input, shape index: {}]   ;;  %s413_s6 = inlined_call_operand.vmem [shape: f32[1,32], index: 6, kind: input, shape index: {}]   ;;  %s414_s7 = inlined_call_operand.vmem [shape: f32[16,32], index: 7, kind: output, shape index: {}]  }
   0x1   :  { %280 = vmatprep.subr.bf16.mxu0 %v312_v0  ;;  %v302_v1 = vld [vmem:[%s407_s1 + $0x8] sm:$0xff]   ;;  %284 = vmatprep.mubr.msk.bf16.mxu0 %vm313_vm1, %v312_v0  ;;  %32 = vst.msk [vmem:[#allocation2] sm:$0xff] %vm31_vm0, %v312_v0  ;;  %33 = vst.msk [vmem:[#allocation2 + $0x8] sm:$0xff] %vm31_vm0, %v312_v0  ;;  %v303_v2 = vld [vmem:[%s407_s1] sm:$0xff]  }
   0x2   :  { %288 = vmatprep.subr.bf16.mxu1 %v312_v0  ;;  %296 = vmatprep.mubr.msk.bf16.mxu1 %vm313_vm1, %v312_v0  ;;  %v34_v3 = vld [vmem:[%s408_s0] sm:$0xff]  ;;  %v35_v4 = vld [vmem:[%s408_s0 + $0x8] sm:$0xff]  ;;  %v304_v5 = vld [vmem:[%s409_s3 + $0x18] sm:$0xff]  }
   0x3   :  { %281 = vmatpush3.bf16.msra.mxu0 %v302_v1  ;;  %v36_v6 = vpack.c.bf16 %v35_v4, %v34_v3  ;;  %289 = vmatpush3.bf16.msra.mxu1 %v304_v5  ;;  %v305_v7 = vld [vmem:[%s409_s3 + $0x10] sm:$0xff]   ;;  %v306_v8 = vld [vmem:[%s409_s3 + $0x8] sm:$0xff]   ;;  %v307_v9 = vld [vmem:[%s409_s3] sm:$0xff]  }
   0x4   :  { %282 = vmatprep.subr.bf16.mxu0 %v312_v0  ;;  %290 = vmatprep.subr.bf16.mxu1 %v312_v0  ;;  %v260_v10 = vld [vmem:[%s410_s2] ss:$0 sm:$0xff] }
   0x5   :  { %v269_v28 = vld [vmem:[%s411_s4] ss:$0 sm:$0xff] }
   0x6   :  { %v270_v54 = vld [vmem:[%s412_s5] ss:$0 sm:$0xff] }
   0x7   :  { %283 = vmatpush3.bf16.msra.mxu0 %v303_v2  ;;  %291 = vmatpush3.bf16.msra.mxu1 %v305_v7  ;;  %v271_v56 = vld [vmem:[%s413_s6] ss:$0 sm:$0xff] }
   0x8   :  { %292 = vmatprep.subr.bf16.mxu1 %v312_v0  ;;  %v107_v20 = vld [vmem:[#allocation2] sm:$0xff]  ;;  %v108_v24 = vld [vmem:[#allocation2 + $0x8] sm:$0xff] }
   0xa   :  { %285 = vmatmul.mubr.msk.bf16.vlgmr.msra.gmra.mxu0 %vm31_vm0, %v36_v6 }
   0xb   :  { %293 = vmatpush3.bf16.msra.mxu1 %v306_v8 }
   0xc   :  { %294 = vmatprep.subr.bf16.mxu1 %v312_v0 }
   0xf   :  { %295 = vmatpush3.bf16.msra.mxu1 %v307_v9 }
  0xca   :  { %v98_v11 = vpop.f32.mrf.mxu0 }
  0xcb   :  { %v99_v13 = vadd.f32 %v260_v10, %v98_v11 }
  0xcc   :  { %v286_v12 = vpop.f32.mrf.mxu0 }
  0xcd   :  { %v105_v17 = vmax.f32 %v99_v13, 0.0 }
  0xce   :  { %v101_v14 = vpop.f32.mrf.mxu0 }
  0xcf   :  { %v102_v15 = vadd.f32 %v260_v10, %v101_v14 }
  0xd0   :  { %v287_v16 = vpop.f32.mrf.mxu0 }
  0xd1   :  { %v106_v18 = vmax.f32 %v102_v15, 0.0 }
  0xd3   :  { %v109_v19 = vpack.c.bf16 %v106_v18, %v105_v17 }
  0xd5   :  { %297 = vmatmul.mubr.msk.bf16.vlgmr.msra.gmra.mxu1 %vm142_vm2, %v109_v19 }
 0x195   :  { %v180_v21 = vpop.f32.mrf.mxu1 }
 0x196   :  { %v187_v22 = vadd.f32 %v180_v21, %v107_v20 }
 0x197   :  { %v298_v23 = vpop.f32.mrf.mxu1 }
 0x198   :  { %189 = vst.msk [vmem:[#allocation2] sm:$0xff] %vm31_vm0, %v187_v22 }
 0x199   :  { %v183_v25 = vpop.f32.mrf.mxu1 }
 0x19a   :  { %v188_v26 = vadd.f32 %v183_v25, %v108_v24 }
 0x19b   :  { %v299_v27 = vpop.f32.mrf.mxu1 }
 0x19c   :  { %190 = vst.msk [vmem:[#allocation2 + $0x8] sm:$0xff] %vm31_vm0, %v188_v26 }
 0x19f   :  { %v194_v29 = vld [vmem:[#allocation2] sm:$0xff] }
 0x1a0   :  { %v203_v30 = vadd.f32 %v269_v28, %v194_v29 }
 0x1a2   :  { %v207_v31 = vadd.f32 %v203_v30, %v34_v3 }
 0x1a3   :  { %v195_v32 = vld [vmem:[#allocation2 + $0x8] sm:$0xff] }
 0x1a4   :  { %v209_v33 = vsel %vm31_vm0, %v207_v31, 0.0  ;;  %v204_v34 = vadd.f32 %v269_v28, %v195_v32 }
 0x1a5   :  { %210 = vadd.xlane.f32.xlu0 %v209_v33 }
 0x1a6   :  { %v208_v35 = vadd.f32 %v204_v34, %v35_v4 }
 0x1a8   :  { %v212_v36 = vsel %vm31_vm0, %v208_v35, 0.0 }
 0x1a9   :  { %213 = vadd.xlane.f32.xlu0 %v212_v36 }
 0x22e   :  { %v211_v37 = vpop.xlane.xlu0 %210 }
 0x22f   :  { %v216_v38 = vmul.f32 0.03125, %v211_v37 }
 0x231   :  { %v218_v39 = vsub.f32 %v207_v31, %v216_v38 }
 0x232   :  { %v214_v40 = vpop.xlane.xlu0 %213 }
 0x233   :  { %v217_v41 = vmul.f32 0.03125, %v214_v40  ;;  %v220_v42 = vmul.f32 %v218_v39, %v218_v39 }
 0x235   :  { %v219_v43 = vsub.f32 %v208_v35, %v217_v41  ;;  %v222_v44 = vsel %vm31_vm0, %v220_v42, 0.0 }
 0x236   :  { %223 = vadd.xlane.f32.xlu1 %v222_v44 }
 0x237   :  { %v221_v45 = vmul.f32 %v219_v43, %v219_v43 }
 0x239   :  { %v225_v46 = vsel %vm31_vm0, %v221_v45, 0.0 }
 0x23a   :  { %226 = vadd.xlane.f32.xlu1 %v225_v46 }
 0x2bf   :  { %v224_v47 = vpop.xlane.xlu1 %223 }
 0x2c0   :  { %v228_v48 = vmul.f32 0.03125, %v224_v47 }
 0x2c2   :  { %v230_v49 = vadd.f32 1e-05, %v228_v48 }
 0x2c3   :  { %v227_v50 = vpop.xlane.xlu1 %226 }
 0x2c4   :  { %308 = vrsqrt.f32 %v230_v49  ;;  %v229_v51 = vmul.f32 0.03125, %v227_v50 }
 0x2c6   :  { %v231_v52 = vadd.f32 1e-05, %v229_v51 }
 0x2c8   :  { %310 = vrsqrt.f32 %v231_v52 }
 0x2d1   :  { %v309_v53 = vpop.eup %308 }
 0x2d2   :  { %v234_v55 = vmul.f32 %v309_v53, %v218_v39 }
 0x2d4   :  { %v243_v57 = vmul.f32 %v270_v54, %v234_v55 }
 0x2d5   :  { %v311_v58 = vpop.eup %310 }
 0x2d6   :  { %v252_v59 = vadd.f32 %v271_v56, %v243_v57  ;;  %v235_v60 = vmul.f32 %v311_v58, %v219_v43 }
 0x2d8   :  { %254 = vst.msk [vmem:[%s414_s7] sm:$0xff] %vm31_vm0, %v252_v59  ;;  %v244_v61 = vmul.f32 %v270_v54, %v235_v60 }
 0x2da   :  { %v253_v62 = vadd.f32 %v271_v56, %v244_v61 }
 0x2dc   :  { %255 = vst.msk [vmem:[%s414_s7 + $0x8] sm:$0xff] %vm31_vm0, %v253_v62 }

// kernel: decoder_forward.22
= control target key start
LH: loop header
LB: loop body
LE: loop exit
PB: predicated region body
PF: predicated region fallthrough
CT: control target
= control target key end

     0   :  { %s918_s12 = smov 0   ;;  %s1018_s0 = inlined_call_operand.vmem [shape: bf16[2,8,32], index: 0, kind: input, shape index: {}]   ;;  %s1019_s1 = inlined_call_operand.vmem [shape: bf16[2,8,64], index: 1, kind: input, shape index: {}]   ;;  %s1020_s2 = inlined_call_operand.vmem [shape: f32[2,1,8], index: 2, kind: input, shape index: {}]   ;;  %s1021_s3 = inlined_call_operand.vmem [shape: bf16[2,8,32], index: 3, kind: output, shape index: {}]  }
   0x1 LB: > { %s754_s13 = sadd.s32 4294967295, %s883_s12   ;;  %p758_p0 = scmp.ge.s32.totalorder %s883_s12, 1  ;;  %s883_s12 = sphi %s918_s12, %s13_s12  }
   0x2   : > { %p153_p1 = scmp.lt.s32.totalorder %s883_s12, 3 }
   0x4   : > { %p154_p2 = pnand %p758_p0, %p153_p1 }
   0x5   : > { %p182_p3 = scmp.lt.s32.totalorder (!%p154_p2), %s754_s13, 1  ;;  %s888_s24 = smov (!%p154_p2), 96  }
   0x6   : > { %157 = sbr.rel (%p154_p2) target bundleno = 1379 (0x563), region = 32  ;;  %s889_s25 = smov (!%p154_p2), 120  }
   0x7   : > { %s890_s26 = smov (!%p154_p2), 112   ;;  %s891_s27 = smov (!%p154_p2), 104  }
   0x8   : > { %s892_s28 = smov (!%p154_p2), 88   ;;  %s893_s29 = smov (!%p154_p2), 72  }
   0x9   : > { %s894_s30 = smov (!%p154_p2), 80   ;;  %s895_s4 = smov (!%p154_p2), 8  }
   0xa   : > { %s896_s5 = smov (!%p154_p2), 16   ;;  %s897_s6 = smov (!%p154_p2), 24  }
   0xb   : > { %v885_v0 = vmov 0.0   ;;  %vm886_vm0 = vmmov 0   ;;  %s1023_s13 = smov (!%p182_p3, %s754_s13), 1  ;;  %vm202_vm1 = vcmask 64512   ;;  %v251_v4 = vlaneseq }
   0xc   : > { %790 = vmatprep.subr.bf16.mxu0 %v885_v0  ;;  %792 = vmatprep.mubr.msk.bf16.mxu0 %vm886_vm0, %v885_v0  ;;  %s932_s14 = sshll.u32 %s1023_s13, 2  ;;  %s192_s23 = scalar_lea.vmem %s1020_s2, %s1023_s13  ;;  %v887_v8 = vmov 0   ;;  %vm277_vm4 = vcmask 1043456   ;;  %vm673_vm5 = vcmask 130048   ;;  %vm675_vm6 = vcmask 195584  }
   0xd   : > { %796 = vmatprep.subr.bf16.mxu1 %v885_v0  ;;  %798 = vmatprep.mubr.msk.bf16.mxu1 %vm886_vm0, %v885_v0  ;;  %s189_s17 = scalar_lea.vmem %s1019_s1, %s932_s14  ;;  %s185_s20 = scalar_lea.vmem %s1018_s0, %s932_s14  ;;  %v200_v5 = vld [vmem:[%s192_s23] sm:$0x1]  ;;  %v252_v6 = vshrl.u32 %v251_v4, 7  ;;  %vm678_vm7 = vcmask 257024  }
   0xe   : > { %v198_v1 = vld [vmem:[%s189_s17] sm:$0xf]  ;;  %vm201_vm2 = vcmp.eq.f32.partialorder %v200_v5, 0.0  ;;  %s196_s9 = scalar_lea.vmem %s1021_s3, %s932_s14 }
   0xf   : > { %v207_v2 = vsel %vm202_vm1, %v198_v1, 0  ;;  %v199_v3 = vld [vmem:[%s185_s20] sm:$0xf]  ;;  %v253_v7 = vsub.s32 0, %v252_v6  ;;  %v250_v9 = vsel %vm201_vm2, 1, %v887_v8  ;;  %v956_v18 = vcombine.low %v198_v1, %v198_v1 }
  0x10   : > { %791 = vmatpush3.bf16.xpose.msra.mxu0 %v207_v2  ;;  %v765_v19 = vcombine.low %v199_v3, %v199_v3 }
  0x11   : > { %808 = vmatprep.subr.bf16.mxu0 %v885_v0  ;;  %v950_v10 = vrot.slane %v250_v9, %v253_v7  ;;  %272 = vrot.lane.b32.xlu1 %v956_v18, %s888_s24 }
  0x13   : > { %vm255_vm3 = vcmp.eq.s32.totalorder %v950_v10, 1 }
  0x15   : > { %326 = vrot.lane.b32.xlu1 %v956_v18, %s889_s25 }
  0x17   : > { %793 = vmatmul.mubr.msk.bf16.vlgmr.msra.gmra.mxu0 %vm202_vm1, %v199_v3 }
  0x18   : > { %810 = vmatprep.mubr.msk.bf16.mxu0 %vm886_vm0, %v885_v0 }
  0x19   : > { %438 = vrot.lane.b32.xlu1 %v956_v18, %s890_s26 }
  0x1d   : > { %436 = vrot.lane.b32.xlu1 %v765_v19, %s890_s26 }
  0x21   : > { %550 = vrot.lane.b32.xlu1 %v956_v18, %s891_s27 }
  0x25   : > { %548 = vrot.lane.b32.xlu1 %v765_v19, %s891_s27 }
  0x83   : > { %v273_v25 = vpop.permute.xlu1 %272 }
  0x84   : > { %v279_v26 = vsel %vm277_vm4, %v273_v25, 0 }
  0x85   : > { %797 = vmatpush3.bf16.msra.mxu1 %v279_v26 }
  0x86   : > { %802 = vmatprep.subr.bf16.mxu1 %v885_v0 }
  0x87   : > { %v327_v29 = vpop.permute.xlu1 %326 }
  0x88   : > { %v332_v31 = vsel %vm202_vm1, %v327_v29, 0 }
  0x8b   : > { %v439_v33 = vpop.permute.xlu1 %438 }
  0x8c   : > { %v444_v36 = vsel %vm202_vm1, %v439_v33, 0 }
  0x8f   : > { %v437_v35 = vpop.permute.xlu1 %436 }
  0x93   : > { %v551_v37 = vpop.permute.xlu1 %550 }
  0x94   : > { %v556_v38 = vsel %vm202_vm1, %v551_v37, 0 }
  0x97   : > { %v549_v39 = vpop.permute.xlu1 %548 }
  0xd7   : > { %v243_v11 = vpop.f32.mrf.mxu0 }
  0xd8   : > { %v249_v12 = vmul.f32 0.35355338, %v243_v11 }
  0xd9   : > { %v794_v13 = vpop.f32.mrf.mxu0 }
  0xda   : > { %v256_v14 = vsel %vm255_vm3, -1e+10, %v249_v12 }
  0xdb   : > { %v246_v15 = vpop.f32.mrf.mxu0  ;;  %v257_v16 = vsel %vm202_vm1, %v256_v14, -inf }
  0xdc   : > { %258 = vmax.xlane.f32.xlu0 %v257_v16 }
  0xdd   : > { %v795_v17 = vpop.f32.mrf.mxu0 }
 0x165   : > { %v259_v20 = vpop.xlane.xlu0 %258 }
 0x166   : > { %v260_v21 = vsub.f32 %v256_v14, %v259_v20 }
 0x168   : > { %v261_v22 = vmul.f32 1.442695, %v260_v21 }
 0x16a   : > { %861 = vpow2.f32 %v261_v22 }
 0x177   : > { %v862_v23 = vpop.eup %861 }
 0x178   : > { %v263_v24 = vsel %vm202_vm1, %v862_v23, 0.0 }
 0x179   : > { %264 = vadd.xlane.f32.xlu0 %v263_v24 }
 0x18f   : > { %324 = vrot.lane.b32.xlu0 %v765_v19, %s889_s25 }
 0x202   : > { %v265_v27 = vpop.xlane.xlu0 %264 }
 0x203   : > { %863 = vrcp.f32 %v265_v27 }
 0x206   : > { %v325_v34 = vpop.permute.xlu0 %324 }
 0x210   : > { %v864_v28 = vpop.eup %863 }
 0x211   : > { %v267_v30 = vmul.f32 %v864_v28, %v862_v23 }
 0x213   : > { %v268_v32 = vpack.c.bf16 %v267_v30, %v267_v30 }
 0x215   : > { %799 = vmatmul.mubr.msk.bf16.vlgmr.msra.gmra.mxu1 %vm202_vm1, %v268_v32 }
 0x216   : > { %803 = vmatpush3.bf16.xpose.msra.mxu1 %v332_v31  ;;  %804 = vmatprep.mubr.msk.bf16.mxu1 %vm886_vm0, %v885_v0 }
 0x217   : > { %814 = vmatprep.subr.bf16.mxu1 %v885_v0 }
 0x21d   : > { %805 = vmatmul.mubr.msk.bf16.vlgmr.msra.gmra.mxu1 %vm202_vm1, %v325_v34 }
 0x21e   : > { %815 = vmatpush3.bf16.xpose.msra.mxu1 %v444_v36  ;;  %816 = vmatprep.mubr.msk.bf16.mxu1 %vm886_vm0, %v885_v0 }
 0x21f   : > { %826 = vmatprep.subr.bf16.mxu1 %v885_v0 }
 0x225   : > { %817 = vmatmul.mubr.msk.bf16.vlgmr.msra.gmra.mxu1 %vm202_vm1, %v437_v35 }
 0x226   : > { %827 = vmatpush3.bf16.xpose.msra.mxu1 %v556_v38  ;;  %828 = vmatprep.mubr.msk.bf16.mxu1 %vm886_vm0, %v885_v0 }
 0x22d   : > { %829 = vmatmul.mubr.msk.bf16.vlgmr.msra.gmra.mxu1 %vm202_vm1, %v549_v39 }
 0x2d5   : > { %v980_v40 = vpop.f32.mrf.mxu1 }
 0x2d7   : > { %v800_v41 = vpop.f32.mrf.mxu1 }
 0x2d9   : > { %v318_v42 = vpop.f32.mrf.mxu1 }
 0x2db   : > { %v801_v43 = vpop.f32.mrf.mxu1 }
 0x2dd   : > { %v368_v44 = vpop.f32.mrf.mxu1 }
 0x2de   : > { %v374_v45 = vmul.f32 0.35355338, %v368_v44 }
 0x2df   : > { %v806_v46 = vpop.f32.mrf.mxu1 }
 0x2e0   : > { %v375_v47 = vsel %vm255_vm3, -1e+10, %v374_v45 }
 0x2e1   : > { %v371_v48 = vpop.f32.mrf.mxu1  ;;  %v376_v49 = vsel %vm202_vm1, %v375_v47, -inf }
 0x2e2   : > { %377 = vmax.xlane.f32.xlu1 %v376_v49 }
 0x2e3   : > { %v807_v50 = vpop.f32.mrf.mxu1 }
 0x2e5   : > { %v480_v51 = vpop.f32.mrf.mxu1 }
 0x2e6   : > { %v486_v52 = vmul.f32 0.35355338, %v480_v51 }
 0x2e7   : > { %v818_v53 = vpop.f32.mrf.mxu1 }
 0x2e8   : > { %v487_v54 = vsel %vm255_vm3, -1e+10, %v486_v52 }
 0x2e9   : > { %v483_v55 = vpop.f32.mrf.mxu1  ;;  %v488_v56 = vsel %vm202_vm1, %v487_v54, -inf }
 0x2ea   : > { %489 = vmax.xlane.f32.xlu0 %v488_v56 }
 0x2eb   : > { %v819_v57 = vpop.f32.mrf.mxu1 }
 0x2ed   : > { %v592_v58 = vpop.f32.mrf.mxu1 }
 0x2ee   : > { %v598_v59 = vmul.f32 0.35355338, %v592_v58 }
 0x2ef   : > { %v830_v60 = vpop.f32.mrf.mxu1 }
 0x2f0   : > { %v599_v61 = vsel %vm255_vm3, -1e+10, %v598_v59 }
 0x2f1   : > { %v595_v62 = vpop.f32.mrf.mxu1  ;;  %v600_v63 = vsel %vm202_vm1, %v599_v61, -inf }
 0x2f2   : > { %601 = vmax.xlane.f32.xlu1 %v600_v63 }
 0x2f3   : > { %v831_v1 = vpop.f32.mrf.mxu1 }
 0x303   : > { %388 = vrot.lane.b32.xlu1 %v956_v18, %s892_s28 }
 0x36b   : > { %v378_v2 = vpop.xlane.xlu1 %377 }
 0x36c   : > { %v379_v3 = vsub.f32 %v375_v47, %v378_v2 }
 0x36e   : > { %v380_v4 = vmul.f32 1.442695, %v379_v3 }
 0x370   : > { %865 = vpow2.f32 %v380_v4 }
 0x373   : > { %v490_v5 = vpop.xlane.xlu0 %489 }
 0x374   : > { %v491_v6 = vsub.f32 %v487_v54, %v490_v5 }
 0x376   : > { %v492_v7 = vmul.f32 1.442695, %v491_v6 }
 0x378   : > { %867 = vpow2.f32 %v492_v7 }
 0x37b   : > { %v602_v8 = vpop.xlane.xlu1 %601 }
 0x37c   : > { %v603_v9 = vsub.f32 %v599_v61, %v602_v8 }
 0x37d   : > { %v866_v10 = vpop.eup %865 }
 0x37e   : > { %v604_v11 = vmul.f32 1.442695, %v603_v9  ;;  %v382_v12 = vsel %vm202_vm1, %v866_v10, 0.0 }
 0x37f   : > { %383 = vadd.xlane.f32.xlu0 %v382_v12  ;;  %v389_v13 = vpop.permute.xlu1 %388 }
 0x380   : > { %869 = vpow2.f32 %v604_v11  ;;  %v394_v14 = vsel %vm277_vm4, %v389_v13, 0 }
 0x381   : > { %809 = vmatpush3.bf16.msra.mxu0 %v394_v14 }
 0x382   : > { %820 = vmatprep.subr.bf16.mxu0 %v885_v0 }
 0x385   : > { %v868_v15 = vpop.eup %867 }
 0x386   : > { %v494_v16 = vsel %vm202_vm1, %v868_v15, 0.0 }
 0x387   : > { %495 = vadd.xlane.f32.xlu1 %v494_v16 }
 0x38d   : > { %v870_v17 = vpop.eup %869 }
 0x38e   : > { %v606_v19 = vsel %vm202_vm1, %v870_v17, 0.0 }
 0x38f   : > { %607 = vadd.xlane.f32.xlu0 %v606_v19 }
 0x398   : > { %612 = vrot.lane.b32.xlu1 %v956_v18, %s893_s29 }
 0x3a5   : > { %500 = vrot.lane.b32.xlu0 %v956_v18, %s894_s30 }
 0x408   : > { %v384_v20 = vpop.xlane.xlu0 %383 }
 0x409   : > { %871 = vrcp.f32 %v384_v20 }
 0x410   : > { %v496_v21 = vpop.xlane.xlu1 %495 }
 0x411   : > { %873 = vrcp.f32 %v496_v21 }
 0x414   : > { %v613_v18 = vpop.permute.xlu1 %612 }
 0x415   : > { %v618_v31 = vsel %vm277_vm4, %v613_v18, 0 }
 0x416   : > { %v872_v22 = vpop.eup %871 }
 0x417   : > { %v386_v23 = vmul.f32 %v872_v22, %v866_v10 }
 0x418   : > { %v608_v24 = vpop.xlane.xlu0 %607 }
 0x419   : > { %875 = vrcp.f32 %v608_v24  ;;  %v387_v25 = vpack.c.bf16 %v386_v23, %v386_v23 }
 0x41b   : > { %811 = vmatmul.mubr.msk.bf16.vlgmr.msra.gmra.mxu0 %vm202_vm1, %v387_v25 }
 0x41c   : > { %v501_v26 = vpop.permute.xlu0 %500  ;;  %822 = vmatprep.mubr.msk.bf16.mxu0 %vm886_vm0, %v885_v0 }
 0x41d   : > { %v506_v27 = vsel %vm277_vm4, %v501_v26, 0 }
 0x41e   : > { %v874_v28 = vpop.eup %873  ;;  %821 = vmatpush3.bf16.msra.mxu0 %v506_v27 }
 0x41f   : > { %v498_v29 = vmul.f32 %v874_v28, %v868_v15  ;;  %832 = vmatprep.subr.bf16.mxu0 %v885_v0 }
 0x421   : > { %v499_v30 = vpack.c.bf16 %v498_v29, %v498_v29 }
 0x423   : > { %823 = vmatmul.mubr.msk.bf16.vlgmr.msra.gmra.mxu0 %vm202_vm1, %v499_v30 }
 0x424   : > { %833 = vmatpush3.bf16.msra.mxu0 %v618_v31  ;;  %834 = vmatprep.mubr.msk.bf16.mxu0 %vm886_vm0, %v885_v0 }
 0x426   : > { %v876_v32 = vpop.eup %875 }
 0x427   : > { %v610_v33 = vmul.f32 %v876_v32, %v870_v17 }
 0x429   : > { %v611_v34 = vpack.c.bf16 %v610_v33, %v610_v33 }
 0x42b   : > { %835 = vmatmul.mubr.msk.bf16.vlgmr.msra.gmra.mxu0 %vm202_vm1, %v611_v34 }
 0x4db   : > { %v430_v35 = vpop.f32.mrf.mxu0 }
 0x4dc   : > { %661 = vrot.lane.b32.xlu1 %v430_v35, %s895_s4 }
 0x4dd   : > { %v812_v36 = vpop.f32.mrf.mxu0 }
 0x4df   : > { %v433_v37 = vpop.f32.mrf.mxu0 }
 0x4e1   : > { %v813_v38 = vpop.f32.mrf.mxu0 }
 0x4e3   : > { %v542_v39 = vpop.f32.mrf.mxu0 }
 0x4e4   : > { %665 = vrot.lane.b32.xlu0 %v542_v39, %s896_s5 }
 0x4e5   : > { %v824_v41 = vpop.f32.mrf.mxu0 }
 0x4e7   : > { %v545_v42 = vpop.f32.mrf.mxu0 }
 0x4e9   : > { %v825_v43 = vpop.f32.mrf.mxu0 }
 0x4eb   : > { %v654_v44 = vpop.f32.mrf.mxu0 }
 0x4ec   : > { %669 = vrot.lane.b32.xlu1 %v654_v44, %s897_s6 }
 0x4ed   : > { %v836_v0 = vpop.f32.mrf.mxu0 }
 0x4ef   : > { %v657_v45 = vpop.f32.mrf.mxu0 }
 0x4f1   : > { %v837_v46 = vpop.f32.mrf.mxu0 }
 0x54e   : > { %v662_v47 = vpop.permute.xlu1 %661 }
 0x54f   : > { %v672_v49 = vsel %vm202_vm1, %v980_v40, %v662_v47 }
 0x556   : > { %v666_v48 = vpop.permute.xlu0 %665 }
 0x557   : > { %v674_v50 = vsel %vm673_vm5, %v672_v49, %v666_v48 }
 0x55e   : > { %v670_v51 = vpop.permute.xlu1 %669 }
 0x55f   : > { %v676_v52 = vsel %vm675_vm6, %v674_v50, %v670_v51 }
 0x560   : > { %v677_v53 = vpack.c.bf16 %v676_v52, %v676_v52 }
 0x562   : > { %679 = vst.msk [vmem:[%s196_s9] sm:$0xf] %vm678_vm7, %v677_v53 }
 0x563 PF: > { %s13_s12 = sadd.s32 1, %s883_s12  }
 0x564   : > { %p10_p4 = scmp.ge.s32.totalorder %s13_s12, 4  }
 0x566   :  { %12 = sbr.rel (!%p10_p4) target bundleno = 1 (0x1), region = 68 }

// kernel: decoder_forward.30
= control target key start
LH: loop header
LB: loop body
LE: loop exit
PB: predicated region body
PF: predicated region fallthrough
CT: control target
= control target key end

     0   :  { %10 = vsyncpa [#allocation3], 0  ;;  %s1316_s0 = inlined_call_operand.vmem [shape: bf16[2,8,32], index: 0, kind: input, shape index: {}]   ;;  %s1317_s1 = inlined_call_operand.vmem [shape: bf16[2,8,64], index: 1, kind: input, shape index: {}]   ;;  %s1318_s2 = inlined_call_operand.vmem [shape: f32[2,1,8], index: 2, kind: input, shape index: {}]   ;;  %s1319_s3 = inlined_call_operand.vmem [shape: bf16[2,8,32], index: 3, kind: output, shape index: {0}]   ;;  %s1320_s4 = inlined_call_operand.hbm [shape: f32[2,4,8,8], index: 4, kind: output, shape index: {1}]  }
   0x1   :  { %12 = vsyncpa [#allocation3 + $0x1], 0  ;;  %s1111_s15 = smov 0   ;;  %s1113_s16 = smov 0  }
   0x2   :  { %s1115_s17 = smov 0   ;;  %s1117_s18 = smov 0  }
   0x3 LB: > { %s1132_s19 = sadd.s32 4294967295, %s1069_s18   ;;  %s850_s20 = sadd.s32 4294967294, %s1069_s18   ;;  %s1069_s18 = sphi %s1117_s18, %s1326_s18   ;;  %s1065_s17 = sphi %s1115_s17, %s1325_s17   ;;  %s1061_s16 = sphi %s1113_s16, %s1324_s16   ;;  %s1057_s15 = sphi %s1111_s15, %s1323_s15  }
   0x4   : > { %s1136_s21 = sadd.s32 1, %s1069_s18   ;;  %s129_s22 = sadd.s32 1, %s1065_s17 }
   0x5   : > { %s126_s23 = ssub.s32 %s1069_s18, %s1136_s21  ;;  %p139_p0 = scmp.ne.s32.totalorder %s1065_s17, %s1061_s16 }
   0x6   : > { %p127_p1 = scmp.eq.s32.totalorder %s126_s23, 0  ;;  %p140_p2 = scmp.eq.s32.totalorder %s1132_s19, 1 }
   0x7   : > { %p145_p3 = scmp.ne.s32.totalorder %s1061_s16, %s1057_s15  ;;  %p146_p4 = scmp.eq.s32.totalorder %s850_s20, 1 }
   0x8   : > { %s1147_s24 = scalar_select %p127_p1, %s1065_s17, %s129_s22  }
   0x9   : > { %p1149_p5 = por %p140_p2, %p139_p0  ;;  %p1153_p6 = por %p146_p4, %p145_p3 }
   0xa   : > { %p853_p7 = scmp.ge.s32.totalorder %s1069_s18, 1  ;;  %p184_p8 = scmp.lt.s32.totalorder %s1069_s18, 3 }
   0xc   : > { %p185_p9 = pnand %p853_p7, %p184_p8 }
   0xd   : > { %p220_p10 = scmp.lt.s32.totalorder (!%p185_p9), %s1132_s19, 1  ;;  %s1074_s12 = smov (!%p185_p9), 96  }
   0xe   : > { %188 = sbr.rel (%p185_p9) target bundleno = 1398 (0x576), region = 32  ;;  %s1075_s13 = smov (!%p185_p9), 120  }
   0xf   : > { %s1076_s14 = smov (!%p185_p9), 112   ;;  %s1077_s20 = smov (!%p185_p9), 104  }
  0x10   : > { %s217_s22 = sand.u32 (!%p185_p9), 1, %s1061_s16   ;;  %s1078_s29 = smov (!%p185_p9), 88  }
  0x11   : > { %s854_s23 = sshll.u32 (!%p185_p9), %s217_s22, 5  ;;  %s1079_s30 = smov (!%p185_p9), 72  }
  0x12   : > { %s1081_s6 = smov (!%p185_p9), 8   ;;  %s873_s7 = sshll.u32 (!%p185_p9), %s1132_s19, 9 }
  0x13   : > { %v1071_v0 = vmov 0.0   ;;  %vm1072_vm0 = vmmov 0   ;;  %s221_s27 = scalar_select %p220_p10, %s1132_s19, 1  ;;  %vm240_vm1 = vcmask 64512   ;;  %v289_v4 = vlaneseq }
  0x14   : > { %890 = vmatprep.subr.bf16.mxu0 %v1071_v0  ;;  %892 = vmatprep.mubr.msk.bf16.mxu0 %vm1072_vm0, %v1071_v0  ;;  %v1073_v8 = vmov 0   ;;  %vm315_vm4 = vcmask 1043456   ;;  %s1082_s19 = smov [#allocation2]  }
  0x15   : > { %896 = vmatprep.subr.bf16.mxu1 %v1071_v0  ;;  %898 = vmatprep.mubr.msk.bf16.mxu1 %vm1072_vm0, %v1071_v0  ;;  %s1167_s28 = sshll.u32 %s221_s27, 2  ;;  %s230_s11 = scalar_lea.vmem %s1318_s2, %s221_s27  ;;  %v290_v6 = vshrl.u32 %v289_v4, 7 }
  0x16   : > { %s227_s5 = scalar_lea.vmem %s1317_s1, %s1167_s28  ;;  %s223_s8 = scalar_lea.vmem %s1316_s0, %s1167_s28  ;;  %v238_v5 = vld [vmem:[%s230_s11] sm:$0x1] }
  0x17   : > { %v236_v1 = vld [vmem:[%s227_s5] sm:$0xf]  ;;  %vm239_vm2 = vcmp.eq.f32.partialorder %v238_v5, 0.0  ;;  %v291_v7 = vsub.s32 0, %v290_v6  ;;  %s1204_s27 = scalar_lea.vmem [#allocation2], %s854_s23  ;;  %s1080_s5 = smov 80  }
  0x18   : > { %v245_v2 = vsel %vm240_vm1, %v236_v1, 0  ;;  %v237_v3 = vld [vmem:[%s223_s8] sm:$0xf]  ;;  %v288_v9 = vsel %vm239_vm2, 1, %v1073_v8  ;;  %v1191_v18 = vcombine.low %v236_v1, %v236_v1  ;;  %s743_s8 = sshll.u32 %s1204_s27, 4  ;;  %s1263_s11 = scalar_lea.hbm %s1320_s4, %s873_s7  ;;  %s1265_s8 = int_to_ptr.vmem [resolvable:$true] %s743_s8 }
  0x19   : > { %891 = vmatpush3.bf16.xpose.msra.mxu0 %v245_v2  ;;  %v1185_v10 = vrot.slane %v288_v9, %v291_v7  ;;  %v861_v19 = vcombine.low %v237_v3, %v237_v3 }
  0x1a   : > { %908 = vmatprep.subr.bf16.mxu0 %v1071_v0  ;;  %310 = vrot.lane.b32.xlu1 %v1191_v18, %s1074_s12  ;;  %s1269_s12 = scalar_lea.sflag [#allocation3], %s217_s22 }
  0x1b   : > { %vm293_vm3 = vcmp.eq.s32.totalorder %v1185_v10, 1 }
  0x1e   : > { %364 = vrot.lane.b32.xlu1 %v1191_v18, %s1075_s13 }
  0x20   : > { %893 = vmatmul.mubr.msk.bf16.vlgmr.msra.gmra.mxu0 %vm240_vm1, %v237_v3 }
  0x21   : > { %910 = vmatprep.mubr.msk.bf16.mxu0 %vm1072_vm0, %v1071_v0 }
  0x22   : > { %476 = vrot.lane.b32.xlu1 %v1191_v18, %s1076_s14 }
  0x26   : > { %474 = vrot.lane.b32.xlu1 %v861_v19, %s1076_s14  ;;  %s1013_s14 = sshll.u32 %s1082_s19, 4  ;;  %s1014_s14 = int_to_ptr.vmem [resolvable:$false] %s1013_s14 }
  0x27   : > { %p1016_p0 = scmp.lt.s32.totalorder %s1265_s8, %s1014_s14 }
  0x2a   : > { %588 = vrot.lane.b32.xlu1 %v1191_v18, %s1077_s20 }
  0x2e   : > { %586 = vrot.lane.b32.xlu1 %v861_v19, %s1077_s20  ;;  %s1015_s20 = scalar_lea.vmem %s1014_s14, 1024 }
  0x8c   : > { %v311_v25 = vpop.permute.xlu1 %310 }
  0x8d   : > { %v317_v26 = vsel %vm315_vm4, %v311_v25, 0 }
  0x8e   : > { %897 = vmatpush3.bf16.msra.mxu1 %v317_v26 }
  0x8f   : > { %902 = vmatprep.subr.bf16.mxu1 %v1071_v0 }
  0x90   : > { %v365_v29 = vpop.permute.xlu1 %364 }
  0x91   : > { %v370_v31 = vsel %vm240_vm1, %v365_v29, 0 }
  0x94   : > { %v477_v33 = vpop.permute.xlu1 %476 }
  0x95   : > { %v482_v36 = vsel %vm240_vm1, %v477_v33, 0 }
  0x98   : > { %v475_v35 = vpop.permute.xlu1 %474 }
  0x9c   : > { %v589_v37 = vpop.permute.xlu1 %588 }
  0x9d   : > { %v594_v38 = vsel %vm240_vm1, %v589_v37, 0 }
  0xa0   : > { %v587_v39 = vpop.permute.xlu1 %586 }
  0xe0   : > { %v281_v11 = vpop.f32.mrf.mxu0 }
  0xe1   : > { %v287_v12 = vmul.f32 0.35355338, %v281_v11 }
  0xe2   : > { %v894_v13 = vpop.f32.mrf.mxu0 }
  0xe3   : > { %v294_v14 = vsel %vm293_vm3, -1e+10, %v287_v12 }
  0xe4   : > { %v284_v15 = vpop.f32.mrf.mxu0  ;;  %v295_v16 = vsel %vm240_vm1, %v294_v14, -inf }
  0xe5   : > { %296 = vmax.xlane.f32.xlu0 %v295_v16 }
  0xe6   : > { %v895_v17 = vpop.f32.mrf.mxu0 }
 0x16e   : > { %v297_v20 = vpop.xlane.xlu0 %296 }
 0x16f   : > { %v298_v21 = vsub.f32 %v294_v14, %v297_v20 }
 0x171   : > { %v299_v22 = vmul.f32 1.442695, %v298_v21 }
 0x173   : > { %993 = vpow2.f32 %v299_v22 }
 0x180   : > { %v994_v23 = vpop.eup %993 }
 0x181   : > { %v301_v24 = vsel %vm240_vm1, %v994_v23, 0.0 }
 0x182   : > { %302 = vadd.xlane.f32.xlu0 %v301_v24 }
 0x198   : > { %362 = vrot.lane.b32.xlu0 %v861_v19, %s1075_s13  ;;  %s1009_s13 = scalar_lea.vmem %s1265_s8, 512 }
 0x199   : > { %p1010_p11 = scmp.ne.s32.totalorder %s1265_s8, %s1009_s13  ;;  %p1017_p1 = scmp.lt.s32.totalorder %s1015_s20, %s1009_s13 }
 0x19b   : > { %p1011_p12 = pnand %p1010_p11, %p1149_p5  ;;  %p1018_p2 = por %p1017_p1, %p1016_p0 }
 0x19d   : > { %p1012_p13 = pneg %p1011_p12 }
 0x19f   : > { %p1019_p3 = pnand %p1018_p2, %p1012_p13 }
 0x20b   : > { %v303_v27 = vpop.xlane.xlu0 %302 }
 0x20c   : > { %995 = vrcp.f32 %v303_v27 }
 0x20f   : > { %v363_v34 = vpop.permute.xlu0 %362 }
 0x219   : > { %v996_v28 = vpop.eup %995 }
 0x21a   : > { %v305_v30 = vmul.f32 %v996_v28, %v994_v23 }
 0x21c   : > { %v306_v32 = vpack.c.bf16 %v305_v30, %v305_v30  ;;  %718 = vst.msk [vmem:[%s1204_s27] sm:$0xff] %vm240_vm1, %v305_v30 }
 0x21e   : > { %899 = vmatmul.mubr.msk.bf16.vlgmr.msra.gmra.mxu1 %vm240_vm1, %v306_v32 }
 0x21f   : > { %903 = vmatpush3.bf16.xpose.msra.mxu1 %v370_v31  ;;  %904 = vmatprep.mubr.msk.bf16.mxu1 %vm1072_vm0, %v1071_v0 }
 0x220   : > { %914 = vmatprep.subr.bf16.mxu1 %v1071_v0 }
 0x226   : > { %905 = vmatmul.mubr.msk.bf16.vlgmr.msra.gmra.mxu1 %vm240_vm1, %v363_v34 }
 0x227   : > { %915 = vmatpush3.bf16.xpose.msra.mxu1 %v482_v36  ;;  %916 = vmatprep.mubr.msk.bf16.mxu1 %vm1072_vm0, %v1071_v0 }
 0x228   : > { %926 = vmatprep.subr.bf16.mxu1 %v1071_v0 }
 0x22e   : > { %917 = vmatmul.mubr.msk.bf16.vlgmr.msra.gmra.mxu1 %vm240_vm1, %v475_v35 }
 0x22f   : > { %927 = vmatpush3.bf16.xpose.msra.mxu1 %v594_v38  ;;  %928 = vmatprep.mubr.msk.bf16.mxu1 %vm1072_vm0, %v1071_v0 }
 0x236   : > { %929 = vmatmul.mubr.msk.bf16.vlgmr.msra.gmra.mxu1 %vm240_vm1, %v587_v39 }
 0x2de   : > { %v1222_v40 = vpop.f32.mrf.mxu1 }
 0x2e0   : > { %v900_v41 = vpop.f32.mrf.mxu1 }
 0x2e2   : > { %v356_v42 = vpop.f32.mrf.mxu1 }
 0x2e4   : > { %v901_v43 = vpop.f32.mrf.mxu1 }
 0x2e6   : > { %v406_v44 = vpop.f32.mrf.mxu1 }
 0x2e7   : > { %v412_v45 = vmul.f32 0.35355338, %v406_v44 }
 0x2e8   : > { %v906_v46 = vpop.f32.mrf.mxu1 }
 0x2e9   : > { %v413_v47 = vsel %vm293_vm3, -1e+10, %v412_v45 }
 0x2ea   : > { %v409_v48 = vpop.f32.mrf.mxu1  ;;  %v414_v49 = vsel %vm240_vm1, %v413_v47, -inf }
 0x2eb   : > { %415 = vmax.xlane.f32.xlu1 %v414_v49 }
 0x2ec   : > { %v907_v50 = vpop.f32.mrf.mxu1 }
 0x2ee   : > { %v518_v51 = vpop.f32.mrf.mxu1 }
 0x2ef   : > { %v524_v52 = vmul.f32 0.35355338, %v518_v51 }
 0x2f0   : > { %v918_v53 = vpop.f32.mrf.mxu1 }
 0x2f1   : > { %v525_v54 = vsel %vm293_vm3, -1e+10, %v524_v52 }
 0x2f2   : > { %v521_v55 = vpop.f32.mrf.mxu1  ;;  %v526_v56 = vsel %vm240_vm1, %v525_v54, -inf }
 0x2f3   : > { %527 = vmax.xlane.f32.xlu0 %v526_v56 }
 0x2f4   : > { %v919_v57 = vpop.f32.mrf.mxu1 }
 0x2f6   : > { %v630_v58 = vpop.f32.mrf.mxu1 }
 0x2f7   : > { %v636_v59 = vmul.f32 0.35355338, %v630_v58 }
 0x2f8   : > { %v930_v60 = vpop.f32.mrf.mxu1 }
 0x2f9   : > { %v637_v61 = vsel %vm293_vm3, -1e+10, %v636_v59 }
 0x2fa   : > { %v633_v62 = vpop.f32.mrf.mxu1  ;;  %v638_v63 = vsel %vm240_vm1, %v637_v61, -inf }
 0x2fb   : > { %639 = vmax.xlane.f32.xlu1 %v638_v63 }
 0x2fc   : > { %v931_v1 = vpop.f32.mrf.mxu1 }
 0x30c   : > { %426 = vrot.lane.b32.xlu1 %v1191_v18, %s1078_s29 }
 0x374   : > { %v416_v2 = vpop.xlane.xlu1 %415 }
 0x375   : > { %v417_v3 = vsub.f32 %v413_v47, %v416_v2 }
 0x377   : > { %v418_v4 = vmul.f32 1.442695, %v417_v3 }
 0x379   : > { %997 = vpow2.f32 %v418_v4 }
 0x37c   : > { %v528_v5 = vpop.xlane.xlu0 %527 }
 0x37d   : > { %v529_v6 = vsub.f32 %v525_v54, %v528_v5 }
 0x37f   : > { %v530_v7 = vmul.f32 1.442695, %v529_v6 }
 0x381   : > { %999 = vpow2.f32 %v530_v7 }
 0x384   : > { %v640_v8 = vpop.xlane.xlu1 %639 }
 0x385   : > { %v641_v9 = vsub.f32 %v637_v61, %v640_v8 }
 0x386   : > { %v998_v10 = vpop.eup %997 }
 0x387   : > { %v642_v11 = vmul.f32 1.442695, %v641_v9  ;;  %v420_v12 = vsel %vm240_vm1, %v998_v10, 0.0 }
 0x388   : > { %421 = vadd.xlane.f32.xlu0 %v420_v12  ;;  %v427_v13 = vpop.permute.xlu1 %426 }
 0x389   : > { %1001 = vpow2.f32 %v642_v11  ;;  %v432_v14 = vsel %vm315_vm4, %v427_v13, 0 }
 0x38a   : > { %909 = vmatpush3.bf16.msra.mxu0 %v432_v14 }
 0x38b   : > { %920 = vmatprep.subr.bf16.mxu0 %v1071_v0 }
 0x38e   : > { %v1000_v15 = vpop.eup %999 }
 0x38f   : > { %v532_v16 = vsel %vm240_vm1, %v1000_v15, 0.0 }
 0x390   : > { %533 = vadd.xlane.f32.xlu1 %v532_v16 }
 0x396   : > { %v1002_v17 = vpop.eup %1001 }
 0x397   : > { %v644_v19 = vsel %vm240_vm1, %v1002_v17, 0.0 }
 0x398   : > { %645 = vadd.xlane.f32.xlu0 %v644_v19 }
 0x3a1   : > { %650 = vrot.lane.b32.xlu1 %v1191_v18, %s1079_s30 }
 0x3ae   : > { %538 = vrot.lane.b32.xlu0 %v1191_v18, %s1080_s5 }
 0x411   : > { %v422_v20 = vpop.xlane.xlu0 %421 }
 0x412   : > { %1003 = vrcp.f32 %v422_v20 }
 0x419   : > { %v534_v21 = vpop.xlane.xlu1 %533 }
 0x41a   : > { %1005 = vrcp.f32 %v534_v21 }
 0x41d   : > { %v651_v28 = vpop.permute.xlu1 %650 }
 0x41e   : > { %v656_v31 = vsel %vm315_vm4, %v651_v28, 0 }
 0x41f   : > { %v1004_v22 = vpop.eup %1003 }
 0x420   : > { %v424_v23 = vmul.f32 %v1004_v22, %v998_v10 }
 0x421   : > { %v646_v24 = vpop.xlane.xlu0 %645 }
 0x422   : > { %1007 = vrcp.f32 %v646_v24  ;;  %v425_v25 = vpack.c.bf16 %v424_v23, %v424_v23  ;;  %719 = vst.msk [vmem:[%s1204_s27 + $0x8] sm:$0xff] %vm240_vm1, %v424_v23 }
 0x424   : > { %911 = vmatmul.mubr.msk.bf16.vlgmr.msra.gmra.mxu0 %vm240_vm1, %v425_v25 }
 0x425   : > { %v539_v26 = vpop.permute.xlu0 %538  ;;  %922 = vmatprep.mubr.msk.bf16.mxu0 %vm1072_vm0, %v1071_v0 }
 0x426   : > { %v544_v18 = vsel %vm315_vm4, %v539_v26, 0 }
 0x427   : > { %v1006_v27 = vpop.eup %1005  ;;  %921 = vmatpush3.bf16.msra.mxu0 %v544_v18 }
 0x428   : > { %v536_v29 = vmul.f32 %v1006_v27, %v1000_v15  ;;  %932 = vmatprep.subr.bf16.mxu0 %v1071_v0 }
 0x42a   : > { %v537_v30 = vpack.c.bf16 %v536_v29, %v536_v29  ;;  %720 = vst.msk [vmem:[%s1204_s27 + $0x10] sm:$0xff] %vm240_vm1, %v536_v29 }
 0x42c   : > { %923 = vmatmul.mubr.msk.bf16.vlgmr.msra.gmra.mxu0 %vm240_vm1, %v537_v30 }
 0x42d   : > { %933 = vmatpush3.bf16.msra.mxu0 %v656_v31  ;;  %934 = vmatprep.mubr.msk.bf16.mxu0 %vm1072_vm0, %v1071_v0 }
 0x42f   : > { %v1008_v32 = vpop.eup %1007 }
 0x430   : > { %v648_v33 = vmul.f32 %v1008_v32, %v1002_v17 }
 0x432   : > { %v649_v34 = vpack.c.bf16 %v648_v33, %v648_v33  ;;  %721 = vst.msk [vmem:[%s1204_s27 + $0x18] sm:$0xff] %vm240_vm1, %v648_v33 }
 0x434   : > { %935 = vmatmul.mubr.msk.bf16.vlgmr.msra.gmra.mxu0 %vm240_vm1, %v649_v34 }
 0x4e4   : > { %v468_v35 = vpop.f32.mrf.mxu0 }
 0x4e5   : > { %699 = vrot.lane.b32.xlu1 %v468_v35, %s1081_s6 }
 0x4e6   : > { %v912_v36 = vpop.f32.mrf.mxu0 }
 0x4e8   : > { %v471_v37 = vpop.f32.mrf.mxu0 }
 0x4ea   : > { %v913_v38 = vpop.f32.mrf.mxu0 }
 0x4ec   : > { %v580_v0 = vpop.f32.mrf.mxu0 }
 0x4ed   : > { %1022 = shalt.err (!%p1019_p3)
}
 0x4ee   : > { %s1023_s22 = scalar_lea.hbm %s1263_s11, 512  ;;  %s1027_s29 = scalar_lea.hbm %s1320_s4, 1024 }
 0x4ef   : > { %p1024_p4 = scmp.ne.s32.totalorder %s1263_s11, %s1023_s22  ;;  %p1028_p9 = scmp.lt.s32.totalorder %s1263_s11, %s1320_s4 }
 0x4f0   : > { %p1029_p10 = scmp.lt.s32.totalorder %s1027_s29, %s1023_s22 }
 0x4f1   : > { %p1025_p7 = pnand %p1024_p4, %p1149_p5 }
 0x4f2   : > { %p1030_p11 = por %p1029_p10, %p1028_p9 }
 0x4f3   : > { %p1026_p8 = pneg %p1025_p7 }
 0x4f5   : > { %p1031_p12 = pnand %p1030_p11, %p1026_p8 }
 0x4f7   : > { %1034 = shalt.err (!%p1031_p12)
}
 0x4f8   : > { %s1083_s7 = smov 128   ;;  %s1084_s9 = smov 16   ;;  %v924_v39 = vpop.f32.mrf.mxu0  ;;  %vm711_vm5 = vcmask 130048   ;;  %vm713_vm6 = vcmask 195584   ;;  %vm716_vm7 = vcmask 257024  }
 0x4f9   : > { %938 = dma.vmem_to_hbm [thread:$0]  (%p1149_p5), %s1265_s8, 512, %s1263_s11, %s1269_s12, %s1083_s7, %s1083_s7, %s1081_s6  }
 0x4fa   : > { %703 = vrot.lane.b32.xlu0 %v580_v0, %s1084_s9  ;;  %v583_v41 = vpop.f32.mrf.mxu0  ;;  %s1085_s10 = smov 24   ;;  %s234_s8 = scalar_lea.vmem %s1319_s3, %s1167_s28 }
 0x4fc   : > { %v925_v42 = vpop.f32.mrf.mxu0 }
 0x4fe   : > { %v692_v43 = vpop.f32.mrf.mxu0 }
 0x4ff   : > { %707 = vrot.lane.b32.xlu1 %v692_v43, %s1085_s10 }
 0x500   : > { %v936_v44 = vpop.f32.mrf.mxu0 }
 0x502   : > { %v695_v45 = vpop.f32.mrf.mxu0 }
 0x504   : > { %v937_v46 = vpop.f32.mrf.mxu0 }
 0x557   : > { %v700_v47 = vpop.permute.xlu1 %699 }
 0x558   : > { %v710_v49 = vsel %vm240_vm1, %v1222_v40, %v700_v47 }
 0x56c   : > { %v704_v48 = vpop.permute.xlu0 %703 }
 0x56d   : > { %v712_v50 = vsel %vm711_vm5, %v710_v49, %v704_v48 }
 0x571   : > { %v708_v51 = vpop.permute.xlu1 %707 }
 0x572   : > { %v714_v52 = vsel %vm713_vm6, %v712_v50, %v708_v51 }
 0x573   : > { %v715_v53 = vpack.c.bf16 %v714_v52, %v714_v52 }
 0x575   : > { %717 = vst.msk [vmem:[%s234_s8] sm:$0xf] %vm716_vm7, %v715_v53 }
 0x576 PF: > { %p944_p5 = scmp.ge.s32.totalorder %s1069_s18, 2  ;;  %s765_s11 = sand.u32 1, %s1057_s15  }
 0x577   : > { %s766_s12 = scalar_lea.sflag [#allocation3], %s765_s11 }
 0x578   : > { %p941_p13 = pnand %p944_p5, %p1153_p6 }
 0x57a   : > { %p942_p0 = pneg %p941_p13 }
 0x57c   : > { %1052 = dma.done.wait (%p942_p0), %s766_s12, 512  }
 0x57d   : > { %1054 = vsyncadd (%p942_p0), %s766_s12, 4294966784  ;;  %p15_p1 = scmp.ge.s32.totalorder %s1136_s21, 4   ;;  %s1323_s15 = smov %s1061_s16 }
 0x57e   : > { %s1324_s16 = smov %s1065_s17  ;;  %s1325_s17 = smov %s1147_s24 }
 0x57f   : > { %s1326_s18 = smov %s1136_s21  ;;  %17 = sbr.rel (!%p15_p1) target bundleno = 3 (0x3), region = 85 }
 0x584   :  { %771 = vsyncpa [#allocation3], 1 }
 0x585   :  { %773 = vsyncpa [#allocation3 + $0x1], 1 }

// kernel: decoder_forward.33
= control target key start
LH: loop header
LB: loop body
LE: loop exit
PB: predicated region body
PF: predicated region fallthrough
CT: control target
= control target key end

     0   :  { %v170_v1 = vmov 0.0   ;;  %vm171_vm0 = vmmov 0   ;;  %vm20_vm1 = vcmask 162816   ;;  %s219_s0 = inlined_call_operand.vmem [shape: f32[16,32], index: 0, kind: input, shape index: {}]   ;;  %s220_s1 = inlined_call_operand.vmem [shape: bf16[32,20], index: 1, kind: input, shape index: {}]   ;;  %s221_s2 = inlined_call_operand.vmem [shape: f32[1,20], index: 2, kind: input, shape index: {}]   ;;  %s222_s3 = inlined_call_operand.hbm [shape: f32[16,20], index: 3, kind: output, shape index: {}]  }
   0x1   :  { %v146_v0 = vld [vmem:[%s220_s1 + $0x8] sm:$0xff]   ;;  %133 = vmatprep.subr.bf16.mxu0 %v170_v1  ;;  %v147_v2 = vld [vmem:[%s220_s1] sm:$0xff]   ;;  %137 = vmatprep.mubr.msk.bf16.mxu0 %vm171_vm0, %v170_v1 }
   0x2   :  { %134 = vmatpush3.bf16.msra.mxu0 %v146_v0  ;;  %v25_v3 = vld [vmem:[%s219_s0] sm:$0xff]  ;;  %v26_v4 = vld [vmem:[%s219_s0 + $0x8] sm:$0xff] }
   0x3   :  { %8 = vsyncpa [#allocation4], 0  ;;  %135 = vmatprep.subr.bf16.mxu0 %v170_v1  ;;  %21 = vst.msk [vmem:[#allocation2] sm:$0xff] %vm20_vm1, %v170_v1  ;;  %v27_v5 = vpack.c.bf16 %v26_v4, %v25_v3  ;;  %vm44_vm2 = vcmask 261120   ;;  %v129_v14 = vld [vmem:[%s221_s2] ss:$0 sm:$0xff] }
   0x4   :  { %22 = vst.msk [vmem:[#allocation2 + $0x8] sm:$0xff] %vm20_vm1, %v170_v1  ;;  %s172_s20 = smov [#allocation3]  }
   0x5   :  { %s115_s21 = sshll.u32 %s172_s20, 4  ;;  %s116_s21 = int_to_ptr.vmem [resolvable:$true] %s115_s21 }
   0x6   :  { %136 = vmatpush3.bf16.msra.mxu0 %v147_v2  ;;  %s148_s22 = scalar_lea.vmem %s116_s21, 256  ;;  %p153_p1 = scmp.lt.s32.totalorder %s116_s21, %s116_s21 }
   0x7   :  { %p149_p0 = scmp.ne.s32.totalorder %s116_s21, %s148_s22  ;;  %p154_p2 = scmp.lt.s32.totalorder %s148_s22, %s148_s22 }
   0x9   :  { %138 = vmatmul.mubr.msk.bf16.vlgmr.msra.gmra.mxu0 %vm44_vm2, %v27_v5  ;;  %p155_p3 = por %p154_p2, %p153_p1 }
   0xa   :  { %v23_v6 = vld [vmem:[#allocation2] sm:$0xff] }
   0xb   :  { %v24_v10 = vld [vmem:[#allocation2 + $0x8] sm:$0xff]  ;;  %p156_p4 = pnand %p155_p3, %p149_p0 }
  0xc9   :  { %v82_v7 = vpop.f32.mrf.mxu0 }
  0xca   :  { %v89_v8 = vadd.f32 %v82_v7, %v23_v6 }
  0xcb   :  { %v139_v9 = vpop.f32.mrf.mxu0 }
  0xcc   :  { %92 = vst.msk [vmem:[#allocation2] sm:$0xff] %vm20_vm1, %v89_v8 }
  0xcd   :  { %v85_v11 = vpop.f32.mrf.mxu0 }
  0xce   :  { %v90_v12 = vadd.f32 %v85_v11, %v24_v10 }
  0xcf   :  { %v140_v13 = vpop.f32.mrf.mxu0 }
  0xd0   :  { %93 = vst.msk [vmem:[#allocation2 + $0x8] sm:$0xff] %vm20_vm1, %v90_v12 }
  0xd3   :  { %v97_v15 = vld [vmem:[#allocation2] sm:$0xff] }
  0xd4   :  { %v106_v16 = vadd.f32 %v129_v14, %v97_v15 }
  0xd6   :  { %108 = vst.msk [vmem:[#allocation3] sm:$0xff] %vm20_vm1, %v106_v16 }
  0xd7   :  { %v98_v17 = vld [vmem:[#allocation2 + $0x8] sm:$0xff] }
  0xd8   :  { %v107_v18 = vadd.f32 %v129_v14, %v98_v17 }
  0xda   :  { %109 = vst.msk [vmem:[#allocation3 + $0x8] sm:$0xff] %vm20_vm1, %v107_v18 }
  0xdb   :  { %159 = shalt.err (!%p156_p4)
}
  0xdc   :  { %s173_s23 = smov 128   ;;  %s174_s2 = smov 8  }
  0xdd   :  { %121 = dma.vmem_to_hbm [thread:$0]  %s116_s21, 256, %s222_s3, [#allocation4], %s173_s23, %s173_s23, %s174_s2  }
  0xde   :  { %168 = dma.done.wait [#allocation4], 256  }
  0xdf   :  { %169 = vsyncadd [#allocation4], 4294967040 }
  0xe0   :  { %125 = vsyncpa [#allocation4], 1 }

</bundles_post_ra>
